<compile_context>
chip_gen: v5e
topology: v5e:2x2
jax: 0.10.0
libtpu: 0.0.40
codegen_flags: <defaults>
</compile_context>

<pallas_src>
import math

import jax
import jax.numpy as jnp
from jax import lax
from jax.experimental import pallas as pl
from jax.experimental.pallas import tpu as pltpu

# ----------------------- model hyper-parameters ("param" module) ------------
SRC_VOCAB = 16      # param.src_vocab_size
TGT_VOCAB = 16      # param.tgt_vocab_size
D_MODEL   = 32      # param.embed_dim
D_FF      = 64      # feed-forward hidden dim
D_K = D_V = 16      # per-head dims
N_HEADS   = 2
N_LAYERS  = 2
SRC_LEN   = 8
TGT_LEN   = 8
BATCH     = 2
PAD_ID    = 0
LN_EPS    = 1e-5    # PyTorch nn.LayerNorm default

HDK = N_HEADS * D_K
HDV = N_HEADS * D_V
SCALE = 1.0 / math.sqrt(D_K)

# Order in which the stacked parameter arrays are passed to the fused kernel.
PARAM_ORDER = (
    # encoder (stacked over N_LAYERS)
    "e_wqkv", "e_wo", "e_bo", "e_ln1g", "e_ln1b",
    "e_w1", "e_b1", "e_w2", "e_b2", "e_ln2g", "e_ln2b",
    # decoder (stacked over N_LAYERS)
    "d_wqkv", "d_wo1", "d_bo1", "d_ln1g", "d_ln1b",
    "d_wq", "d_wkv", "d_wo2", "d_bo2", "d_ln2g", "d_ln2b",
    "d_w1", "d_b1", "d_w2", "d_b2", "d_ln3g", "d_ln3b",
    # final vocabulary projection (bias=False)
    "proj",
)


# ----------------------------- in-kernel helpers ----------------------------
def _layernorm(y, g, b):
    mu = jnp.mean(y, axis=-1, keepdims=True)
    var = jnp.mean(jnp.square(y - mu), axis=-1, keepdims=True)
    return (y - mu) * lax.rsqrt(var + LN_EPS) * g + b


def _mha(q, k, v, bias, wo, bo, g, b, x_res):
    """All-head attention + output proj + residual + LayerNorm (all rows at once).

    q:(Rq,HDK) k:(Rk,HDK) v:(Rk,HDV) f32; bias:(Rq,Rk) additive f32 (block-
    diagonal over batch); wo:(HDV,D) bf16; bo/g/b:(1,D) f32; x_res:(Rq,D) f32.
    Each head's context is folded straight into the output projection, so no
    lane-axis concatenate is needed.
    """
    out = jnp.zeros((q.shape[0], D_MODEL), jnp.float32)
    for h in range(N_HEADS):                       # static, tiny head count
        qh = q[:, h * D_K:(h + 1) * D_K].astype(jnp.bfloat16)
        kh = k[:, h * D_K:(h + 1) * D_K].astype(jnp.bfloat16)
        vh = v[:, h * D_V:(h + 1) * D_V].astype(jnp.bfloat16)
        # q . k^T without an explicit transpose: contract on the head dim.
        s = lax.dot_general(qh, kh, (((1,), (1,)), ((), ())),
                            preferred_element_type=jnp.float32)
        s = s * SCALE + bias
        s_max = jnp.max(s, axis=-1, keepdims=True)
        p = jnp.exp(s - s_max)
        p = p * pl.reciprocal(jnp.sum(p, axis=-1, keepdims=True), approx=True)
        ctx = jnp.dot(p.astype(jnp.bfloat16), vh,
                      preferred_element_type=jnp.float32)
        out = out + jnp.dot(ctx.astype(jnp.bfloat16),
                            wo[h * D_V:(h + 1) * D_V, :],
                            preferred_element_type=jnp.float32)
    return _layernorm(out + bo + x_res, g, b)


def _ffn(x, w1, b1, w2, b2, g, b):
    h = jnp.dot(x.astype(jnp.bfloat16), w1,
                preferred_element_type=jnp.float32) + b1
    h = jnp.maximum(h, 0.0)                        # ReLU
    out = jnp.dot(h.astype(jnp.bfloat16), w2,
                  preferred_element_type=jnp.float32) + b2
    return _layernorm(out + x, g, b)


# --------------------------- the single fused kernel ------------------------
def _transformer_kernel(enc_x_ref, dec_x_ref,
                        enc_bias_ref, dec_self_bias_ref, dec_enc_bias_ref,
                        *rest):
    logits_ref = rest[-1]
    prm = dict(zip(PARAM_ORDER, rest[:-1]))

    enc_x = enc_x_ref[...]                    # (B*Ls, D) f32
    dec_x = dec_x_ref[...]                    # (B*Lt, D) f32
    enc_bias = enc_bias_ref[...]              # (B*Ls, B*Ls) additive f32
    dec_self_bias = dec_self_bias_ref[...]    # (B*Lt, B*Lt)
    dec_enc_bias = dec_enc_bias_ref[...]      # (B*Lt, B*Ls)

    # -------------------- encoder stack --------------------
    for l in range(N_LAYERS):
        xb = enc_x.astype(jnp.bfloat16)
        qkv = jnp.dot(xb, prm["e_wqkv"][l], preferred_element_type=jnp.float32)
        enc_x = _mha(qkv[:, :HDK], qkv[:, HDK:2 * HDK], qkv[:, 2 * HDK:],
                     enc_bias, prm["e_wo"][l], prm["e_bo"][l],
                     prm["e_ln1g"][l], prm["e_ln1b"][l], enc_x)
        enc_x = _ffn(enc_x, prm["e_w1"][l], prm["e_b1"][l],
                     prm["e_w2"][l], prm["e_b2"][l],
                     prm["e_ln2g"][l], prm["e_ln2b"][l])

    enc_kv_in = enc_x.astype(jnp.bfloat16)    # reused by every cross-attention

    # -------------------- decoder stack --------------------
    for l in range(N_LAYERS):
        # masked self-attention
        xb = dec_x.astype(jnp.bfloat16)
        qkv = jnp.dot(xb, prm["d_wqkv"][l], preferred_element_type=jnp.float32)
        dec_x = _mha(qkv[:, :HDK], qkv[:, HDK:2 * HDK], qkv[:, 2 * HDK:],
                     dec_self_bias, prm["d_wo1"][l], prm["d_bo1"][l],
                     prm["d_ln1g"][l], prm["d_ln1b"][l], dec_x)
        # encoder-decoder cross-attention
        q = jnp.dot(dec_x.astype(jnp.bfloat16), prm["d_wq"][l],
                    preferred_element_type=jnp.float32)
        kv = jnp.dot(enc_kv_in, prm["d_wkv"][l],
                     preferred_element_type=jnp.float32)
        dec_x = _mha(q, kv[:, :HDK], kv[:, HDK:],
                     dec_enc_bias, prm["d_wo2"][l], prm["d_bo2"][l],
                     prm["d_ln2g"][l], prm["d_ln2b"][l], dec_x)
        # position-wise feed-forward
        dec_x = _ffn(dec_x, prm["d_w1"][l], prm["d_b1"][l],
                     prm["d_w2"][l], prm["d_b2"][l],
                     prm["d_ln3g"][l], prm["d_ln3b"][l])

    # ------------- final vocabulary projection (bias=False) -------------
    logits_ref[...] = jnp.dot(dec_x.astype(jnp.bfloat16), prm["proj"][...],
                              preferred_element_type=jnp.float32)


# ------------------------------- JAX glue ------------------------------------
# TODO(synk): token-embedding gather, sinusoidal positional table and mask
# construction stay as plain-JAX glue (no clean Pallas win at these sizes).
def sinusoid_table(n_pos, d_model):
    pos = jnp.arange(n_pos, dtype=jnp.float32)[:, None]
    i = jnp.arange(d_model)[None, :]
    angle = pos / jnp.power(10000.0, (2.0 * (i // 2)).astype(jnp.float32) / d_model)
    return jnp.where(i % 2 == 0, jnp.sin(angle), jnp.cos(angle))


def flat_attn_bias(seq_q, seq_k, causal=False):
    """Additive bias over the flattened (B*Lq, B*Lk) score matrix.

    0 where (same batch) & (key not PAD) [& causal], else -1e9.  The block-
    diagonal structure lets the kernel treat batch as extra rows (no batch
    grid, no batched dot_general).
    """
    B, Lq = seq_q.shape
    Lk = seq_k.shape[1]
    ok = jnp.eye(B, dtype=bool)[:, None, :, None]                # same-batch
    ok = jnp.logical_and(ok, (seq_k != PAD_ID)[None, None, :, :])
    if causal:
        tri = jnp.arange(Lq)[:, None] >= jnp.arange(Lk)[None, :]
        ok = jnp.logical_and(ok, tri[None, :, None, :])
    ok = jnp.broadcast_to(ok, (B, Lq, B, Lk))
    bias = jnp.where(ok, 0.0, -1e9).astype(jnp.float32)
    return bias.reshape(B * Lq, B * Lk)


def transformer(params, enc_inputs, dec_inputs):
    B, Ls = enc_inputs.shape
    Lt = dec_inputs.shape[1]

    enc_x = (params["src_emb"][enc_inputs]
             + sinusoid_table(Ls, D_MODEL)[None]).reshape(B * Ls, D_MODEL)
    dec_x = (params["tgt_emb"][dec_inputs]
             + sinusoid_table(Lt, D_MODEL)[None]).reshape(B * Lt, D_MODEL)

    enc_bias = flat_attn_bias(enc_inputs, enc_inputs)
    dec_self_bias = flat_attn_bias(dec_inputs, dec_inputs, causal=True)
    dec_enc_bias = flat_attn_bias(dec_inputs, enc_inputs)

    args = (enc_x, dec_x, enc_bias, dec_self_bias, dec_enc_bias,
            *[params[k] for k in PARAM_ORDER])
    vmem = pl.BlockSpec(memory_space=pltpu.MemorySpace.VMEM)
    logits = pl.pallas_call(
        _transformer_kernel,
        out_shape=jax.ShapeDtypeStruct((B * Lt, TGT_VOCAB), jnp.float32),
        in_specs=[vmem] * len(args),
        out_specs=vmem,
    )(*args)
    return logits                                  # (B*tgt_len, tgt_vocab)


# ----------------------------- parameter init --------------------------------
def init_params(key):
    keys = iter(jax.random.split(key, 64))

    def w(shape, scale=0.1):
        # matmul weights pre-cast to bf16 (halves weight DMA, no in-kernel casts)
        return (jax.random.normal(next(keys), shape, jnp.float32)
                * scale).astype(jnp.bfloat16)

    def zeros(shape):
        return jnp.zeros(shape, jnp.float32)

    def ones(shape):
        return jnp.ones(shape, jnp.float32)

    L = N_LAYERS
    return dict(
        src_emb=jax.random.normal(next(keys), (SRC_VOCAB, D_MODEL), jnp.float32),
        tgt_emb=jax.random.normal(next(keys), (TGT_VOCAB, D_MODEL), jnp.float32),
        # ----- encoder (stacked over layers) -----
        e_wqkv=w((L, D_MODEL, 2 * HDK + HDV)),
        e_wo=w((L, HDV, D_MODEL)),
        e_bo=zeros((L, 1, D_MODEL)),
        e_ln1g=ones((L, 1, D_MODEL)), e_ln1b=zeros((L, 1, D_MODEL)),
        e_w1=w((L, D_MODEL, D_FF)), e_b1=zeros((L, 1, D_FF)),
        e_w2=w((L, D_FF, D_MODEL)), e_b2=zeros((L, 1, D_MODEL)),
        e_ln2g=ones((L, 1, D_MODEL)), e_ln2b=zeros((L, 1, D_MODEL)),
        # ----- decoder (stacked over layers) -----
        d_wqkv=w((L, D_MODEL, 2 * HDK + HDV)),
        d_wo1=w((L, HDV, D_MODEL)),
        d_bo1=zeros((L, 1, D_MODEL)),
        d_ln1g=ones((L, 1, D_MODEL)), d_ln1b=zeros((L, 1, D_MODEL)),
        d_wq=w((L, D_MODEL, HDK)),
        d_wkv=w((L, D_MODEL, HDK + HDV)),
        d_wo2=w((L, HDV, D_MODEL)),
        d_bo2=zeros((L, 1, D_MODEL)),
        d_ln2g=ones((L, 1, D_MODEL)), d_ln2b=zeros((L, 1, D_MODEL)),
        d_w1=w((L, D_MODEL, D_FF)), d_b1=zeros((L, 1, D_FF)),
        d_w2=w((L, D_FF, D_MODEL)), d_b2=zeros((L, 1, D_MODEL)),
        d_ln3g=ones((L, 1, D_MODEL)), d_ln3b=zeros((L, 1, D_MODEL)),
        # ----- final projection (bias=False) -----
        proj=w((D_MODEL, TGT_VOCAB)),
    )


# --------------------------------- main ---------------------------------------
if __name__ == "__main__":
    key = jax.random.PRNGKey(0)
    pkey, ekey, dkey = jax.random.split(key, 3)
    params = init_params(pkey)

    enc_inputs = jax.random.randint(ekey, (BATCH, SRC_LEN), 1, SRC_VOCAB)
    dec_inputs = jax.random.randint(dkey, (BATCH, TGT_LEN), 1, TGT_VOCAB)
    # introduce some PAD tokens so the pad masks are exercised
    enc_inputs = enc_inputs.at[:, -1].set(PAD_ID)
    dec_inputs = dec_inputs.at[:, -1].set(PAD_ID)

    logits = jax.jit(transformer)(params, enc_inputs, dec_inputs)
    logits = jax.block_until_ready(logits)

    assert logits.shape == (BATCH * TGT_LEN, TGT_VOCAB), logits.shape
    assert bool(jnp.all(jnp.isfinite(logits)))
    print("KERNEL_OK")
</pallas_src>

<mosaic_0001>
module attributes {stable_mosaic.version = 11 : i64} {
  func.func @_transformer_kernel(%arg0: memref<16x32xf32, #tpu.memory_space<vmem>>, %arg1: memref<16x32xf32, #tpu.memory_space<vmem>>, %arg2: memref<16x16xf32, #tpu.memory_space<vmem>>, %arg3: memref<16x16xf32, #tpu.memory_space<vmem>>, %arg4: memref<16x16xf32, #tpu.memory_space<vmem>>, %arg5: memref<2x32x96xbf16, #tpu.memory_space<vmem>>, %arg6: memref<2x32x32xbf16, #tpu.memory_space<vmem>>, %arg7: memref<2x1x32xf32, #tpu.memory_space<vmem>>, %arg8: memref<2x1x32xf32, #tpu.memory_space<vmem>>, %arg9: memref<2x1x32xf32, #tpu.memory_space<vmem>>, %arg10: memref<2x32x64xbf16, #tpu.memory_space<vmem>>, %arg11: memref<2x1x64xf32, #tpu.memory_space<vmem>>, %arg12: memref<2x64x32xbf16, #tpu.memory_space<vmem>>, %arg13: memref<2x1x32xf32, #tpu.memory_space<vmem>>, %arg14: memref<2x1x32xf32, #tpu.memory_space<vmem>>, %arg15: memref<2x1x32xf32, #tpu.memory_space<vmem>>, %arg16: memref<2x32x96xbf16, #tpu.memory_space<vmem>>, %arg17: memref<2x32x32xbf16, #tpu.memory_space<vmem>>, %arg18: memref<2x1x32xf32, #tpu.memory_space<vmem>>, %arg19: memref<2x1x32xf32, #tpu.memory_space<vmem>>, %arg20: memref<2x1x32xf32, #tpu.memory_space<vmem>>, %arg21: memref<2x32x32xbf16, #tpu.memory_space<vmem>>, %arg22: memref<2x32x64xbf16, #tpu.memory_space<vmem>>, %arg23: memref<2x32x32xbf16, #tpu.memory_space<vmem>>, %arg24: memref<2x1x32xf32, #tpu.memory_space<vmem>>, %arg25: memref<2x1x32xf32, #tpu.memory_space<vmem>>, %arg26: memref<2x1x32xf32, #tpu.memory_space<vmem>>, %arg27: memref<2x32x64xbf16, #tpu.memory_space<vmem>>, %arg28: memref<2x1x64xf32, #tpu.memory_space<vmem>>, %arg29: memref<2x64x32xbf16, #tpu.memory_space<vmem>>, %arg30: memref<2x1x32xf32, #tpu.memory_space<vmem>>, %arg31: memref<2x1x32xf32, #tpu.memory_space<vmem>>, %arg32: memref<2x1x32xf32, #tpu.memory_space<vmem>>, %arg33: memref<32x16xbf16, #tpu.memory_space<vmem>>, %arg34: memref<16x16xf32, #tpu.memory_space<vmem>>) attributes {dimension_semantics = [], scalar_prefetch = 0 : i64, scratch_operands = 0 : i64, tpu.core_type = #tpu.core_type<tc>} {
    %c0 = arith.constant 0 : index
    %c0_0 = arith.constant 0 : index
    %0 = vector.load %arg0[%c0, %c0_0] : memref<16x32xf32, #tpu.memory_space<vmem>>, vector<16x32xf32>
    %c0_1 = arith.constant 0 : index
    %c0_2 = arith.constant 0 : index
    %1 = vector.load %arg1[%c0_1, %c0_2] : memref<16x32xf32, #tpu.memory_space<vmem>>, vector<16x32xf32>
    %c0_3 = arith.constant 0 : index
    %c0_4 = arith.constant 0 : index
    %2 = vector.load %arg2[%c0_3, %c0_4] : memref<16x16xf32, #tpu.memory_space<vmem>>, vector<16x16xf32>
    %c0_5 = arith.constant 0 : index
    %c0_6 = arith.constant 0 : index
    %3 = vector.load %arg3[%c0_5, %c0_6] : memref<16x16xf32, #tpu.memory_space<vmem>>, vector<16x16xf32>
    %c0_7 = arith.constant 0 : index
    %c0_8 = arith.constant 0 : index
    %4 = vector.load %arg4[%c0_7, %c0_8] : memref<16x16xf32, #tpu.memory_space<vmem>>, vector<16x16xf32>
    %5 = arith.truncf %0 : vector<16x32xf32> to vector<16x32xbf16>
    %c0_9 = arith.constant 0 : index
    %c0_10 = arith.constant 0 : index
    %c0_11 = arith.constant 0 : index
    %6 = vector.load %arg5[%c0_9, %c0_10, %c0_11] : memref<2x32x96xbf16, #tpu.memory_space<vmem>>, vector<1x32x96xbf16>
    %7 = vector.shape_cast %6 : vector<1x32x96xbf16> to vector<32x96xbf16>
    %cst = arith.constant dense<0.000000e+00> : vector<16x96xf32>
    %8 = tpu.matmul %5, %7, %cst {dimension_numbers = #tpu.dot_dimension_numbers<[1], [0], [0], [1], [0, 0, 1, 1], [], []>} : vector<16x32xbf16>, vector<32x96xbf16>, vector<16x96xf32> -> vector<16x96xf32>
    %9 = vector.extract_strided_slice %8 {offsets = [0, 0], sizes = [16, 32], strides = [1, 1]} : vector<16x96xf32> to vector<16x32xf32>
    %10 = vector.extract_strided_slice %8 {offsets = [0, 32], sizes = [16, 32], strides = [1, 1]} : vector<16x96xf32> to vector<16x32xf32>
    %11 = vector.extract_strided_slice %8 {offsets = [0, 64], sizes = [16, 32], strides = [1, 1]} : vector<16x96xf32> to vector<16x32xf32>
    %c0_12 = arith.constant 0 : index
    %c0_13 = arith.constant 0 : index
    %c0_14 = arith.constant 0 : index
    %12 = vector.load %arg6[%c0_12, %c0_13, %c0_14] : memref<2x32x32xbf16, #tpu.memory_space<vmem>>, vector<1x32x32xbf16>
    %13 = vector.shape_cast %12 : vector<1x32x32xbf16> to vector<32x32xbf16>
    %c0_15 = arith.constant 0 : index
    %c0_16 = arith.constant 0 : index
    %c0_17 = arith.constant 0 : index
    %14 = vector.load %arg7[%c0_15, %c0_16, %c0_17] : memref<2x1x32xf32, #tpu.memory_space<vmem>>, vector<1x1x32xf32>
    %15 = vector.shape_cast %14 : vector<1x1x32xf32> to vector<1x32xf32>
    %c0_18 = arith.constant 0 : index
    %c0_19 = arith.constant 0 : index
    %c0_20 = arith.constant 0 : index
    %16 = vector.load %arg8[%c0_18, %c0_19, %c0_20] : memref<2x1x32xf32, #tpu.memory_space<vmem>>, vector<1x1x32xf32>
    %17 = vector.shape_cast %16 : vector<1x1x32xf32> to vector<1x32xf32>
    %c0_21 = arith.constant 0 : index
    %c0_22 = arith.constant 0 : index
    %c0_23 = arith.constant 0 : index
    %18 = vector.load %arg9[%c0_21, %c0_22, %c0_23] : memref<2x1x32xf32, #tpu.memory_space<vmem>>, vector<1x1x32xf32>
    %19 = vector.shape_cast %18 : vector<1x1x32xf32> to vector<1x32xf32>
    %cst_24 = arith.constant 0.000000e+00 : f32
    %20 = vector.broadcast %cst_24 : f32 to vector<16x32xf32>
    %21 = vector.extract_strided_slice %9 {offsets = [0, 0], sizes = [16, 16], strides = [1, 1]} : vector<16x32xf32> to vector<16x16xf32>
    %22 = arith.truncf %21 : vector<16x16xf32> to vector<16x16xbf16>
    %23 = vector.extract_strided_slice %10 {offsets = [0, 0], sizes = [16, 16], strides = [1, 1]} : vector<16x32xf32> to vector<16x16xf32>
    %24 = arith.truncf %23 : vector<16x16xf32> to vector<16x16xbf16>
    %25 = vector.extract_strided_slice %11 {offsets = [0, 0], sizes = [16, 16], strides = [1, 1]} : vector<16x32xf32> to vector<16x16xf32>
    %26 = arith.truncf %25 : vector<16x16xf32> to vector<16x16xbf16>
    %cst_25 = arith.constant dense<0.000000e+00> : vector<16x16xf32>
    %27 = tpu.matmul %22, %24, %cst_25 {dimension_numbers = #tpu.dot_dimension_numbers<[1], [1], [0], [0], [0, 0, 1, 0], [], []>} : vector<16x16xbf16>, vector<16x16xbf16>, vector<16x16xf32> -> vector<16x16xf32>
    %cst_26 = arith.constant 2.500000e-01 : f32
    %28 = vector.broadcast %cst_26 : f32 to vector<16x16xf32>
    %29 = arith.mulf %27, %28 : vector<16x16xf32>
    %30 = arith.addf %29, %2 : vector<16x16xf32>
    %cst_27 = arith.constant dense<0xFF800000> : vector<16xf32>
    %31 = vector.multi_reduction <maximumf>, %30, %cst_27 [1] : vector<16x16xf32> to vector<16xf32>
    %32 = vector.shape_cast %31 : vector<16xf32> to vector<16x1xf32>
    %33 = vector.broadcast %32 : vector<16x1xf32> to vector<16x16xf32>
    %34 = arith.subf %30, %33 : vector<16x16xf32>
    %35 = math.exp %34 : vector<16x16xf32>
    %cst_28 = arith.constant dense<0.000000e+00> : vector<16xf32>
    %36 = vector.multi_reduction <add>, %35, %cst_28 [1] : vector<16x16xf32> to vector<16xf32>
    %37 = vector.shape_cast %36 : vector<16xf32> to vector<16x1xf32>
    %38 = tpu.reciprocal %37 {approx = true} : vector<16x1xf32> -> vector<16x1xf32>
    %39 = vector.broadcast %38 : vector<16x1xf32> to vector<16x16xf32>
    %40 = arith.mulf %35, %39 : vector<16x16xf32>
    %41 = arith.truncf %40 : vector<16x16xf32> to vector<16x16xbf16>
    %cst_29 = arith.constant dense<0.000000e+00> : vector<16x16xf32>
    %42 = tpu.matmul %41, %26, %cst_29 {dimension_numbers = #tpu.dot_dimension_numbers<[1], [0], [0], [1], [0, 0, 1, 1], [], []>} : vector<16x16xbf16>, vector<16x16xbf16>, vector<16x16xf32> -> vector<16x16xf32>
    %43 = arith.truncf %42 : vector<16x16xf32> to vector<16x16xbf16>
    %44 = vector.extract_strided_slice %13 {offsets = [0, 0], sizes = [16, 32], strides = [1, 1]} : vector<32x32xbf16> to vector<16x32xbf16>
    %cst_30 = arith.constant dense<0.000000e+00> : vector<16x32xf32>
    %45 = tpu.matmul %43, %44, %cst_30 {dimension_numbers = #tpu.dot_dimension_numbers<[1], [0], [0], [1], [0, 0, 1, 1], [], []>} : vector<16x16xbf16>, vector<16x32xbf16>, vector<16x32xf32> -> vector<16x32xf32>
    %46 = arith.addf %20, %45 : vector<16x32xf32>
    %47 = vector.extract_strided_slice %9 {offsets = [0, 16], sizes = [16, 16], strides = [1, 1]} : vector<16x32xf32> to vector<16x16xf32>
    %48 = arith.truncf %47 : vector<16x16xf32> to vector<16x16xbf16>
    %49 = vector.extract_strided_slice %10 {offsets = [0, 16], sizes = [16, 16], strides = [1, 1]} : vector<16x32xf32> to vector<16x16xf32>
    %50 = arith.truncf %49 : vector<16x16xf32> to vector<16x16xbf16>
    %51 = vector.extract_strided_slice %11 {offsets = [0, 16], sizes = [16, 16], strides = [1, 1]} : vector<16x32xf32> to vector<16x16xf32>
    %52 = arith.truncf %51 : vector<16x16xf32> to vector<16x16xbf16>
    %cst_31 = arith.constant dense<0.000000e+00> : vector<16x16xf32>
    %53 = tpu.matmul %48, %50, %cst_31 {dimension_numbers = #tpu.dot_dimension_numbers<[1], [1], [0], [0], [0, 0, 1, 0], [], []>} : vector<16x16xbf16>, vector<16x16xbf16>, vector<16x16xf32> -> vector<16x16xf32>
    %cst_32 = arith.constant 2.500000e-01 : f32
    %54 = vector.broadcast %cst_32 : f32 to vector<16x16xf32>
    %55 = arith.mulf %53, %54 : vector<16x16xf32>
    %56 = arith.addf %55, %2 : vector<16x16xf32>
    %cst_33 = arith.constant dense<0xFF800000> : vector<16xf32>
    %57 = vector.multi_reduction <maximumf>, %56, %cst_33 [1] : vector<16x16xf32> to vector<16xf32>
    %58 = vector.shape_cast %57 : vector<16xf32> to vector<16x1xf32>
    %59 = vector.broadcast %58 : vector<16x1xf32> to vector<16x16xf32>
    %60 = arith.subf %56, %59 : vector<16x16xf32>
    %61 = math.exp %60 : vector<16x16xf32>
    %cst_34 = arith.constant dense<0.000000e+00> : vector<16xf32>
    %62 = vector.multi_reduction <add>, %61, %cst_34 [1] : vector<16x16xf32> to vector<16xf32>
    %63 = vector.shape_cast %62 : vector<16xf32> to vector<16x1xf32>
    %64 = tpu.reciprocal %63 {approx = true} : vector<16x1xf32> -> vector<16x1xf32>
    %65 = vector.broadcast %64 : vector<16x1xf32> to vector<16x16xf32>
    %66 = arith.mulf %61, %65 : vector<16x16xf32>
    %67 = arith.truncf %66 : vector<16x16xf32> to vector<16x16xbf16>
    %cst_35 = arith.constant dense<0.000000e+00> : vector<16x16xf32>
    %68 = tpu.matmul %67, %52, %cst_35 {dimension_numbers = #tpu.dot_dimension_numbers<[1], [0], [0], [1], [0, 0, 1, 1], [], []>} : vector<16x16xbf16>, vector<16x16xbf16>, vector<16x16xf32> -> vector<16x16xf32>
    %69 = arith.truncf %68 : vector<16x16xf32> to vector<16x16xbf16>
    %70 = vector.extract_strided_slice %13 {offsets = [16, 0], sizes = [16, 32], strides = [1, 1]} : vector<32x32xbf16> to vector<16x32xbf16>
    %cst_36 = arith.constant dense<0.000000e+00> : vector<16x32xf32>
    %71 = tpu.matmul %69, %70, %cst_36 {dimension_numbers = #tpu.dot_dimension_numbers<[1], [0], [0], [1], [0, 0, 1, 1], [], []>} : vector<16x16xbf16>, vector<16x32xbf16>, vector<16x32xf32> -> vector<16x32xf32>
    %72 = arith.addf %46, %71 : vector<16x32xf32>
    %73 = vector.broadcast %15 : vector<1x32xf32> to vector<16x32xf32>
    %74 = arith.addf %72, %73 : vector<16x32xf32>
    %75 = arith.addf %74, %0 : vector<16x32xf32>
    %cst_37 = arith.constant dense<0.000000e+00> : vector<16xf32>
    %76 = vector.multi_reduction <add>, %75, %cst_37 [1] : vector<16x32xf32> to vector<16xf32>
    %77 = vector.shape_cast %76 : vector<16xf32> to vector<16x1xf32>
    %cst_38 = arith.constant 3.200000e+01 : f32
    %78 = vector.broadcast %cst_38 : f32 to vector<16x1xf32>
    %79 = arith.divf %77, %78 : vector<16x1xf32>
    %80 = vector.broadcast %79 : vector<16x1xf32> to vector<16x32xf32>
    %81 = arith.subf %75, %80 : vector<16x32xf32>
    %82 = arith.mulf %81, %81 : vector<16x32xf32>
    %cst_39 = arith.constant dense<0.000000e+00> : vector<16xf32>
    %83 = vector.multi_reduction <add>, %82, %cst_39 [1] : vector<16x32xf32> to vector<16xf32>
    %84 = vector.shape_cast %83 : vector<16xf32> to vector<16x1xf32>
    %cst_40 = arith.constant 3.200000e+01 : f32
    %85 = vector.broadcast %cst_40 : f32 to vector<16x1xf32>
    %86 = arith.divf %84, %85 : vector<16x1xf32>
    %87 = vector.broadcast %79 : vector<16x1xf32> to vector<16x32xf32>
    %88 = arith.subf %75, %87 : vector<16x32xf32>
    %cst_41 = arith.constant 9.99999974E-6 : f32
    %89 = vector.broadcast %cst_41 : f32 to vector<16x1xf32>
    %90 = arith.addf %86, %89 : vector<16x1xf32>
    %91 = math.rsqrt %90 : vector<16x1xf32>
    %92 = vector.broadcast %91 : vector<16x1xf32> to vector<16x32xf32>
    %93 = arith.mulf %88, %92 : vector<16x32xf32>
    %94 = vector.broadcast %17 : vector<1x32xf32> to vector<16x32xf32>
    %95 = arith.mulf %93, %94 : vector<16x32xf32>
    %96 = vector.broadcast %19 : vector<1x32xf32> to vector<16x32xf32>
    %97 = arith.addf %95, %96 : vector<16x32xf32>
    %c0_42 = arith.constant 0 : index
    %c0_43 = arith.constant 0 : index
    %c0_44 = arith.constant 0 : index
    %98 = vector.load %arg10[%c0_42, %c0_43, %c0_44] : memref<2x32x64xbf16, #tpu.memory_space<vmem>>, vector<1x32x64xbf16>
    %99 = vector.shape_cast %98 : vector<1x32x64xbf16> to vector<32x64xbf16>
    %c0_45 = arith.constant 0 : index
    %c0_46 = arith.constant 0 : index
    %c0_47 = arith.constant 0 : index
    %100 = vector.load %arg11[%c0_45, %c0_46, %c0_47] : memref<2x1x64xf32, #tpu.memory_space<vmem>>, vector<1x1x64xf32>
    %101 = vector.shape_cast %100 : vector<1x1x64xf32> to vector<1x64xf32>
    %c0_48 = arith.constant 0 : index
    %c0_49 = arith.constant 0 : index
    %c0_50 = arith.constant 0 : index
    %102 = vector.load %arg12[%c0_48, %c0_49, %c0_50] : memref<2x64x32xbf16, #tpu.memory_space<vmem>>, vector<1x64x32xbf16>
    %103 = vector.shape_cast %102 : vector<1x64x32xbf16> to vector<64x32xbf16>
    %c0_51 = arith.constant 0 : index
    %c0_52 = arith.constant 0 : index
    %c0_53 = arith.constant 0 : index
    %104 = vector.load %arg13[%c0_51, %c0_52, %c0_53] : memref<2x1x32xf32, #tpu.memory_space<vmem>>, vector<1x1x32xf32>
    %105 = vector.shape_cast %104 : vector<1x1x32xf32> to vector<1x32xf32>
    %c0_54 = arith.constant 0 : index
    %c0_55 = arith.constant 0 : index
    %c0_56 = arith.constant 0 : index
    %106 = vector.load %arg14[%c0_54, %c0_55, %c0_56] : memref<2x1x32xf32, #tpu.memory_space<vmem>>, vector<1x1x32xf32>
    %107 = vector.shape_cast %106 : vector<1x1x32xf32> to vector<1x32xf32>
    %c0_57 = arith.constant 0 : index
    %c0_58 = arith.constant 0 : index
    %c0_59 = arith.constant 0 : index
    %108 = vector.load %arg15[%c0_57, %c0_58, %c0_59] : memref<2x1x32xf32, #tpu.memory_space<vmem>>, vector<1x1x32xf32>
    %109 = vector.shape_cast %108 : vector<1x1x32xf32> to vector<1x32xf32>
    %110 = arith.truncf %97 : vector<16x32xf32> to vector<16x32xbf16>
    %cst_60 = arith.constant dense<0.000000e+00> : vector<16x64xf32>
    %111 = tpu.matmul %110, %99, %cst_60 {dimension_numbers = #tpu.dot_dimension_numbers<[1], [0], [0], [1], [0, 0, 1, 1], [], []>} : vector<16x32xbf16>, vector<32x64xbf16>, vector<16x64xf32> -> vector<16x64xf32>
    %112 = vector.broadcast %101 : vector<1x64xf32> to vector<16x64xf32>
    %113 = arith.addf %111, %112 : vector<16x64xf32>
    %cst_61 = arith.constant 0.000000e+00 : f32
    %114 = vector.broadcast %cst_61 : f32 to vector<16x64xf32>
    %115 = arith.maximumf %113, %114 : vector<16x64xf32>
    %116 = arith.truncf %115 : vector<16x64xf32> to vector<16x64xbf16>
    %cst_62 = arith.constant dense<0.000000e+00> : vector<16x32xf32>
    %117 = tpu.matmul %116, %103, %cst_62 {dimension_numbers = #tpu.dot_dimension_numbers<[1], [0], [0], [1], [0, 0, 1, 1], [], []>} : vector<16x64xbf16>, vector<64x32xbf16>, vector<16x32xf32> -> vector<16x32xf32>
    %118 = vector.broadcast %105 : vector<1x32xf32> to vector<16x32xf32>
    %119 = arith.addf %117, %118 : vector<16x32xf32>
    %120 = arith.addf %119, %97 : vector<16x32xf32>
    %cst_63 = arith.constant dense<0.000000e+00> : vector<16xf32>
    %121 = vector.multi_reduction <add>, %120, %cst_63 [1] : vector<16x32xf32> to vector<16xf32>
    %122 = vector.shape_cast %121 : vector<16xf32> to vector<16x1xf32>
    %cst_64 = arith.constant 3.200000e+01 : f32
    %123 = vector.broadcast %cst_64 : f32 to vector<16x1xf32>
    %124 = arith.divf %122, %123 : vector<16x1xf32>
    %125 = vector.broadcast %124 : vector<16x1xf32> to vector<16x32xf32>
    %126 = arith.subf %120, %125 : vector<16x32xf32>
    %127 = arith.mulf %126, %126 : vector<16x32xf32>
    %cst_65 = arith.constant dense<0.000000e+00> : vector<16xf32>
    %128 = vector.multi_reduction <add>, %127, %cst_65 [1] : vector<16x32xf32> to vector<16xf32>
    %129 = vector.shape_cast %128 : vector<16xf32> to vector<16x1xf32>
    %cst_66 = arith.constant 3.200000e+01 : f32
    %130 = vector.broadcast %cst_66 : f32 to vector<16x1xf32>
    %131 = arith.divf %129, %130 : vector<16x1xf32>
    %132 = vector.broadcast %124 : vector<16x1xf32> to vector<16x32xf32>
    %133 = arith.subf %120, %132 : vector<16x32xf32>
    %cst_67 = arith.constant 9.99999974E-6 : f32
    %134 = vector.broadcast %cst_67 : f32 to vector<16x1xf32>
    %135 = arith.addf %131, %134 : vector<16x1xf32>
    %136 = math.rsqrt %135 : vector<16x1xf32>
    %137 = vector.broadcast %136 : vector<16x1xf32> to vector<16x32xf32>
    %138 = arith.mulf %133, %137 : vector<16x32xf32>
    %139 = vector.broadcast %107 : vector<1x32xf32> to vector<16x32xf32>
    %140 = arith.mulf %138, %139 : vector<16x32xf32>
    %141 = vector.broadcast %109 : vector<1x32xf32> to vector<16x32xf32>
    %142 = arith.addf %140, %141 : vector<16x32xf32>
    %143 = arith.truncf %142 : vector<16x32xf32> to vector<16x32xbf16>
    %c1 = arith.constant 1 : index
    %c0_68 = arith.constant 0 : index
    %c0_69 = arith.constant 0 : index
    %144 = vector.load %arg5[%c1, %c0_68, %c0_69] : memref<2x32x96xbf16, #tpu.memory_space<vmem>>, vector<1x32x96xbf16>
    %145 = vector.shape_cast %144 : vector<1x32x96xbf16> to vector<32x96xbf16>
    %cst_70 = arith.constant dense<0.000000e+00> : vector<16x96xf32>
    %146 = tpu.matmul %143, %145, %cst_70 {dimension_numbers = #tpu.dot_dimension_numbers<[1], [0], [0], [1], [0, 0, 1, 1], [], []>} : vector<16x32xbf16>, vector<32x96xbf16>, vector<16x96xf32> -> vector<16x96xf32>
    %147 = vector.extract_strided_slice %146 {offsets = [0, 0], sizes = [16, 32], strides = [1, 1]} : vector<16x96xf32> to vector<16x32xf32>
    %148 = vector.extract_strided_slice %146 {offsets = [0, 32], sizes = [16, 32], strides = [1, 1]} : vector<16x96xf32> to vector<16x32xf32>
    %149 = vector.extract_strided_slice %146 {offsets = [0, 64], sizes = [16, 32], strides = [1, 1]} : vector<16x96xf32> to vector<16x32xf32>
    %c1_71 = arith.constant 1 : index
    %c0_72 = arith.constant 0 : index
    %c0_73 = arith.constant 0 : index
    %150 = vector.load %arg6[%c1_71, %c0_72, %c0_73] : memref<2x32x32xbf16, #tpu.memory_space<vmem>>, vector<1x32x32xbf16>
    %151 = vector.shape_cast %150 : vector<1x32x32xbf16> to vector<32x32xbf16>
    %c1_74 = arith.constant 1 : index
    %c0_75 = arith.constant 0 : index
    %c0_76 = arith.constant 0 : index
    %152 = vector.load %arg7[%c1_74, %c0_75, %c0_76] : memref<2x1x32xf32, #tpu.memory_space<vmem>>, vector<1x1x32xf32>
    %153 = vector.shape_cast %152 : vector<1x1x32xf32> to vector<1x32xf32>
    %c1_77 = arith.constant 1 : index
    %c0_78 = arith.constant 0 : index
    %c0_79 = arith.constant 0 : index
    %154 = vector.load %arg8[%c1_77, %c0_78, %c0_79] : memref<2x1x32xf32, #tpu.memory_space<vmem>>, vector<1x1x32xf32>
    %155 = vector.shape_cast %154 : vector<1x1x32xf32> to vector<1x32xf32>
    %c1_80 = arith.constant 1 : index
    %c0_81 = arith.constant 0 : index
    %c0_82 = arith.constant 0 : index
    %156 = vector.load %arg9[%c1_80, %c0_81, %c0_82] : memref<2x1x32xf32, #tpu.memory_space<vmem>>, vector<1x1x32xf32>
    %157 = vector.shape_cast %156 : vector<1x1x32xf32> to vector<1x32xf32>
    %cst_83 = arith.constant 0.000000e+00 : f32
    %158 = vector.broadcast %cst_83 : f32 to vector<16x32xf32>
    %159 = vector.extract_strided_slice %147 {offsets = [0, 0], sizes = [16, 16], strides = [1, 1]} : vector<16x32xf32> to vector<16x16xf32>
    %160 = arith.truncf %159 : vector<16x16xf32> to vector<16x16xbf16>
    %161 = vector.extract_strided_slice %148 {offsets = [0, 0], sizes = [16, 16], strides = [1, 1]} : vector<16x32xf32> to vector<16x16xf32>
    %162 = arith.truncf %161 : vector<16x16xf32> to vector<16x16xbf16>
    %163 = vector.extract_strided_slice %149 {offsets = [0, 0], sizes = [16, 16], strides = [1, 1]} : vector<16x32xf32> to vector<16x16xf32>
    %164 = arith.truncf %163 : vector<16x16xf32> to vector<16x16xbf16>
    %cst_84 = arith.constant dense<0.000000e+00> : vector<16x16xf32>
    %165 = tpu.matmul %160, %162, %cst_84 {dimension_numbers = #tpu.dot_dimension_numbers<[1], [1], [0], [0], [0, 0, 1, 0], [], []>} : vector<16x16xbf16>, vector<16x16xbf16>, vector<16x16xf32> -> vector<16x16xf32>
    %cst_85 = arith.constant 2.500000e-01 : f32
    %166 = vector.broadcast %cst_85 : f32 to vector<16x16xf32>
    %167 = arith.mulf %165, %166 : vector<16x16xf32>
    %168 = arith.addf %167, %2 : vector<16x16xf32>
    %cst_86 = arith.constant dense<0xFF800000> : vector<16xf32>
    %169 = vector.multi_reduction <maximumf>, %168, %cst_86 [1] : vector<16x16xf32> to vector<16xf32>
    %170 = vector.shape_cast %169 : vector<16xf32> to vector<16x1xf32>
    %171 = vector.broadcast %170 : vector<16x1xf32> to vector<16x16xf32>
    %172 = arith.subf %168, %171 : vector<16x16xf32>
    %173 = math.exp %172 : vector<16x16xf32>
    %cst_87 = arith.constant dense<0.000000e+00> : vector<16xf32>
    %174 = vector.multi_reduction <add>, %173, %cst_87 [1] : vector<16x16xf32> to vector<16xf32>
    %175 = vector.shape_cast %174 : vector<16xf32> to vector<16x1xf32>
    %176 = tpu.reciprocal %175 {approx = true} : vector<16x1xf32> -> vector<16x1xf32>
    %177 = vector.broadcast %176 : vector<16x1xf32> to vector<16x16xf32>
    %178 = arith.mulf %173, %177 : vector<16x16xf32>
    %179 = arith.truncf %178 : vector<16x16xf32> to vector<16x16xbf16>
    %cst_88 = arith.constant dense<0.000000e+00> : vector<16x16xf32>
    %180 = tpu.matmul %179, %164, %cst_88 {dimension_numbers = #tpu.dot_dimension_numbers<[1], [0], [0], [1], [0, 0, 1, 1], [], []>} : vector<16x16xbf16>, vector<16x16xbf16>, vector<16x16xf32> -> vector<16x16xf32>
    %181 = arith.truncf %180 : vector<16x16xf32> to vector<16x16xbf16>
    %182 = vector.extract_strided_slice %151 {offsets = [0, 0], sizes = [16, 32], strides = [1, 1]} : vector<32x32xbf16> to vector<16x32xbf16>
    %cst_89 = arith.constant dense<0.000000e+00> : vector<16x32xf32>
    %183 = tpu.matmul %181, %182, %cst_89 {dimension_numbers = #tpu.dot_dimension_numbers<[1], [0], [0], [1], [0, 0, 1, 1], [], []>} : vector<16x16xbf16>, vector<16x32xbf16>, vector<16x32xf32> -> vector<16x32xf32>
    %184 = arith.addf %158, %183 : vector<16x32xf32>
    %185 = vector.extract_strided_slice %147 {offsets = [0, 16], sizes = [16, 16], strides = [1, 1]} : vector<16x32xf32> to vector<16x16xf32>
    %186 = arith.truncf %185 : vector<16x16xf32> to vector<16x16xbf16>
    %187 = vector.extract_strided_slice %148 {offsets = [0, 16], sizes = [16, 16], strides = [1, 1]} : vector<16x32xf32> to vector<16x16xf32>
    %188 = arith.truncf %187 : vector<16x16xf32> to vector<16x16xbf16>
    %189 = vector.extract_strided_slice %149 {offsets = [0, 16], sizes = [16, 16], strides = [1, 1]} : vector<16x32xf32> to vector<16x16xf32>
    %190 = arith.truncf %189 : vector<16x16xf32> to vector<16x16xbf16>
    %cst_90 = arith.constant dense<0.000000e+00> : vector<16x16xf32>
    %191 = tpu.matmul %186, %188, %cst_90 {dimension_numbers = #tpu.dot_dimension_numbers<[1], [1], [0], [0], [0, 0, 1, 0], [], []>} : vector<16x16xbf16>, vector<16x16xbf16>, vector<16x16xf32> -> vector<16x16xf32>
    %cst_91 = arith.constant 2.500000e-01 : f32
    %192 = vector.broadcast %cst_91 : f32 to vector<16x16xf32>
    %193 = arith.mulf %191, %192 : vector<16x16xf32>
    %194 = arith.addf %193, %2 : vector<16x16xf32>
    %cst_92 = arith.constant dense<0xFF800000> : vector<16xf32>
    %195 = vector.multi_reduction <maximumf>, %194, %cst_92 [1] : vector<16x16xf32> to vector<16xf32>
    %196 = vector.shape_cast %195 : vector<16xf32> to vector<16x1xf32>
    %197 = vector.broadcast %196 : vector<16x1xf32> to vector<16x16xf32>
    %198 = arith.subf %194, %197 : vector<16x16xf32>
    %199 = math.exp %198 : vector<16x16xf32>
    %cst_93 = arith.constant dense<0.000000e+00> : vector<16xf32>
    %200 = vector.multi_reduction <add>, %199, %cst_93 [1] : vector<16x16xf32> to vector<16xf32>
    %201 = vector.shape_cast %200 : vector<16xf32> to vector<16x1xf32>
    %202 = tpu.reciprocal %201 {approx = true} : vector<16x1xf32> -> vector<16x1xf32>
    %203 = vector.broadcast %202 : vector<16x1xf32> to vector<16x16xf32>
    %204 = arith.mulf %199, %203 : vector<16x16xf32>
    %205 = arith.truncf %204 : vector<16x16xf32> to vector<16x16xbf16>
    %cst_94 = arith.constant dense<0.000000e+00> : vector<16x16xf32>
    %206 = tpu.matmul %205, %190, %cst_94 {dimension_numbers = #tpu.dot_dimension_numbers<[1], [0], [0], [1], [0, 0, 1, 1], [], []>} : vector<16x16xbf16>, vector<16x16xbf16>, vector<16x16xf32> -> vector<16x16xf32>
    %207 = arith.truncf %206 : vector<16x16xf32> to vector<16x16xbf16>
    %208 = vector.extract_strided_slice %151 {offsets = [16, 0], sizes = [16, 32], strides = [1, 1]} : vector<32x32xbf16> to vector<16x32xbf16>
    %cst_95 = arith.constant dense<0.000000e+00> : vector<16x32xf32>
    %209 = tpu.matmul %207, %208, %cst_95 {dimension_numbers = #tpu.dot_dimension_numbers<[1], [0], [0], [1], [0, 0, 1, 1], [], []>} : vector<16x16xbf16>, vector<16x32xbf16>, vector<16x32xf32> -> vector<16x32xf32>
    %210 = arith.addf %184, %209 : vector<16x32xf32>
    %211 = vector.broadcast %153 : vector<1x32xf32> to vector<16x32xf32>
    %212 = arith.addf %210, %211 : vector<16x32xf32>
    %213 = arith.addf %212, %142 : vector<16x32xf32>
    %cst_96 = arith.constant dense<0.000000e+00> : vector<16xf32>
    %214 = vector.multi_reduction <add>, %213, %cst_96 [1] : vector<16x32xf32> to vector<16xf32>
    %215 = vector.shape_cast %214 : vector<16xf32> to vector<16x1xf32>
    %cst_97 = arith.constant 3.200000e+01 : f32
    %216 = vector.broadcast %cst_97 : f32 to vector<16x1xf32>
    %217 = arith.divf %215, %216 : vector<16x1xf32>
    %218 = vector.broadcast %217 : vector<16x1xf32> to vector<16x32xf32>
    %219 = arith.subf %213, %218 : vector<16x32xf32>
    %220 = arith.mulf %219, %219 : vector<16x32xf32>
    %cst_98 = arith.constant dense<0.000000e+00> : vector<16xf32>
    %221 = vector.multi_reduction <add>, %220, %cst_98 [1] : vector<16x32xf32> to vector<16xf32>
    %222 = vector.shape_cast %221 : vector<16xf32> to vector<16x1xf32>
    %cst_99 = arith.constant 3.200000e+01 : f32
    %223 = vector.broadcast %cst_99 : f32 to vector<16x1xf32>
    %224 = arith.divf %222, %223 : vector<16x1xf32>
    %225 = vector.broadcast %217 : vector<16x1xf32> to vector<16x32xf32>
    %226 = arith.subf %213, %225 : vector<16x32xf32>
    %cst_100 = arith.constant 9.99999974E-6 : f32
    %227 = vector.broadcast %cst_100 : f32 to vector<16x1xf32>
    %228 = arith.addf %224, %227 : vector<16x1xf32>
    %229 = math.rsqrt %228 : vector<16x1xf32>
    %230 = vector.broadcast %229 : vector<16x1xf32> to vector<16x32xf32>
    %231 = arith.mulf %226, %230 : vector<16x32xf32>
    %232 = vector.broadcast %155 : vector<1x32xf32> to vector<16x32xf32>
    %233 = arith.mulf %231, %232 : vector<16x32xf32>
    %234 = vector.broadcast %157 : vector<1x32xf32> to vector<16x32xf32>
    %235 = arith.addf %233, %234 : vector<16x32xf32>
    %c1_101 = arith.constant 1 : index
    %c0_102 = arith.constant 0 : index
    %c0_103 = arith.constant 0 : index
    %236 = vector.load %arg10[%c1_101, %c0_102, %c0_103] : memref<2x32x64xbf16, #tpu.memory_space<vmem>>, vector<1x32x64xbf16>
    %237 = vector.shape_cast %236 : vector<1x32x64xbf16> to vector<32x64xbf16>
    %c1_104 = arith.constant 1 : index
    %c0_105 = arith.constant 0 : index
    %c0_106 = arith.constant 0 : index
    %238 = vector.load %arg11[%c1_104, %c0_105, %c0_106] : memref<2x1x64xf32, #tpu.memory_space<vmem>>, vector<1x1x64xf32>
    %239 = vector.shape_cast %238 : vector<1x1x64xf32> to vector<1x64xf32>
    %c1_107 = arith.constant 1 : index
    %c0_108 = arith.constant 0 : index
    %c0_109 = arith.constant 0 : index
    %240 = vector.load %arg12[%c1_107, %c0_108, %c0_109] : memref<2x64x32xbf16, #tpu.memory_space<vmem>>, vector<1x64x32xbf16>
    %241 = vector.shape_cast %240 : vector<1x64x32xbf16> to vector<64x32xbf16>
    %c1_110 = arith.constant 1 : index
    %c0_111 = arith.constant 0 : index
    %c0_112 = arith.constant 0 : index
    %242 = vector.load %arg13[%c1_110, %c0_111, %c0_112] : memref<2x1x32xf32, #tpu.memory_space<vmem>>, vector<1x1x32xf32>
    %243 = vector.shape_cast %242 : vector<1x1x32xf32> to vector<1x32xf32>
    %c1_113 = arith.constant 1 : index
    %c0_114 = arith.constant 0 : index
    %c0_115 = arith.constant 0 : index
    %244 = vector.load %arg14[%c1_113, %c0_114, %c0_115] : memref<2x1x32xf32, #tpu.memory_space<vmem>>, vector<1x1x32xf32>
    %245 = vector.shape_cast %244 : vector<1x1x32xf32> to vector<1x32xf32>
    %c1_116 = arith.constant 1 : index
    %c0_117 = arith.constant 0 : index
    %c0_118 = arith.constant 0 : index
    %246 = vector.load %arg15[%c1_116, %c0_117, %c0_118] : memref<2x1x32xf32, #tpu.memory_space<vmem>>, vector<1x1x32xf32>
    %247 = vector.shape_cast %246 : vector<1x1x32xf32> to vector<1x32xf32>
    %248 = arith.truncf %235 : vector<16x32xf32> to vector<16x32xbf16>
    %cst_119 = arith.constant dense<0.000000e+00> : vector<16x64xf32>
    %249 = tpu.matmul %248, %237, %cst_119 {dimension_numbers = #tpu.dot_dimension_numbers<[1], [0], [0], [1], [0, 0, 1, 1], [], []>} : vector<16x32xbf16>, vector<32x64xbf16>, vector<16x64xf32> -> vector<16x64xf32>
    %250 = vector.broadcast %239 : vector<1x64xf32> to vector<16x64xf32>
    %251 = arith.addf %249, %250 : vector<16x64xf32>
    %cst_120 = arith.constant 0.000000e+00 : f32
    %252 = vector.broadcast %cst_120 : f32 to vector<16x64xf32>
    %253 = arith.maximumf %251, %252 : vector<16x64xf32>
    %254 = arith.truncf %253 : vector<16x64xf32> to vector<16x64xbf16>
    %cst_121 = arith.constant dense<0.000000e+00> : vector<16x32xf32>
    %255 = tpu.matmul %254, %241, %cst_121 {dimension_numbers = #tpu.dot_dimension_numbers<[1], [0], [0], [1], [0, 0, 1, 1], [], []>} : vector<16x64xbf16>, vector<64x32xbf16>, vector<16x32xf32> -> vector<16x32xf32>
    %256 = vector.broadcast %243 : vector<1x32xf32> to vector<16x32xf32>
    %257 = arith.addf %255, %256 : vector<16x32xf32>
    %258 = arith.addf %257, %235 : vector<16x32xf32>
    %cst_122 = arith.constant dense<0.000000e+00> : vector<16xf32>
    %259 = vector.multi_reduction <add>, %258, %cst_122 [1] : vector<16x32xf32> to vector<16xf32>
    %260 = vector.shape_cast %259 : vector<16xf32> to vector<16x1xf32>
    %cst_123 = arith.constant 3.200000e+01 : f32
    %261 = vector.broadcast %cst_123 : f32 to vector<16x1xf32>
    %262 = arith.divf %260, %261 : vector<16x1xf32>
    %263 = vector.broadcast %262 : vector<16x1xf32> to vector<16x32xf32>
    %264 = arith.subf %258, %263 : vector<16x32xf32>
    %265 = arith.mulf %264, %264 : vector<16x32xf32>
    %cst_124 = arith.constant dense<0.000000e+00> : vector<16xf32>
    %266 = vector.multi_reduction <add>, %265, %cst_124 [1] : vector<16x32xf32> to vector<16xf32>
    %267 = vector.shape_cast %266 : vector<16xf32> to vector<16x1xf32>
    %cst_125 = arith.constant 3.200000e+01 : f32
    %268 = vector.broadcast %cst_125 : f32 to vector<16x1xf32>
    %269 = arith.divf %267, %268 : vector<16x1xf32>
    %270 = vector.broadcast %262 : vector<16x1xf32> to vector<16x32xf32>
    %271 = arith.subf %258, %270 : vector<16x32xf32>
    %cst_126 = arith.constant 9.99999974E-6 : f32
    %272 = vector.broadcast %cst_126 : f32 to vector<16x1xf32>
    %273 = arith.addf %269, %272 : vector<16x1xf32>
    %274 = math.rsqrt %273 : vector<16x1xf32>
    %275 = vector.broadcast %274 : vector<16x1xf32> to vector<16x32xf32>
    %276 = arith.mulf %271, %275 : vector<16x32xf32>
    %277 = vector.broadcast %245 : vector<1x32xf32> to vector<16x32xf32>
    %278 = arith.mulf %276, %277 : vector<16x32xf32>
    %279 = vector.broadcast %247 : vector<1x32xf32> to vector<16x32xf32>
    %280 = arith.addf %278, %279 : vector<16x32xf32>
    %281 = arith.truncf %280 : vector<16x32xf32> to vector<16x32xbf16>
    %282 = arith.truncf %1 : vector<16x32xf32> to vector<16x32xbf16>
    %c0_127 = arith.constant 0 : index
    %c0_128 = arith.constant 0 : index
    %c0_129 = arith.constant 0 : index
    %283 = vector.load %arg16[%c0_127, %c0_128, %c0_129] : memref<2x32x96xbf16, #tpu.memory_space<vmem>>, vector<1x32x96xbf16>
    %284 = vector.shape_cast %283 : vector<1x32x96xbf16> to vector<32x96xbf16>
    %cst_130 = arith.constant dense<0.000000e+00> : vector<16x96xf32>
    %285 = tpu.matmul %282, %284, %cst_130 {dimension_numbers = #tpu.dot_dimension_numbers<[1], [0], [0], [1], [0, 0, 1, 1], [], []>} : vector<16x32xbf16>, vector<32x96xbf16>, vector<16x96xf32> -> vector<16x96xf32>
    %286 = vector.extract_strided_slice %285 {offsets = [0, 0], sizes = [16, 32], strides = [1, 1]} : vector<16x96xf32> to vector<16x32xf32>
    %287 = vector.extract_strided_slice %285 {offsets = [0, 32], sizes = [16, 32], strides = [1, 1]} : vector<16x96xf32> to vector<16x32xf32>
    %288 = vector.extract_strided_slice %285 {offsets = [0, 64], sizes = [16, 32], strides = [1, 1]} : vector<16x96xf32> to vector<16x32xf32>
    %c0_131 = arith.constant 0 : index
    %c0_132 = arith.constant 0 : index
    %c0_133 = arith.constant 0 : index
    %289 = vector.load %arg17[%c0_131, %c0_132, %c0_133] : memref<2x32x32xbf16, #tpu.memory_space<vmem>>, vector<1x32x32xbf16>
    %290 = vector.shape_cast %289 : vector<1x32x32xbf16> to vector<32x32xbf16>
    %c0_134 = arith.constant 0 : index
    %c0_135 = arith.constant 0 : index
    %c0_136 = arith.constant 0 : index
    %291 = vector.load %arg18[%c0_134, %c0_135, %c0_136] : memref<2x1x32xf32, #tpu.memory_space<vmem>>, vector<1x1x32xf32>
    %292 = vector.shape_cast %291 : vector<1x1x32xf32> to vector<1x32xf32>
    %c0_137 = arith.constant 0 : index
    %c0_138 = arith.constant 0 : index
    %c0_139 = arith.constant 0 : index
    %293 = vector.load %arg19[%c0_137, %c0_138, %c0_139] : memref<2x1x32xf32, #tpu.memory_space<vmem>>, vector<1x1x32xf32>
    %294 = vector.shape_cast %293 : vector<1x1x32xf32> to vector<1x32xf32>
    %c0_140 = arith.constant 0 : index
    %c0_141 = arith.constant 0 : index
    %c0_142 = arith.constant 0 : index
    %295 = vector.load %arg20[%c0_140, %c0_141, %c0_142] : memref<2x1x32xf32, #tpu.memory_space<vmem>>, vector<1x1x32xf32>
    %296 = vector.shape_cast %295 : vector<1x1x32xf32> to vector<1x32xf32>
    %cst_143 = arith.constant 0.000000e+00 : f32
    %297 = vector.broadcast %cst_143 : f32 to vector<16x32xf32>
    %298 = vector.extract_strided_slice %286 {offsets = [0, 0], sizes = [16, 16], strides = [1, 1]} : vector<16x32xf32> to vector<16x16xf32>
    %299 = arith.truncf %298 : vector<16x16xf32> to vector<16x16xbf16>
    %300 = vector.extract_strided_slice %287 {offsets = [0, 0], sizes = [16, 16], strides = [1, 1]} : vector<16x32xf32> to vector<16x16xf32>
    %301 = arith.truncf %300 : vector<16x16xf32> to vector<16x16xbf16>
    %302 = vector.extract_strided_slice %288 {offsets = [0, 0], sizes = [16, 16], strides = [1, 1]} : vector<16x32xf32> to vector<16x16xf32>
    %303 = arith.truncf %302 : vector<16x16xf32> to vector<16x16xbf16>
    %cst_144 = arith.constant dense<0.000000e+00> : vector<16x16xf32>
    %304 = tpu.matmul %299, %301, %cst_144 {dimension_numbers = #tpu.dot_dimension_numbers<[1], [1], [0], [0], [0, 0, 1, 0], [], []>} : vector<16x16xbf16>, vector<16x16xbf16>, vector<16x16xf32> -> vector<16x16xf32>
    %cst_145 = arith.constant 2.500000e-01 : f32
    %305 = vector.broadcast %cst_145 : f32 to vector<16x16xf32>
    %306 = arith.mulf %304, %305 : vector<16x16xf32>
    %307 = arith.addf %306, %3 : vector<16x16xf32>
    %cst_146 = arith.constant dense<0xFF800000> : vector<16xf32>
    %308 = vector.multi_reduction <maximumf>, %307, %cst_146 [1] : vector<16x16xf32> to vector<16xf32>
    %309 = vector.shape_cast %308 : vector<16xf32> to vector<16x1xf32>
    %310 = vector.broadcast %309 : vector<16x1xf32> to vector<16x16xf32>
    %311 = arith.subf %307, %310 : vector<16x16xf32>
    %312 = math.exp %311 : vector<16x16xf32>
    %cst_147 = arith.constant dense<0.000000e+00> : vector<16xf32>
    %313 = vector.multi_reduction <add>, %312, %cst_147 [1] : vector<16x16xf32> to vector<16xf32>
    %314 = vector.shape_cast %313 : vector<16xf32> to vector<16x1xf32>
    %315 = tpu.reciprocal %314 {approx = true} : vector<16x1xf32> -> vector<16x1xf32>
    %316 = vector.broadcast %315 : vector<16x1xf32> to vector<16x16xf32>
    %317 = arith.mulf %312, %316 : vector<16x16xf32>
    %318 = arith.truncf %317 : vector<16x16xf32> to vector<16x16xbf16>
    %cst_148 = arith.constant dense<0.000000e+00> : vector<16x16xf32>
    %319 = tpu.matmul %318, %303, %cst_148 {dimension_numbers = #tpu.dot_dimension_numbers<[1], [0], [0], [1], [0, 0, 1, 1], [], []>} : vector<16x16xbf16>, vector<16x16xbf16>, vector<16x16xf32> -> vector<16x16xf32>
    %320 = arith.truncf %319 : vector<16x16xf32> to vector<16x16xbf16>
    %321 = vector.extract_strided_slice %290 {offsets = [0, 0], sizes = [16, 32], strides = [1, 1]} : vector<32x32xbf16> to vector<16x32xbf16>
    %cst_149 = arith.constant dense<0.000000e+00> : vector<16x32xf32>
    %322 = tpu.matmul %320, %321, %cst_149 {dimension_numbers = #tpu.dot_dimension_numbers<[1], [0], [0], [1], [0, 0, 1, 1], [], []>} : vector<16x16xbf16>, vector<16x32xbf16>, vector<16x32xf32> -> vector<16x32xf32>
    %323 = arith.addf %297, %322 : vector<16x32xf32>
    %324 = vector.extract_strided_slice %286 {offsets = [0, 16], sizes = [16, 16], strides = [1, 1]} : vector<16x32xf32> to vector<16x16xf32>
    %325 = arith.truncf %324 : vector<16x16xf32> to vector<16x16xbf16>
    %326 = vector.extract_strided_slice %287 {offsets = [0, 16], sizes = [16, 16], strides = [1, 1]} : vector<16x32xf32> to vector<16x16xf32>
    %327 = arith.truncf %326 : vector<16x16xf32> to vector<16x16xbf16>
    %328 = vector.extract_strided_slice %288 {offsets = [0, 16], sizes = [16, 16], strides = [1, 1]} : vector<16x32xf32> to vector<16x16xf32>
    %329 = arith.truncf %328 : vector<16x16xf32> to vector<16x16xbf16>
    %cst_150 = arith.constant dense<0.000000e+00> : vector<16x16xf32>
    %330 = tpu.matmul %325, %327, %cst_150 {dimension_numbers = #tpu.dot_dimension_numbers<[1], [1], [0], [0], [0, 0, 1, 0], [], []>} : vector<16x16xbf16>, vector<16x16xbf16>, vector<16x16xf32> -> vector<16x16xf32>
    %cst_151 = arith.constant 2.500000e-01 : f32
    %331 = vector.broadcast %cst_151 : f32 to vector<16x16xf32>
    %332 = arith.mulf %330, %331 : vector<16x16xf32>
    %333 = arith.addf %332, %3 : vector<16x16xf32>
    %cst_152 = arith.constant dense<0xFF800000> : vector<16xf32>
    %334 = vector.multi_reduction <maximumf>, %333, %cst_152 [1] : vector<16x16xf32> to vector<16xf32>
    %335 = vector.shape_cast %334 : vector<16xf32> to vector<16x1xf32>
    %336 = vector.broadcast %335 : vector<16x1xf32> to vector<16x16xf32>
    %337 = arith.subf %333, %336 : vector<16x16xf32>
    %338 = math.exp %337 : vector<16x16xf32>
    %cst_153 = arith.constant dense<0.000000e+00> : vector<16xf32>
    %339 = vector.multi_reduction <add>, %338, %cst_153 [1] : vector<16x16xf32> to vector<16xf32>
    %340 = vector.shape_cast %339 : vector<16xf32> to vector<16x1xf32>
    %341 = tpu.reciprocal %340 {approx = true} : vector<16x1xf32> -> vector<16x1xf32>
    %342 = vector.broadcast %341 : vector<16x1xf32> to vector<16x16xf32>
    %343 = arith.mulf %338, %342 : vector<16x16xf32>
    %344 = arith.truncf %343 : vector<16x16xf32> to vector<16x16xbf16>
    %cst_154 = arith.constant dense<0.000000e+00> : vector<16x16xf32>
    %345 = tpu.matmul %344, %329, %cst_154 {dimension_numbers = #tpu.dot_dimension_numbers<[1], [0], [0], [1], [0, 0, 1, 1], [], []>} : vector<16x16xbf16>, vector<16x16xbf16>, vector<16x16xf32> -> vector<16x16xf32>
    %346 = arith.truncf %345 : vector<16x16xf32> to vector<16x16xbf16>
    %347 = vector.extract_strided_slice %290 {offsets = [16, 0], sizes = [16, 32], strides = [1, 1]} : vector<32x32xbf16> to vector<16x32xbf16>
    %cst_155 = arith.constant dense<0.000000e+00> : vector<16x32xf32>
    %348 = tpu.matmul %346, %347, %cst_155 {dimension_numbers = #tpu.dot_dimension_numbers<[1], [0], [0], [1], [0, 0, 1, 1], [], []>} : vector<16x16xbf16>, vector<16x32xbf16>, vector<16x32xf32> -> vector<16x32xf32>
    %349 = arith.addf %323, %348 : vector<16x32xf32>
    %350 = vector.broadcast %292 : vector<1x32xf32> to vector<16x32xf32>
    %351 = arith.addf %349, %350 : vector<16x32xf32>
    %352 = arith.addf %351, %1 : vector<16x32xf32>
    %cst_156 = arith.constant dense<0.000000e+00> : vector<16xf32>
    %353 = vector.multi_reduction <add>, %352, %cst_156 [1] : vector<16x32xf32> to vector<16xf32>
    %354 = vector.shape_cast %353 : vector<16xf32> to vector<16x1xf32>
    %cst_157 = arith.constant 3.200000e+01 : f32
    %355 = vector.broadcast %cst_157 : f32 to vector<16x1xf32>
    %356 = arith.divf %354, %355 : vector<16x1xf32>
    %357 = vector.broadcast %356 : vector<16x1xf32> to vector<16x32xf32>
    %358 = arith.subf %352, %357 : vector<16x32xf32>
    %359 = arith.mulf %358, %358 : vector<16x32xf32>
    %cst_158 = arith.constant dense<0.000000e+00> : vector<16xf32>
    %360 = vector.multi_reduction <add>, %359, %cst_158 [1] : vector<16x32xf32> to vector<16xf32>
    %361 = vector.shape_cast %360 : vector<16xf32> to vector<16x1xf32>
    %cst_159 = arith.constant 3.200000e+01 : f32
    %362 = vector.broadcast %cst_159 : f32 to vector<16x1xf32>
    %363 = arith.divf %361, %362 : vector<16x1xf32>
    %364 = vector.broadcast %356 : vector<16x1xf32> to vector<16x32xf32>
    %365 = arith.subf %352, %364 : vector<16x32xf32>
    %cst_160 = arith.constant 9.99999974E-6 : f32
    %366 = vector.broadcast %cst_160 : f32 to vector<16x1xf32>
    %367 = arith.addf %363, %366 : vector<16x1xf32>
    %368 = math.rsqrt %367 : vector<16x1xf32>
    %369 = vector.broadcast %368 : vector<16x1xf32> to vector<16x32xf32>
    %370 = arith.mulf %365, %369 : vector<16x32xf32>
    %371 = vector.broadcast %294 : vector<1x32xf32> to vector<16x32xf32>
    %372 = arith.mulf %370, %371 : vector<16x32xf32>
    %373 = vector.broadcast %296 : vector<1x32xf32> to vector<16x32xf32>
    %374 = arith.addf %372, %373 : vector<16x32xf32>
    %375 = arith.truncf %374 : vector<16x32xf32> to vector<16x32xbf16>
    %c0_161 = arith.constant 0 : index
    %c0_162 = arith.constant 0 : index
    %c0_163 = arith.constant 0 : index
    %376 = vector.load %arg21[%c0_161, %c0_162, %c0_163] : memref<2x32x32xbf16, #tpu.memory_space<vmem>>, vector<1x32x32xbf16>
    %377 = vector.shape_cast %376 : vector<1x32x32xbf16> to vector<32x32xbf16>
    %cst_164 = arith.constant dense<0.000000e+00> : vector<16x32xf32>
    %378 = tpu.matmul %375, %377, %cst_164 {dimension_numbers = #tpu.dot_dimension_numbers<[1], [0], [0], [1], [0, 0, 1, 1], [], []>} : vector<16x32xbf16>, vector<32x32xbf16>, vector<16x32xf32> -> vector<16x32xf32>
    %c0_165 = arith.constant 0 : index
    %c0_166 = arith.constant 0 : index
    %c0_167 = arith.constant 0 : index
    %379 = vector.load %arg22[%c0_165, %c0_166, %c0_167] : memref<2x32x64xbf16, #tpu.memory_space<vmem>>, vector<1x32x64xbf16>
    %380 = vector.shape_cast %379 : vector<1x32x64xbf16> to vector<32x64xbf16>
    %cst_168 = arith.constant dense<0.000000e+00> : vector<16x64xf32>
    %381 = tpu.matmul %281, %380, %cst_168 {dimension_numbers = #tpu.dot_dimension_numbers<[1], [0], [0], [1], [0, 0, 1, 1], [], []>} : vector<16x32xbf16>, vector<32x64xbf16>, vector<16x64xf32> -> vector<16x64xf32>
    %382 = vector.extract_strided_slice %381 {offsets = [0, 0], sizes = [16, 32], strides = [1, 1]} : vector<16x64xf32> to vector<16x32xf32>
    %383 = vector.extract_strided_slice %381 {offsets = [0, 32], sizes = [16, 32], strides = [1, 1]} : vector<16x64xf32> to vector<16x32xf32>
    %c0_169 = arith.constant 0 : index
    %c0_170 = arith.constant 0 : index
    %c0_171 = arith.constant 0 : index
    %384 = vector.load %arg23[%c0_169, %c0_170, %c0_171] : memref<2x32x32xbf16, #tpu.memory_space<vmem>>, vector<1x32x32xbf16>
    %385 = vector.shape_cast %384 : vector<1x32x32xbf16> to vector<32x32xbf16>
    %c0_172 = arith.constant 0 : index
    %c0_173 = arith.constant 0 : index
    %c0_174 = arith.constant 0 : index
    %386 = vector.load %arg24[%c0_172, %c0_173, %c0_174] : memref<2x1x32xf32, #tpu.memory_space<vmem>>, vector<1x1x32xf32>
    %387 = vector.shape_cast %386 : vector<1x1x32xf32> to vector<1x32xf32>
    %c0_175 = arith.constant 0 : index
    %c0_176 = arith.constant 0 : index
    %c0_177 = arith.constant 0 : index
    %388 = vector.load %arg25[%c0_175, %c0_176, %c0_177] : memref<2x1x32xf32, #tpu.memory_space<vmem>>, vector<1x1x32xf32>
    %389 = vector.shape_cast %388 : vector<1x1x32xf32> to vector<1x32xf32>
    %c0_178 = arith.constant 0 : index
    %c0_179 = arith.constant 0 : index
    %c0_180 = arith.constant 0 : index
    %390 = vector.load %arg26[%c0_178, %c0_179, %c0_180] : memref<2x1x32xf32, #tpu.memory_space<vmem>>, vector<1x1x32xf32>
    %391 = vector.shape_cast %390 : vector<1x1x32xf32> to vector<1x32xf32>
    %cst_181 = arith.constant 0.000000e+00 : f32
    %392 = vector.broadcast %cst_181 : f32 to vector<16x32xf32>
    %393 = vector.extract_strided_slice %378 {offsets = [0, 0], sizes = [16, 16], strides = [1, 1]} : vector<16x32xf32> to vector<16x16xf32>
    %394 = arith.truncf %393 : vector<16x16xf32> to vector<16x16xbf16>
    %395 = vector.extract_strided_slice %382 {offsets = [0, 0], sizes = [16, 16], strides = [1, 1]} : vector<16x32xf32> to vector<16x16xf32>
    %396 = arith.truncf %395 : vector<16x16xf32> to vector<16x16xbf16>
    %397 = vector.extract_strided_slice %383 {offsets = [0, 0], sizes = [16, 16], strides = [1, 1]} : vector<16x32xf32> to vector<16x16xf32>
    %398 = arith.truncf %397 : vector<16x16xf32> to vector<16x16xbf16>
    %cst_182 = arith.constant dense<0.000000e+00> : vector<16x16xf32>
    %399 = tpu.matmul %394, %396, %cst_182 {dimension_numbers = #tpu.dot_dimension_numbers<[1], [1], [0], [0], [0, 0, 1, 0], [], []>} : vector<16x16xbf16>, vector<16x16xbf16>, vector<16x16xf32> -> vector<16x16xf32>
    %cst_183 = arith.constant 2.500000e-01 : f32
    %400 = vector.broadcast %cst_183 : f32 to vector<16x16xf32>
    %401 = arith.mulf %399, %400 : vector<16x16xf32>
    %402 = arith.addf %401, %4 : vector<16x16xf32>
    %cst_184 = arith.constant dense<0xFF800000> : vector<16xf32>
    %403 = vector.multi_reduction <maximumf>, %402, %cst_184 [1] : vector<16x16xf32> to vector<16xf32>
    %404 = vector.shape_cast %403 : vector<16xf32> to vector<16x1xf32>
    %405 = vector.broadcast %404 : vector<16x1xf32> to vector<16x16xf32>
    %406 = arith.subf %402, %405 : vector<16x16xf32>
    %407 = math.exp %406 : vector<16x16xf32>
    %cst_185 = arith.constant dense<0.000000e+00> : vector<16xf32>
    %408 = vector.multi_reduction <add>, %407, %cst_185 [1] : vector<16x16xf32> to vector<16xf32>
    %409 = vector.shape_cast %408 : vector<16xf32> to vector<16x1xf32>
    %410 = tpu.reciprocal %409 {approx = true} : vector<16x1xf32> -> vector<16x1xf32>
    %411 = vector.broadcast %410 : vector<16x1xf32> to vector<16x16xf32>
    %412 = arith.mulf %407, %411 : vector<16x16xf32>
    %413 = arith.truncf %412 : vector<16x16xf32> to vector<16x16xbf16>
    %cst_186 = arith.constant dense<0.000000e+00> : vector<16x16xf32>
    %414 = tpu.matmul %413, %398, %cst_186 {dimension_numbers = #tpu.dot_dimension_numbers<[1], [0], [0], [1], [0, 0, 1, 1], [], []>} : vector<16x16xbf16>, vector<16x16xbf16>, vector<16x16xf32> -> vector<16x16xf32>
    %415 = arith.truncf %414 : vector<16x16xf32> to vector<16x16xbf16>
    %416 = vector.extract_strided_slice %385 {offsets = [0, 0], sizes = [16, 32], strides = [1, 1]} : vector<32x32xbf16> to vector<16x32xbf16>
    %cst_187 = arith.constant dense<0.000000e+00> : vector<16x32xf32>
    %417 = tpu.matmul %415, %416, %cst_187 {dimension_numbers = #tpu.dot_dimension_numbers<[1], [0], [0], [1], [0, 0, 1, 1], [], []>} : vector<16x16xbf16>, vector<16x32xbf16>, vector<16x32xf32> -> vector<16x32xf32>
    %418 = arith.addf %392, %417 : vector<16x32xf32>
    %419 = vector.extract_strided_slice %378 {offsets = [0, 16], sizes = [16, 16], strides = [1, 1]} : vector<16x32xf32> to vector<16x16xf32>
    %420 = arith.truncf %419 : vector<16x16xf32> to vector<16x16xbf16>
    %421 = vector.extract_strided_slice %382 {offsets = [0, 16], sizes = [16, 16], strides = [1, 1]} : vector<16x32xf32> to vector<16x16xf32>
    %422 = arith.truncf %421 : vector<16x16xf32> to vector<16x16xbf16>
    %423 = vector.extract_strided_slice %383 {offsets = [0, 16], sizes = [16, 16], strides = [1, 1]} : vector<16x32xf32> to vector<16x16xf32>
    %424 = arith.truncf %423 : vector<16x16xf32> to vector<16x16xbf16>
    %cst_188 = arith.constant dense<0.000000e+00> : vector<16x16xf32>
    %425 = tpu.matmul %420, %422, %cst_188 {dimension_numbers = #tpu.dot_dimension_numbers<[1], [1], [0], [0], [0, 0, 1, 0], [], []>} : vector<16x16xbf16>, vector<16x16xbf16>, vector<16x16xf32> -> vector<16x16xf32>
    %cst_189 = arith.constant 2.500000e-01 : f32
    %426 = vector.broadcast %cst_189 : f32 to vector<16x16xf32>
    %427 = arith.mulf %425, %426 : vector<16x16xf32>
    %428 = arith.addf %427, %4 : vector<16x16xf32>
    %cst_190 = arith.constant dense<0xFF800000> : vector<16xf32>
    %429 = vector.multi_reduction <maximumf>, %428, %cst_190 [1] : vector<16x16xf32> to vector<16xf32>
    %430 = vector.shape_cast %429 : vector<16xf32> to vector<16x1xf32>
    %431 = vector.broadcast %430 : vector<16x1xf32> to vector<16x16xf32>
    %432 = arith.subf %428, %431 : vector<16x16xf32>
    %433 = math.exp %432 : vector<16x16xf32>
    %cst_191 = arith.constant dense<0.000000e+00> : vector<16xf32>
    %434 = vector.multi_reduction <add>, %433, %cst_191 [1] : vector<16x16xf32> to vector<16xf32>
    %435 = vector.shape_cast %434 : vector<16xf32> to vector<16x1xf32>
    %436 = tpu.reciprocal %435 {approx = true} : vector<16x1xf32> -> vector<16x1xf32>
    %437 = vector.broadcast %436 : vector<16x1xf32> to vector<16x16xf32>
    %438 = arith.mulf %433, %437 : vector<16x16xf32>
    %439 = arith.truncf %438 : vector<16x16xf32> to vector<16x16xbf16>
    %cst_192 = arith.constant dense<0.000000e+00> : vector<16x16xf32>
    %440 = tpu.matmul %439, %424, %cst_192 {dimension_numbers = #tpu.dot_dimension_numbers<[1], [0], [0], [1], [0, 0, 1, 1], [], []>} : vector<16x16xbf16>, vector<16x16xbf16>, vector<16x16xf32> -> vector<16x16xf32>
    %441 = arith.truncf %440 : vector<16x16xf32> to vector<16x16xbf16>
    %442 = vector.extract_strided_slice %385 {offsets = [16, 0], sizes = [16, 32], strides = [1, 1]} : vector<32x32xbf16> to vector<16x32xbf16>
    %cst_193 = arith.constant dense<0.000000e+00> : vector<16x32xf32>
    %443 = tpu.matmul %441, %442, %cst_193 {dimension_numbers = #tpu.dot_dimension_numbers<[1], [0], [0], [1], [0, 0, 1, 1], [], []>} : vector<16x16xbf16>, vector<16x32xbf16>, vector<16x32xf32> -> vector<16x32xf32>
    %444 = arith.addf %418, %443 : vector<16x32xf32>
    %445 = vector.broadcast %387 : vector<1x32xf32> to vector<16x32xf32>
    %446 = arith.addf %444, %445 : vector<16x32xf32>
    %447 = arith.addf %446, %374 : vector<16x32xf32>
    %cst_194 = arith.constant dense<0.000000e+00> : vector<16xf32>
    %448 = vector.multi_reduction <add>, %447, %cst_194 [1] : vector<16x32xf32> to vector<16xf32>
    %449 = vector.shape_cast %448 : vector<16xf32> to vector<16x1xf32>
    %cst_195 = arith.constant 3.200000e+01 : f32
    %450 = vector.broadcast %cst_195 : f32 to vector<16x1xf32>
    %451 = arith.divf %449, %450 : vector<16x1xf32>
    %452 = vector.broadcast %451 : vector<16x1xf32> to vector<16x32xf32>
    %453 = arith.subf %447, %452 : vector<16x32xf32>
    %454 = arith.mulf %453, %453 : vector<16x32xf32>
    %cst_196 = arith.constant dense<0.000000e+00> : vector<16xf32>
    %455 = vector.multi_reduction <add>, %454, %cst_196 [1] : vector<16x32xf32> to vector<16xf32>
    %456 = vector.shape_cast %455 : vector<16xf32> to vector<16x1xf32>
    %cst_197 = arith.constant 3.200000e+01 : f32
    %457 = vector.broadcast %cst_197 : f32 to vector<16x1xf32>
    %458 = arith.divf %456, %457 : vector<16x1xf32>
    %459 = vector.broadcast %451 : vector<16x1xf32> to vector<16x32xf32>
    %460 = arith.subf %447, %459 : vector<16x32xf32>
    %cst_198 = arith.constant 9.99999974E-6 : f32
    %461 = vector.broadcast %cst_198 : f32 to vector<16x1xf32>
    %462 = arith.addf %458, %461 : vector<16x1xf32>
    %463 = math.rsqrt %462 : vector<16x1xf32>
    %464 = vector.broadcast %463 : vector<16x1xf32> to vector<16x32xf32>
    %465 = arith.mulf %460, %464 : vector<16x32xf32>
    %466 = vector.broadcast %389 : vector<1x32xf32> to vector<16x32xf32>
    %467 = arith.mulf %465, %466 : vector<16x32xf32>
    %468 = vector.broadcast %391 : vector<1x32xf32> to vector<16x32xf32>
    %469 = arith.addf %467, %468 : vector<16x32xf32>
    %c0_199 = arith.constant 0 : index
    %c0_200 = arith.constant 0 : index
    %c0_201 = arith.constant 0 : index
    %470 = vector.load %arg27[%c0_199, %c0_200, %c0_201] : memref<2x32x64xbf16, #tpu.memory_space<vmem>>, vector<1x32x64xbf16>
    %471 = vector.shape_cast %470 : vector<1x32x64xbf16> to vector<32x64xbf16>
    %c0_202 = arith.constant 0 : index
    %c0_203 = arith.constant 0 : index
    %c0_204 = arith.constant 0 : index
    %472 = vector.load %arg28[%c0_202, %c0_203, %c0_204] : memref<2x1x64xf32, #tpu.memory_space<vmem>>, vector<1x1x64xf32>
    %473 = vector.shape_cast %472 : vector<1x1x64xf32> to vector<1x64xf32>
    %c0_205 = arith.constant 0 : index
    %c0_206 = arith.constant 0 : index
    %c0_207 = arith.constant 0 : index
    %474 = vector.load %arg29[%c0_205, %c0_206, %c0_207] : memref<2x64x32xbf16, #tpu.memory_space<vmem>>, vector<1x64x32xbf16>
    %475 = vector.shape_cast %474 : vector<1x64x32xbf16> to vector<64x32xbf16>
    %c0_208 = arith.constant 0 : index
    %c0_209 = arith.constant 0 : index
    %c0_210 = arith.constant 0 : index
    %476 = vector.load %arg30[%c0_208, %c0_209, %c0_210] : memref<2x1x32xf32, #tpu.memory_space<vmem>>, vector<1x1x32xf32>
    %477 = vector.shape_cast %476 : vector<1x1x32xf32> to vector<1x32xf32>
    %c0_211 = arith.constant 0 : index
    %c0_212 = arith.constant 0 : index
    %c0_213 = arith.constant 0 : index
    %478 = vector.load %arg31[%c0_211, %c0_212, %c0_213] : memref<2x1x32xf32, #tpu.memory_space<vmem>>, vector<1x1x32xf32>
    %479 = vector.shape_cast %478 : vector<1x1x32xf32> to vector<1x32xf32>
    %c0_214 = arith.constant 0 : index
    %c0_215 = arith.constant 0 : index
    %c0_216 = arith.constant 0 : index
    %480 = vector.load %arg32[%c0_214, %c0_215, %c0_216] : memref<2x1x32xf32, #tpu.memory_space<vmem>>, vector<1x1x32xf32>
    %481 = vector.shape_cast %480 : vector<1x1x32xf32> to vector<1x32xf32>
    %482 = arith.truncf %469 : vector<16x32xf32> to vector<16x32xbf16>
    %cst_217 = arith.constant dense<0.000000e+00> : vector<16x64xf32>
    %483 = tpu.matmul %482, %471, %cst_217 {dimension_numbers = #tpu.dot_dimension_numbers<[1], [0], [0], [1], [0, 0, 1, 1], [], []>} : vector<16x32xbf16>, vector<32x64xbf16>, vector<16x64xf32> -> vector<16x64xf32>
    %484 = vector.broadcast %473 : vector<1x64xf32> to vector<16x64xf32>
    %485 = arith.addf %483, %484 : vector<16x64xf32>
    %cst_218 = arith.constant 0.000000e+00 : f32
    %486 = vector.broadcast %cst_218 : f32 to vector<16x64xf32>
    %487 = arith.maximumf %485, %486 : vector<16x64xf32>
    %488 = arith.truncf %487 : vector<16x64xf32> to vector<16x64xbf16>
    %cst_219 = arith.constant dense<0.000000e+00> : vector<16x32xf32>
    %489 = tpu.matmul %488, %475, %cst_219 {dimension_numbers = #tpu.dot_dimension_numbers<[1], [0], [0], [1], [0, 0, 1, 1], [], []>} : vector<16x64xbf16>, vector<64x32xbf16>, vector<16x32xf32> -> vector<16x32xf32>
    %490 = vector.broadcast %477 : vector<1x32xf32> to vector<16x32xf32>
    %491 = arith.addf %489, %490 : vector<16x32xf32>
    %492 = arith.addf %491, %469 : vector<16x32xf32>
    %cst_220 = arith.constant dense<0.000000e+00> : vector<16xf32>
    %493 = vector.multi_reduction <add>, %492, %cst_220 [1] : vector<16x32xf32> to vector<16xf32>
    %494 = vector.shape_cast %493 : vector<16xf32> to vector<16x1xf32>
    %cst_221 = arith.constant 3.200000e+01 : f32
    %495 = vector.broadcast %cst_221 : f32 to vector<16x1xf32>
    %496 = arith.divf %494, %495 : vector<16x1xf32>
    %497 = vector.broadcast %496 : vector<16x1xf32> to vector<16x32xf32>
    %498 = arith.subf %492, %497 : vector<16x32xf32>
    %499 = arith.mulf %498, %498 : vector<16x32xf32>
    %cst_222 = arith.constant dense<0.000000e+00> : vector<16xf32>
    %500 = vector.multi_reduction <add>, %499, %cst_222 [1] : vector<16x32xf32> to vector<16xf32>
    %501 = vector.shape_cast %500 : vector<16xf32> to vector<16x1xf32>
    %cst_223 = arith.constant 3.200000e+01 : f32
    %502 = vector.broadcast %cst_223 : f32 to vector<16x1xf32>
    %503 = arith.divf %501, %502 : vector<16x1xf32>
    %504 = vector.broadcast %496 : vector<16x1xf32> to vector<16x32xf32>
    %505 = arith.subf %492, %504 : vector<16x32xf32>
    %cst_224 = arith.constant 9.99999974E-6 : f32
    %506 = vector.broadcast %cst_224 : f32 to vector<16x1xf32>
    %507 = arith.addf %503, %506 : vector<16x1xf32>
    %508 = math.rsqrt %507 : vector<16x1xf32>
    %509 = vector.broadcast %508 : vector<16x1xf32> to vector<16x32xf32>
    %510 = arith.mulf %505, %509 : vector<16x32xf32>
    %511 = vector.broadcast %479 : vector<1x32xf32> to vector<16x32xf32>
    %512 = arith.mulf %510, %511 : vector<16x32xf32>
    %513 = vector.broadcast %481 : vector<1x32xf32> to vector<16x32xf32>
    %514 = arith.addf %512, %513 : vector<16x32xf32>
    %515 = arith.truncf %514 : vector<16x32xf32> to vector<16x32xbf16>
    %c1_225 = arith.constant 1 : index
    %c0_226 = arith.constant 0 : index
    %c0_227 = arith.constant 0 : index
    %516 = vector.load %arg16[%c1_225, %c0_226, %c0_227] : memref<2x32x96xbf16, #tpu.memory_space<vmem>>, vector<1x32x96xbf16>
    %517 = vector.shape_cast %516 : vector<1x32x96xbf16> to vector<32x96xbf16>
    %cst_228 = arith.constant dense<0.000000e+00> : vector<16x96xf32>
    %518 = tpu.matmul %515, %517, %cst_228 {dimension_numbers = #tpu.dot_dimension_numbers<[1], [0], [0], [1], [0, 0, 1, 1], [], []>} : vector<16x32xbf16>, vector<32x96xbf16>, vector<16x96xf32> -> vector<16x96xf32>
    %519 = vector.extract_strided_slice %518 {offsets = [0, 0], sizes = [16, 32], strides = [1, 1]} : vector<16x96xf32> to vector<16x32xf32>
    %520 = vector.extract_strided_slice %518 {offsets = [0, 32], sizes = [16, 32], strides = [1, 1]} : vector<16x96xf32> to vector<16x32xf32>
    %521 = vector.extract_strided_slice %518 {offsets = [0, 64], sizes = [16, 32], strides = [1, 1]} : vector<16x96xf32> to vector<16x32xf32>
    %c1_229 = arith.constant 1 : index
    %c0_230 = arith.constant 0 : index
    %c0_231 = arith.constant 0 : index
    %522 = vector.load %arg17[%c1_229, %c0_230, %c0_231] : memref<2x32x32xbf16, #tpu.memory_space<vmem>>, vector<1x32x32xbf16>
    %523 = vector.shape_cast %522 : vector<1x32x32xbf16> to vector<32x32xbf16>
    %c1_232 = arith.constant 1 : index
    %c0_233 = arith.constant 0 : index
    %c0_234 = arith.constant 0 : index
    %524 = vector.load %arg18[%c1_232, %c0_233, %c0_234] : memref<2x1x32xf32, #tpu.memory_space<vmem>>, vector<1x1x32xf32>
    %525 = vector.shape_cast %524 : vector<1x1x32xf32> to vector<1x32xf32>
    %c1_235 = arith.constant 1 : index
    %c0_236 = arith.constant 0 : index
    %c0_237 = arith.constant 0 : index
    %526 = vector.load %arg19[%c1_235, %c0_236, %c0_237] : memref<2x1x32xf32, #tpu.memory_space<vmem>>, vector<1x1x32xf32>
    %527 = vector.shape_cast %526 : vector<1x1x32xf32> to vector<1x32xf32>
    %c1_238 = arith.constant 1 : index
    %c0_239 = arith.constant 0 : index
    %c0_240 = arith.constant 0 : index
    %528 = vector.load %arg20[%c1_238, %c0_239, %c0_240] : memref<2x1x32xf32, #tpu.memory_space<vmem>>, vector<1x1x32xf32>
    %529 = vector.shape_cast %528 : vector<1x1x32xf32> to vector<1x32xf32>
    %cst_241 = arith.constant 0.000000e+00 : f32
    %530 = vector.broadcast %cst_241 : f32 to vector<16x32xf32>
    %531 = vector.extract_strided_slice %519 {offsets = [0, 0], sizes = [16, 16], strides = [1, 1]} : vector<16x32xf32> to vector<16x16xf32>
    %532 = arith.truncf %531 : vector<16x16xf32> to vector<16x16xbf16>
    %533 = vector.extract_strided_slice %520 {offsets = [0, 0], sizes = [16, 16], strides = [1, 1]} : vector<16x32xf32> to vector<16x16xf32>
    %534 = arith.truncf %533 : vector<16x16xf32> to vector<16x16xbf16>
    %535 = vector.extract_strided_slice %521 {offsets = [0, 0], sizes = [16, 16], strides = [1, 1]} : vector<16x32xf32> to vector<16x16xf32>
    %536 = arith.truncf %535 : vector<16x16xf32> to vector<16x16xbf16>
    %cst_242 = arith.constant dense<0.000000e+00> : vector<16x16xf32>
    %537 = tpu.matmul %532, %534, %cst_242 {dimension_numbers = #tpu.dot_dimension_numbers<[1], [1], [0], [0], [0, 0, 1, 0], [], []>} : vector<16x16xbf16>, vector<16x16xbf16>, vector<16x16xf32> -> vector<16x16xf32>
    %cst_243 = arith.constant 2.500000e-01 : f32
    %538 = vector.broadcast %cst_243 : f32 to vector<16x16xf32>
    %539 = arith.mulf %537, %538 : vector<16x16xf32>
    %540 = arith.addf %539, %3 : vector<16x16xf32>
    %cst_244 = arith.constant dense<0xFF800000> : vector<16xf32>
    %541 = vector.multi_reduction <maximumf>, %540, %cst_244 [1] : vector<16x16xf32> to vector<16xf32>
    %542 = vector.shape_cast %541 : vector<16xf32> to vector<16x1xf32>
    %543 = vector.broadcast %542 : vector<16x1xf32> to vector<16x16xf32>
    %544 = arith.subf %540, %543 : vector<16x16xf32>
    %545 = math.exp %544 : vector<16x16xf32>
    %cst_245 = arith.constant dense<0.000000e+00> : vector<16xf32>
    %546 = vector.multi_reduction <add>, %545, %cst_245 [1] : vector<16x16xf32> to vector<16xf32>
    %547 = vector.shape_cast %546 : vector<16xf32> to vector<16x1xf32>
    %548 = tpu.reciprocal %547 {approx = true} : vector<16x1xf32> -> vector<16x1xf32>
    %549 = vector.broadcast %548 : vector<16x1xf32> to vector<16x16xf32>
    %550 = arith.mulf %545, %549 : vector<16x16xf32>
    %551 = arith.truncf %550 : vector<16x16xf32> to vector<16x16xbf16>
    %cst_246 = arith.constant dense<0.000000e+00> : vector<16x16xf32>
    %552 = tpu.matmul %551, %536, %cst_246 {dimension_numbers = #tpu.dot_dimension_numbers<[1], [0], [0], [1], [0, 0, 1, 1], [], []>} : vector<16x16xbf16>, vector<16x16xbf16>, vector<16x16xf32> -> vector<16x16xf32>
    %553 = arith.truncf %552 : vector<16x16xf32> to vector<16x16xbf16>
    %554 = vector.extract_strided_slice %523 {offsets = [0, 0], sizes = [16, 32], strides = [1, 1]} : vector<32x32xbf16> to vector<16x32xbf16>
    %cst_247 = arith.constant dense<0.000000e+00> : vector<16x32xf32>
    %555 = tpu.matmul %553, %554, %cst_247 {dimension_numbers = #tpu.dot_dimension_numbers<[1], [0], [0], [1], [0, 0, 1, 1], [], []>} : vector<16x16xbf16>, vector<16x32xbf16>, vector<16x32xf32> -> vector<16x32xf32>
    %556 = arith.addf %530, %555 : vector<16x32xf32>
    %557 = vector.extract_strided_slice %519 {offsets = [0, 16], sizes = [16, 16], strides = [1, 1]} : vector<16x32xf32> to vector<16x16xf32>
    %558 = arith.truncf %557 : vector<16x16xf32> to vector<16x16xbf16>
    %559 = vector.extract_strided_slice %520 {offsets = [0, 16], sizes = [16, 16], strides = [1, 1]} : vector<16x32xf32> to vector<16x16xf32>
    %560 = arith.truncf %559 : vector<16x16xf32> to vector<16x16xbf16>
    %561 = vector.extract_strided_slice %521 {offsets = [0, 16], sizes = [16, 16], strides = [1, 1]} : vector<16x32xf32> to vector<16x16xf32>
    %562 = arith.truncf %561 : vector<16x16xf32> to vector<16x16xbf16>
    %cst_248 = arith.constant dense<0.000000e+00> : vector<16x16xf32>
    %563 = tpu.matmul %558, %560, %cst_248 {dimension_numbers = #tpu.dot_dimension_numbers<[1], [1], [0], [0], [0, 0, 1, 0], [], []>} : vector<16x16xbf16>, vector<16x16xbf16>, vector<16x16xf32> -> vector<16x16xf32>
    %cst_249 = arith.constant 2.500000e-01 : f32
    %564 = vector.broadcast %cst_249 : f32 to vector<16x16xf32>
    %565 = arith.mulf %563, %564 : vector<16x16xf32>
    %566 = arith.addf %565, %3 : vector<16x16xf32>
    %cst_250 = arith.constant dense<0xFF800000> : vector<16xf32>
    %567 = vector.multi_reduction <maximumf>, %566, %cst_250 [1] : vector<16x16xf32> to vector<16xf32>
    %568 = vector.shape_cast %567 : vector<16xf32> to vector<16x1xf32>
    %569 = vector.broadcast %568 : vector<16x1xf32> to vector<16x16xf32>
    %570 = arith.subf %566, %569 : vector<16x16xf32>
    %571 = math.exp %570 : vector<16x16xf32>
    %cst_251 = arith.constant dense<0.000000e+00> : vector<16xf32>
    %572 = vector.multi_reduction <add>, %571, %cst_251 [1] : vector<16x16xf32> to vector<16xf32>
    %573 = vector.shape_cast %572 : vector<16xf32> to vector<16x1xf32>
    %574 = tpu.reciprocal %573 {approx = true} : vector<16x1xf32> -> vector<16x1xf32>
    %575 = vector.broadcast %574 : vector<16x1xf32> to vector<16x16xf32>
    %576 = arith.mulf %571, %575 : vector<16x16xf32>
    %577 = arith.truncf %576 : vector<16x16xf32> to vector<16x16xbf16>
    %cst_252 = arith.constant dense<0.000000e+00> : vector<16x16xf32>
    %578 = tpu.matmul %577, %562, %cst_252 {dimension_numbers = #tpu.dot_dimension_numbers<[1], [0], [0], [1], [0, 0, 1, 1], [], []>} : vector<16x16xbf16>, vector<16x16xbf16>, vector<16x16xf32> -> vector<16x16xf32>
    %579 = arith.truncf %578 : vector<16x16xf32> to vector<16x16xbf16>
    %580 = vector.extract_strided_slice %523 {offsets = [16, 0], sizes = [16, 32], strides = [1, 1]} : vector<32x32xbf16> to vector<16x32xbf16>
    %cst_253 = arith.constant dense<0.000000e+00> : vector<16x32xf32>
    %581 = tpu.matmul %579, %580, %cst_253 {dimension_numbers = #tpu.dot_dimension_numbers<[1], [0], [0], [1], [0, 0, 1, 1], [], []>} : vector<16x16xbf16>, vector<16x32xbf16>, vector<16x32xf32> -> vector<16x32xf32>
    %582 = arith.addf %556, %581 : vector<16x32xf32>
    %583 = vector.broadcast %525 : vector<1x32xf32> to vector<16x32xf32>
    %584 = arith.addf %582, %583 : vector<16x32xf32>
    %585 = arith.addf %584, %514 : vector<16x32xf32>
    %cst_254 = arith.constant dense<0.000000e+00> : vector<16xf32>
    %586 = vector.multi_reduction <add>, %585, %cst_254 [1] : vector<16x32xf32> to vector<16xf32>
    %587 = vector.shape_cast %586 : vector<16xf32> to vector<16x1xf32>
    %cst_255 = arith.constant 3.200000e+01 : f32
    %588 = vector.broadcast %cst_255 : f32 to vector<16x1xf32>
    %589 = arith.divf %587, %588 : vector<16x1xf32>
    %590 = vector.broadcast %589 : vector<16x1xf32> to vector<16x32xf32>
    %591 = arith.subf %585, %590 : vector<16x32xf32>
    %592 = arith.mulf %591, %591 : vector<16x32xf32>
    %cst_256 = arith.constant dense<0.000000e+00> : vector<16xf32>
    %593 = vector.multi_reduction <add>, %592, %cst_256 [1] : vector<16x32xf32> to vector<16xf32>
    %594 = vector.shape_cast %593 : vector<16xf32> to vector<16x1xf32>
    %cst_257 = arith.constant 3.200000e+01 : f32
    %595 = vector.broadcast %cst_257 : f32 to vector<16x1xf32>
    %596 = arith.divf %594, %595 : vector<16x1xf32>
    %597 = vector.broadcast %589 : vector<16x1xf32> to vector<16x32xf32>
    %598 = arith.subf %585, %597 : vector<16x32xf32>
    %cst_258 = arith.constant 9.99999974E-6 : f32
    %599 = vector.broadcast %cst_258 : f32 to vector<16x1xf32>
    %600 = arith.addf %596, %599 : vector<16x1xf32>
    %601 = math.rsqrt %600 : vector<16x1xf32>
    %602 = vector.broadcast %601 : vector<16x1xf32> to vector<16x32xf32>
    %603 = arith.mulf %598, %602 : vector<16x32xf32>
    %604 = vector.broadcast %527 : vector<1x32xf32> to vector<16x32xf32>
    %605 = arith.mulf %603, %604 : vector<16x32xf32>
    %606 = vector.broadcast %529 : vector<1x32xf32> to vector<16x32xf32>
    %607 = arith.addf %605, %606 : vector<16x32xf32>
    %608 = arith.truncf %607 : vector<16x32xf32> to vector<16x32xbf16>
    %c1_259 = arith.constant 1 : index
    %c0_260 = arith.constant 0 : index
    %c0_261 = arith.constant 0 : index
    %609 = vector.load %arg21[%c1_259, %c0_260, %c0_261] : memref<2x32x32xbf16, #tpu.memory_space<vmem>>, vector<1x32x32xbf16>
    %610 = vector.shape_cast %609 : vector<1x32x32xbf16> to vector<32x32xbf16>
    %cst_262 = arith.constant dense<0.000000e+00> : vector<16x32xf32>
    %611 = tpu.matmul %608, %610, %cst_262 {dimension_numbers = #tpu.dot_dimension_numbers<[1], [0], [0], [1], [0, 0, 1, 1], [], []>} : vector<16x32xbf16>, vector<32x32xbf16>, vector<16x32xf32> -> vector<16x32xf32>
    %c1_263 = arith.constant 1 : index
    %c0_264 = arith.constant 0 : index
    %c0_265 = arith.constant 0 : index
    %612 = vector.load %arg22[%c1_263, %c0_264, %c0_265] : memref<2x32x64xbf16, #tpu.memory_space<vmem>>, vector<1x32x64xbf16>
    %613 = vector.shape_cast %612 : vector<1x32x64xbf16> to vector<32x64xbf16>
    %cst_266 = arith.constant dense<0.000000e+00> : vector<16x64xf32>
    %614 = tpu.matmul %281, %613, %cst_266 {dimension_numbers = #tpu.dot_dimension_numbers<[1], [0], [0], [1], [0, 0, 1, 1], [], []>} : vector<16x32xbf16>, vector<32x64xbf16>, vector<16x64xf32> -> vector<16x64xf32>
    %615 = vector.extract_strided_slice %614 {offsets = [0, 0], sizes = [16, 32], strides = [1, 1]} : vector<16x64xf32> to vector<16x32xf32>
    %616 = vector.extract_strided_slice %614 {offsets = [0, 32], sizes = [16, 32], strides = [1, 1]} : vector<16x64xf32> to vector<16x32xf32>
    %c1_267 = arith.constant 1 : index
    %c0_268 = arith.constant 0 : index
    %c0_269 = arith.constant 0 : index
    %617 = vector.load %arg23[%c1_267, %c0_268, %c0_269] : memref<2x32x32xbf16, #tpu.memory_space<vmem>>, vector<1x32x32xbf16>
    %618 = vector.shape_cast %617 : vector<1x32x32xbf16> to vector<32x32xbf16>
    %c1_270 = arith.constant 1 : index
    %c0_271 = arith.constant 0 : index
    %c0_272 = arith.constant 0 : index
    %619 = vector.load %arg24[%c1_270, %c0_271, %c0_272] : memref<2x1x32xf32, #tpu.memory_space<vmem>>, vector<1x1x32xf32>
    %620 = vector.shape_cast %619 : vector<1x1x32xf32> to vector<1x32xf32>
    %c1_273 = arith.constant 1 : index
    %c0_274 = arith.constant 0 : index
    %c0_275 = arith.constant 0 : index
    %621 = vector.load %arg25[%c1_273, %c0_274, %c0_275] : memref<2x1x32xf32, #tpu.memory_space<vmem>>, vector<1x1x32xf32>
    %622 = vector.shape_cast %621 : vector<1x1x32xf32> to vector<1x32xf32>
    %c1_276 = arith.constant 1 : index
    %c0_277 = arith.constant 0 : index
    %c0_278 = arith.constant 0 : index
    %623 = vector.load %arg26[%c1_276, %c0_277, %c0_278] : memref<2x1x32xf32, #tpu.memory_space<vmem>>, vector<1x1x32xf32>
    %624 = vector.shape_cast %623 : vector<1x1x32xf32> to vector<1x32xf32>
    %cst_279 = arith.constant 0.000000e+00 : f32
    %625 = vector.broadcast %cst_279 : f32 to vector<16x32xf32>
    %626 = vector.extract_strided_slice %611 {offsets = [0, 0], sizes = [16, 16], strides = [1, 1]} : vector<16x32xf32> to vector<16x16xf32>
    %627 = arith.truncf %626 : vector<16x16xf32> to vector<16x16xbf16>
    %628 = vector.extract_strided_slice %615 {offsets = [0, 0], sizes = [16, 16], strides = [1, 1]} : vector<16x32xf32> to vector<16x16xf32>
    %629 = arith.truncf %628 : vector<16x16xf32> to vector<16x16xbf16>
    %630 = vector.extract_strided_slice %616 {offsets = [0, 0], sizes = [16, 16], strides = [1, 1]} : vector<16x32xf32> to vector<16x16xf32>
    %631 = arith.truncf %630 : vector<16x16xf32> to vector<16x16xbf16>
    %cst_280 = arith.constant dense<0.000000e+00> : vector<16x16xf32>
    %632 = tpu.matmul %627, %629, %cst_280 {dimension_numbers = #tpu.dot_dimension_numbers<[1], [1], [0], [0], [0, 0, 1, 0], [], []>} : vector<16x16xbf16>, vector<16x16xbf16>, vector<16x16xf32> -> vector<16x16xf32>
    %cst_281 = arith.constant 2.500000e-01 : f32
    %633 = vector.broadcast %cst_281 : f32 to vector<16x16xf32>
    %634 = arith.mulf %632, %633 : vector<16x16xf32>
    %635 = arith.addf %634, %4 : vector<16x16xf32>
    %cst_282 = arith.constant dense<0xFF800000> : vector<16xf32>
    %636 = vector.multi_reduction <maximumf>, %635, %cst_282 [1] : vector<16x16xf32> to vector<16xf32>
    %637 = vector.shape_cast %636 : vector<16xf32> to vector<16x1xf32>
    %638 = vector.broadcast %637 : vector<16x1xf32> to vector<16x16xf32>
    %639 = arith.subf %635, %638 : vector<16x16xf32>
    %640 = math.exp %639 : vector<16x16xf32>
    %cst_283 = arith.constant dense<0.000000e+00> : vector<16xf32>
    %641 = vector.multi_reduction <add>, %640, %cst_283 [1] : vector<16x16xf32> to vector<16xf32>
    %642 = vector.shape_cast %641 : vector<16xf32> to vector<16x1xf32>
    %643 = tpu.reciprocal %642 {approx = true} : vector<16x1xf32> -> vector<16x1xf32>
    %644 = vector.broadcast %643 : vector<16x1xf32> to vector<16x16xf32>
    %645 = arith.mulf %640, %644 : vector<16x16xf32>
    %646 = arith.truncf %645 : vector<16x16xf32> to vector<16x16xbf16>
    %cst_284 = arith.constant dense<0.000000e+00> : vector<16x16xf32>
    %647 = tpu.matmul %646, %631, %cst_284 {dimension_numbers = #tpu.dot_dimension_numbers<[1], [0], [0], [1], [0, 0, 1, 1], [], []>} : vector<16x16xbf16>, vector<16x16xbf16>, vector<16x16xf32> -> vector<16x16xf32>
    %648 = arith.truncf %647 : vector<16x16xf32> to vector<16x16xbf16>
    %649 = vector.extract_strided_slice %618 {offsets = [0, 0], sizes = [16, 32], strides = [1, 1]} : vector<32x32xbf16> to vector<16x32xbf16>
    %cst_285 = arith.constant dense<0.000000e+00> : vector<16x32xf32>
    %650 = tpu.matmul %648, %649, %cst_285 {dimension_numbers = #tpu.dot_dimension_numbers<[1], [0], [0], [1], [0, 0, 1, 1], [], []>} : vector<16x16xbf16>, vector<16x32xbf16>, vector<16x32xf32> -> vector<16x32xf32>
    %651 = arith.addf %625, %650 : vector<16x32xf32>
    %652 = vector.extract_strided_slice %611 {offsets = [0, 16], sizes = [16, 16], strides = [1, 1]} : vector<16x32xf32> to vector<16x16xf32>
    %653 = arith.truncf %652 : vector<16x16xf32> to vector<16x16xbf16>
    %654 = vector.extract_strided_slice %615 {offsets = [0, 16], sizes = [16, 16], strides = [1, 1]} : vector<16x32xf32> to vector<16x16xf32>
    %655 = arith.truncf %654 : vector<16x16xf32> to vector<16x16xbf16>
    %656 = vector.extract_strided_slice %616 {offsets = [0, 16], sizes = [16, 16], strides = [1, 1]} : vector<16x32xf32> to vector<16x16xf32>
    %657 = arith.truncf %656 : vector<16x16xf32> to vector<16x16xbf16>
    %cst_286 = arith.constant dense<0.000000e+00> : vector<16x16xf32>
    %658 = tpu.matmul %653, %655, %cst_286 {dimension_numbers = #tpu.dot_dimension_numbers<[1], [1], [0], [0], [0, 0, 1, 0], [], []>} : vector<16x16xbf16>, vector<16x16xbf16>, vector<16x16xf32> -> vector<16x16xf32>
    %cst_287 = arith.constant 2.500000e-01 : f32
    %659 = vector.broadcast %cst_287 : f32 to vector<16x16xf32>
    %660 = arith.mulf %658, %659 : vector<16x16xf32>
    %661 = arith.addf %660, %4 : vector<16x16xf32>
    %cst_288 = arith.constant dense<0xFF800000> : vector<16xf32>
    %662 = vector.multi_reduction <maximumf>, %661, %cst_288 [1] : vector<16x16xf32> to vector<16xf32>
    %663 = vector.shape_cast %662 : vector<16xf32> to vector<16x1xf32>
    %664 = vector.broadcast %663 : vector<16x1xf32> to vector<16x16xf32>
    %665 = arith.subf %661, %664 : vector<16x16xf32>
    %666 = math.exp %665 : vector<16x16xf32>
    %cst_289 = arith.constant dense<0.000000e+00> : vector<16xf32>
    %667 = vector.multi_reduction <add>, %666, %cst_289 [1] : vector<16x16xf32> to vector<16xf32>
    %668 = vector.shape_cast %667 : vector<16xf32> to vector<16x1xf32>
    %669 = tpu.reciprocal %668 {approx = true} : vector<16x1xf32> -> vector<16x1xf32>
    %670 = vector.broadcast %669 : vector<16x1xf32> to vector<16x16xf32>
    %671 = arith.mulf %666, %670 : vector<16x16xf32>
    %672 = arith.truncf %671 : vector<16x16xf32> to vector<16x16xbf16>
    %cst_290 = arith.constant dense<0.000000e+00> : vector<16x16xf32>
    %673 = tpu.matmul %672, %657, %cst_290 {dimension_numbers = #tpu.dot_dimension_numbers<[1], [0], [0], [1], [0, 0, 1, 1], [], []>} : vector<16x16xbf16>, vector<16x16xbf16>, vector<16x16xf32> -> vector<16x16xf32>
    %674 = arith.truncf %673 : vector<16x16xf32> to vector<16x16xbf16>
    %675 = vector.extract_strided_slice %618 {offsets = [16, 0], sizes = [16, 32], strides = [1, 1]} : vector<32x32xbf16> to vector<16x32xbf16>
    %cst_291 = arith.constant dense<0.000000e+00> : vector<16x32xf32>
    %676 = tpu.matmul %674, %675, %cst_291 {dimension_numbers = #tpu.dot_dimension_numbers<[1], [0], [0], [1], [0, 0, 1, 1], [], []>} : vector<16x16xbf16>, vector<16x32xbf16>, vector<16x32xf32> -> vector<16x32xf32>
    %677 = arith.addf %651, %676 : vector<16x32xf32>
    %678 = vector.broadcast %620 : vector<1x32xf32> to vector<16x32xf32>
    %679 = arith.addf %677, %678 : vector<16x32xf32>
    %680 = arith.addf %679, %607 : vector<16x32xf32>
    %cst_292 = arith.constant dense<0.000000e+00> : vector<16xf32>
    %681 = vector.multi_reduction <add>, %680, %cst_292 [1] : vector<16x32xf32> to vector<16xf32>
    %682 = vector.shape_cast %681 : vector<16xf32> to vector<16x1xf32>
    %cst_293 = arith.constant 3.200000e+01 : f32
    %683 = vector.broadcast %cst_293 : f32 to vector<16x1xf32>
    %684 = arith.divf %682, %683 : vector<16x1xf32>
    %685 = vector.broadcast %684 : vector<16x1xf32> to vector<16x32xf32>
    %686 = arith.subf %680, %685 : vector<16x32xf32>
    %687 = arith.mulf %686, %686 : vector<16x32xf32>
    %cst_294 = arith.constant dense<0.000000e+00> : vector<16xf32>
    %688 = vector.multi_reduction <add>, %687, %cst_294 [1] : vector<16x32xf32> to vector<16xf32>
    %689 = vector.shape_cast %688 : vector<16xf32> to vector<16x1xf32>
    %cst_295 = arith.constant 3.200000e+01 : f32
    %690 = vector.broadcast %cst_295 : f32 to vector<16x1xf32>
    %691 = arith.divf %689, %690 : vector<16x1xf32>
    %692 = vector.broadcast %684 : vector<16x1xf32> to vector<16x32xf32>
    %693 = arith.subf %680, %692 : vector<16x32xf32>
    %cst_296 = arith.constant 9.99999974E-6 : f32
    %694 = vector.broadcast %cst_296 : f32 to vector<16x1xf32>
    %695 = arith.addf %691, %694 : vector<16x1xf32>
    %696 = math.rsqrt %695 : vector<16x1xf32>
    %697 = vector.broadcast %696 : vector<16x1xf32> to vector<16x32xf32>
    %698 = arith.mulf %693, %697 : vector<16x32xf32>
    %699 = vector.broadcast %622 : vector<1x32xf32> to vector<16x32xf32>
    %700 = arith.mulf %698, %699 : vector<16x32xf32>
    %701 = vector.broadcast %624 : vector<1x32xf32> to vector<16x32xf32>
    %702 = arith.addf %700, %701 : vector<16x32xf32>
    %c1_297 = arith.constant 1 : index
    %c0_298 = arith.constant 0 : index
    %c0_299 = arith.constant 0 : index
    %703 = vector.load %arg27[%c1_297, %c0_298, %c0_299] : memref<2x32x64xbf16, #tpu.memory_space<vmem>>, vector<1x32x64xbf16>
    %704 = vector.shape_cast %703 : vector<1x32x64xbf16> to vector<32x64xbf16>
    %c1_300 = arith.constant 1 : index
    %c0_301 = arith.constant 0 : index
    %c0_302 = arith.constant 0 : index
    %705 = vector.load %arg28[%c1_300, %c0_301, %c0_302] : memref<2x1x64xf32, #tpu.memory_space<vmem>>, vector<1x1x64xf32>
    %706 = vector.shape_cast %705 : vector<1x1x64xf32> to vector<1x64xf32>
    %c1_303 = arith.constant 1 : index
    %c0_304 = arith.constant 0 : index
    %c0_305 = arith.constant 0 : index
    %707 = vector.load %arg29[%c1_303, %c0_304, %c0_305] : memref<2x64x32xbf16, #tpu.memory_space<vmem>>, vector<1x64x32xbf16>
    %708 = vector.shape_cast %707 : vector<1x64x32xbf16> to vector<64x32xbf16>
    %c1_306 = arith.constant 1 : index
    %c0_307 = arith.constant 0 : index
    %c0_308 = arith.constant 0 : index
    %709 = vector.load %arg30[%c1_306, %c0_307, %c0_308] : memref<2x1x32xf32, #tpu.memory_space<vmem>>, vector<1x1x32xf32>
    %710 = vector.shape_cast %709 : vector<1x1x32xf32> to vector<1x32xf32>
    %c1_309 = arith.constant 1 : index
    %c0_310 = arith.constant 0 : index
    %c0_311 = arith.constant 0 : index
    %711 = vector.load %arg31[%c1_309, %c0_310, %c0_311] : memref<2x1x32xf32, #tpu.memory_space<vmem>>, vector<1x1x32xf32>
    %712 = vector.shape_cast %711 : vector<1x1x32xf32> to vector<1x32xf32>
    %c1_312 = arith.constant 1 : index
    %c0_313 = arith.constant 0 : index
    %c0_314 = arith.constant 0 : index
    %713 = vector.load %arg32[%c1_312, %c0_313, %c0_314] : memref<2x1x32xf32, #tpu.memory_space<vmem>>, vector<1x1x32xf32>
    %714 = vector.shape_cast %713 : vector<1x1x32xf32> to vector<1x32xf32>
    %715 = arith.truncf %702 : vector<16x32xf32> to vector<16x32xbf16>
    %cst_315 = arith.constant dense<0.000000e+00> : vector<16x64xf32>
    %716 = tpu.matmul %715, %704, %cst_315 {dimension_numbers = #tpu.dot_dimension_numbers<[1], [0], [0], [1], [0, 0, 1, 1], [], []>} : vector<16x32xbf16>, vector<32x64xbf16>, vector<16x64xf32> -> vector<16x64xf32>
    %717 = vector.broadcast %706 : vector<1x64xf32> to vector<16x64xf32>
    %718 = arith.addf %716, %717 : vector<16x64xf32>
    %cst_316 = arith.constant 0.000000e+00 : f32
    %719 = vector.broadcast %cst_316 : f32 to vector<16x64xf32>
    %720 = arith.maximumf %718, %719 : vector<16x64xf32>
    %721 = arith.truncf %720 : vector<16x64xf32> to vector<16x64xbf16>
    %cst_317 = arith.constant dense<0.000000e+00> : vector<16x32xf32>
    %722 = tpu.matmul %721, %708, %cst_317 {dimension_numbers = #tpu.dot_dimension_numbers<[1], [0], [0], [1], [0, 0, 1, 1], [], []>} : vector<16x64xbf16>, vector<64x32xbf16>, vector<16x32xf32> -> vector<16x32xf32>
    %723 = vector.broadcast %710 : vector<1x32xf32> to vector<16x32xf32>
    %724 = arith.addf %722, %723 : vector<16x32xf32>
    %725 = arith.addf %724, %702 : vector<16x32xf32>
    %cst_318 = arith.constant dense<0.000000e+00> : vector<16xf32>
    %726 = vector.multi_reduction <add>, %725, %cst_318 [1] : vector<16x32xf32> to vector<16xf32>
    %727 = vector.shape_cast %726 : vector<16xf32> to vector<16x1xf32>
    %cst_319 = arith.constant 3.200000e+01 : f32
    %728 = vector.broadcast %cst_319 : f32 to vector<16x1xf32>
    %729 = arith.divf %727, %728 : vector<16x1xf32>
    %730 = vector.broadcast %729 : vector<16x1xf32> to vector<16x32xf32>
    %731 = arith.subf %725, %730 : vector<16x32xf32>
    %732 = arith.mulf %731, %731 : vector<16x32xf32>
    %cst_320 = arith.constant dense<0.000000e+00> : vector<16xf32>
    %733 = vector.multi_reduction <add>, %732, %cst_320 [1] : vector<16x32xf32> to vector<16xf32>
    %734 = vector.shape_cast %733 : vector<16xf32> to vector<16x1xf32>
    %cst_321 = arith.constant 3.200000e+01 : f32
    %735 = vector.broadcast %cst_321 : f32 to vector<16x1xf32>
    %736 = arith.divf %734, %735 : vector<16x1xf32>
    %737 = vector.broadcast %729 : vector<16x1xf32> to vector<16x32xf32>
    %738 = arith.subf %725, %737 : vector<16x32xf32>
    %cst_322 = arith.constant 9.99999974E-6 : f32
    %739 = vector.broadcast %cst_322 : f32 to vector<16x1xf32>
    %740 = arith.addf %736, %739 : vector<16x1xf32>
    %741 = math.rsqrt %740 : vector<16x1xf32>
    %742 = vector.broadcast %741 : vector<16x1xf32> to vector<16x32xf32>
    %743 = arith.mulf %738, %742 : vector<16x32xf32>
    %744 = vector.broadcast %712 : vector<1x32xf32> to vector<16x32xf32>
    %745 = arith.mulf %743, %744 : vector<16x32xf32>
    %746 = vector.broadcast %714 : vector<1x32xf32> to vector<16x32xf32>
    %747 = arith.addf %745, %746 : vector<16x32xf32>
    %748 = arith.truncf %747 : vector<16x32xf32> to vector<16x32xbf16>
    %c0_323 = arith.constant 0 : index
    %c0_324 = arith.constant 0 : index
    %749 = vector.load %arg33[%c0_323, %c0_324] : memref<32x16xbf16, #tpu.memory_space<vmem>>, vector<32x16xbf16>
    %cst_325 = arith.constant dense<0.000000e+00> : vector<16x16xf32>
    %750 = tpu.matmul %748, %749, %cst_325 {dimension_numbers = #tpu.dot_dimension_numbers<[1], [0], [0], [1], [0, 0, 1, 1], [], []>} : vector<16x32xbf16>, vector<32x16xbf16>, vector<16x16xf32> -> vector<16x16xf32>
    %c0_326 = arith.constant 0 : index
    %c0_327 = arith.constant 0 : index
    %751 = vector.load %arg34[%c0_326, %c0_327] : memref<16x16xf32, #tpu.memory_space<vmem>>, vector<16x16xf32>
    tpu.vector_store %arg34[%c0_326, %c0_327], %750 {strides = array<i32>} : memref<16x16xf32, #tpu.memory_space<vmem>>, vector<16x16xf32>,
    return
  }
}

</mosaic_0001>

<bundles_post_ra>
// kernel: transformer.1
= control target key start
LH: loop header
LB: loop body
LE: loop exit
PB: predicated region body
PF: predicated region fallthrough
CT: control target
= control target key end

     0   :  { %s3339_s6 = smov 1   ;;  %s3340_s10 = smov 2   ;;  %s4017_s0 = inlined_call_operand.smem [shape: u32[35], index: -1, kind: input, shape index: {}] }
   0x1   :  { %s3390_s5 = sld [smem:[%s4017_s0]]   ;;  %s3341_s14 = smov 3  }
   0x2   :  { %s3395_s9 = sld [smem:[%s4017_s0 + %s3339_s6]]   ;;  %s3342_s18 = smov 4  }
   0x3   :  { %s3400_s13 = sld [smem:[%s4017_s0 + %s3340_s10]]   ;;  %s3343_s22 = smov 5  }
   0x4   :  { %s3405_s17 = sld [smem:[%s4017_s0 + %s3341_s14]]   ;;  %s3344_s26 = smov 6  }
   0x5   :  { %s3410_s21 = sld [smem:[%s4017_s0 + %s3342_s18]]   ;;  %s3345_s30 = smov 7  }
   0x6   :  { %s3415_s25 = sld [smem:[%s4017_s0 + %s3343_s22]]   ;;  %s3346_s4 = smov 8  }
   0x7   :  { %s3420_s29 = sld [smem:[%s4017_s0 + %s3344_s26]]   ;;  %s3347_s10 = smov 9  }
   0x8   :  { %4035 = sst [smem:[#allocation5_spill]] %s3395_s9  ;;  %s3348_s15 = smov 10  }
   0x9   :  { %s3425_s3 = sld [smem:[%s4017_s0 + %s3345_s30]]   ;;  %s3349_s20 = smov 11  }
   0xa   :  { %4036 = sst [smem:[#allocation6_spill]] %s3405_s17  ;;  %s3350_s26 = smov 12  }
   0xb   :  { %4037 = sst [smem:[#allocation7_spill]] %s3410_s21  ;;  %s3351_s1 = smov 13  }
   0xc   :  { %s3430_s8 = sld [smem:[%s4017_s0 + %s3346_s4]]   ;;  %s3352_s7 = smov 14  }
   0xd   :  { %s3435_s14 = sld [smem:[%s4017_s0 + %s3347_s10]]   ;;  %s3354_s22 = smov 16  }
   0xe   :  { %s3440_s19 = sld [smem:[%s4017_s0 + %s3348_s15]]   ;;  %s3353_s15 = smov 15  }
   0xf   :  { %s3445_s24 = sld [smem:[%s4017_s0 + %s3349_s20]]   ;;  %s3355_s28 = smov 17  }
  0x10   :  { %s3450_s30 = sld [smem:[%s4017_s0 + %s3350_s26]]  }
  0x11   :  { %s3455_s6 = sld [smem:[%s4017_s0 + %s3351_s1]]  }
  0x12   :  { %s3460_s12 = sld [smem:[%s4017_s0 + %s3352_s7]]   ;;  %s3356_s7 = smov 18  }
  0x13   :  { %s3465_s20 = sld [smem:[%s4017_s0 + %s3353_s15]]   ;;  %s3357_s15 = smov 19  }
  0x14   :  { %s3470_s27 = sld [smem:[%s4017_s0 + %s3354_s22]]   ;;  %s3358_s22 = smov 20  }
  0x15   :  { %s3475_s4 = sld [smem:[%s4017_s0 + %s3355_s28]]   ;;  %s3359_s28 = smov 21  }
  0x16   :  { %s3480_s21 = sld [smem:[%s4017_s0 + %s3356_s7]]   ;;  %s3360_s7 = smov 22  }
  0x17   :  { %s3485_s17 = sld [smem:[%s4017_s0 + %s3357_s15]]   ;;  %s3361_s15 = smov 23  }
  0x18   :  { %s3490_s9 = sld [smem:[%s4017_s0 + %s3358_s22]]   ;;  %s3362_s22 = smov 24  }
  0x1b   :  { %4038 = sst [smem:[#allocation8_spill]] %s3475_s4 }
  0x1c   :  { %4039 = sst [smem:[#allocation9_spill]] %s3480_s21 }
  0x1d   :  { %4040 = sst [smem:[#allocation10_spill]] %s3485_s17 }
  0x1e   :  { %4041 = sst [smem:[#allocation11_spill]] %s3490_s9 }
  0x1f   :  { %s3495_s4 = sld [smem:[%s4017_s0 + %s3359_s28]]   ;;  %s3363_s28 = smov 25  }
  0x20   :  { %s3500_s21 = sld [smem:[%s4017_s0 + %s3360_s7]]   ;;  %s3364_s7 = smov 26  }
  0x21   :  { %s3505_s17 = sld [smem:[%s4017_s0 + %s3361_s15]]   ;;  %s3365_s15 = smov 27  }
  0x22   :  { %s3510_s9 = sld [smem:[%s4017_s0 + %s3362_s22]]   ;;  %s3366_s22 = smov 28  }
  0x25   :  { %4042 = sst [smem:[#allocation12_spill]] %s3495_s4 }
  0x26   :  { %4043 = sst [smem:[#allocation13_spill]] %s3500_s21 }
  0x27   :  { %4044 = sst [smem:[#allocation14_spill]] %s3505_s17 }
  0x28   :  { %4045 = sst [smem:[#allocation15_spill]] %s3510_s9 }
  0x29   :  { %s3515_s4 = sld [smem:[%s4017_s0 + %s3363_s28]]   ;;  %s3367_s28 = smov 29  }
  0x2a   :  { %s3520_s21 = sld [smem:[%s4017_s0 + %s3364_s7]]   ;;  %s3368_s7 = smov 30  }
  0x2b   :  { %s3525_s17 = sld [smem:[%s4017_s0 + %s3365_s15]]   ;;  %s3369_s15 = smov 31  }
  0x2c   :  { %s3530_s9 = sld [smem:[%s4017_s0 + %s3366_s22]]   ;;  %s3370_s22 = smov 32  }
  0x2f   :  { %4046 = sst [smem:[#allocation16_spill]] %s3515_s4 }
  0x30   :  { %4047 = sst [smem:[#allocation17_spill]] %s3520_s21 }
  0x31   :  { %4048 = sst [smem:[#allocation18_spill]] %s3525_s17 }
  0x32   :  { %4049 = sst [smem:[#allocation19_spill]] %s3530_s9 }
  0x33   :  { %s3535_s4 = sld [smem:[%s4017_s0 + %s3367_s28]]   ;;  %s3371_s28 = smov 33  }
  0x34   :  { %s3540_s21 = sld [smem:[%s4017_s0 + %s3368_s7]]   ;;  %s3372_s7 = smov 34  }
  0x35   :  { %s3545_s17 = sld [smem:[%s4017_s0 + %s3369_s15]]  }
  0x36   :  { %s3550_s9 = sld [smem:[%s4017_s0 + %s3370_s22]]  }
  0x39   :  { %4050 = sst [smem:[#allocation20_spill]] %s3535_s4 }
  0x3a   :  { %4051 = sst [smem:[#allocation21_spill]] %s3540_s21 }
  0x3b   :  { %s3555_s4 = sld [smem:[%s4017_s0 + %s3371_s28]]  }
  0x3c   :  { %s3560_s21 = sld [smem:[%s4017_s0 + %s3372_s7]]  }
  0x3d   :  { %v3043_v0 = vld [vmem:[%s3415_s25 + $0x8] sm:$0xff]  ;;  %v3042_v1 = vld [vmem:[%s3415_s25] sm:$0xff]  ;;  %vm171_vm0 = vcmask 261120  }
  0x3e   :  { %v3565_v2 = vld [vmem:[%s3390_s5] sm:$0xff]  ;;  %v3568_v3 = vld [vmem:[%s3390_s5 + $0x8] sm:$0xff]  ;;  %181 = vmatpush.bf16.msra.mxu0 %v3043_v0 }
  0x3f   :  { %v154_v4 = vpack.c.bf16 %v3568_v3, %v3565_v2 }
  0x42   :  { %182 = vmatpush.bf16.msra.mxu0 %v3042_v1 }
  0x45   :  { %2712 = vmatmul.msk.bf16.vlgmr.msra.gmra.mxu0 %vm171_vm0, %v154_v4 }
  0x46   :  { %74 = vsyncpa [#allocation3], 0  ;;  %s3373_s0 = smov 112   ;;  %s3374_s15 = smov 96   ;;  %vm200_vm1 = vcmask 130048   ;;  %v3581_v14 = vld [vmem:[%s3400_s13] sm:$0xff] }
  0x47   :  { %s3375_s5 = smov 80   ;;  %v3588_v24 = vld [vmem:[%s3400_s13 + $0x8] sm:$0xff]  ;;  %s3376_s16 = smov 48   ;;  %vm534_vm9 = vcmask 523264  }
  0x48   :  { %s3377_s13 = smov 64   ;;  %s4063_s18 = sld [smem:[#allocation18_spill]] }
  0x49   :  { %s4064_s22 = sld [smem:[#allocation16_spill]]  ;;  %s3329_s7 = scalar_lea.hbm %s3560_s21, 16 }
  0x4a   :  { %s4065_s23 = sld [smem:[#allocation17_spill]] }
  0x4b   :  { %s4066_s26 = sld [smem:[#allocation20_spill]] }
  0x4c   :  { %s4067_s28 = sld [smem:[#allocation19_spill]] }
  0x4d   :  { %s4068_s1 = sld [smem:[#allocation21_spill]] }
  0xc2   :  { %v184_v5 = vpop.f32.mrf.mxu0 }
  0xca   :  { %v186_v6 = vpop.f32.mrf.mxu0 }
  0xcb   :  { %v196_v7 = vpack.c.bf16 %v186_v6, %v184_v5  ;;  %v3044_v5 = vld [vmem:[%s3420_s29] sm:$0xff] }
  0xcd   :  { %269 = vrot.lane.b32.xlu1 %v196_v7, %s3373_s0  ;;  %198 = vrot.lane.b32.xlu0 %v196_v7, %s3374_s15 }
  0xd5   :  { %271 = vrot.lane.b32.xlu0 %v196_v7, %s3375_s5 }
 0x13f   :  { %v199_v8 = vpop.permute.xlu0 %198  ;;  %v270_v12 = vpop.permute.xlu1 %269 }
 0x140   :  { %v205_v9 = vsel %vm200_vm1, %v199_v8, 0 }
 0x141   :  { %214 = vmatpush.bf16.xpose.msra.mxu1 %v205_v9  ;;  %v3045_v9 = vld [vmem:[%s3420_s29 + $0x8] sm:$0xff] }
 0x142   :  { %357 = vmatpush.bf16.msrb.mxu0 %v3045_v9 }
 0x147   :  { %v272_v10 = vpop.permute.xlu0 %271 }
 0x148   :  { %2713 = vmatmul.msk.bf16.vlgmr.msra.gmra.mxu1 %vm200_vm1, %v196_v7  ;;  %v277_v11 = vsel %vm200_vm1, %v272_v10, 0 }
 0x149   :  { %286 = vmatpush.bf16.xpose.msra.mxu3 %v277_v11  ;;  %380 = vmatpush.bf16.msrb.mxu1 %v3044_v5 }
 0x150   :  { %2715 = vmatmul.msk.bf16.vlgmr.msra.gmra.mxu3 %vm200_vm1, %v270_v12 }
 0x1c5   :  { %v216_v13 = vpop.f32.mrf.mxu1 }
 0x1c6   :  { %v221_v15 = vmul.f32 0.25, %v216_v13 }
 0x1c8   :  { %v223_v16 = vadd.f32 %v221_v15, %v3581_v14  ;;  %v3139_v15 = vld [vmem:[%s3425_s3] ss:$0 sm:$0xff] }
 0x1ca   :  { %v225_v17 = vsel %vm200_vm1, %v223_v16, -inf }
 0x1cb   :  { %226 = vmax.xlane.f32.xlu1 %v225_v17 }
 0x1cd   :  { %v218_v20 = vpop.f32.mrf.mxu1 }
 0x1ce   :  { %v222_v22 = vmul.f32 0.25, %v218_v20 }
 0x1d0   :  { %v224_v27 = vadd.f32 %v222_v22, %v3588_v24 }
 0x1d2   :  { %v228_v29 = vsel %vm200_vm1, %v224_v27, -inf }
 0x1d3   :  { %v288_v18 = vpop.f32.mrf.mxu3 }
 0x1d4   :  { %v293_v19 = vmul.f32 0.25, %v288_v18 }
 0x1d6   :  { %v295_v21 = vadd.f32 %v293_v19, %v3581_v14 }
 0x1d8   :  { %v297_v23 = vsel %vm200_vm1, %v295_v21, -inf }
 0x1d9   :  { %298 = vmax.xlane.f32.xlu2 %v297_v23 }
 0x1db   :  { %v290_v25 = vpop.f32.mrf.mxu3 }
 0x1dc   :  { %v294_v26 = vmul.f32 0.25, %v290_v25 }
 0x1de   :  { %v296_v28 = vadd.f32 %v294_v26, %v3588_v24 }
 0x1e0   :  { %v300_v30 = vsel %vm200_vm1, %v296_v28, -inf }
 0x1e1   :  { %229 = vmax.xlane.f32.xlu2 %v228_v29  ;;  %301 = vmax.xlane.f32.xlu0 %v300_v30 }
 0x1f5   :  { %320 = vrot.lane.b32.xlu0 %v196_v7, %s3376_s16 }
 0x23e   :  { %v227_v31 = vpop.xlane.xlu1 %226 }
 0x23f   :  { %v231_v32 = vsub.f32 %v223_v16, %v227_v31 }
 0x241   :  { %v233_v33 = vmul.f32 1.442695, %v231_v32 }
 0x243   :  { %3173 = vpow2.f32 %v233_v33 }
 0x249   :  { %v3174_v34 = vpop.eup %3173 }
 0x24a   :  { %v237_v35 = vsel %vm200_vm1, %v3174_v34, 0.0 }
 0x24b   :  { %238 = vadd.xlane.f32.xlu2 %v237_v35 }
 0x24c   :  { %v299_v36 = vpop.xlane.xlu2 %298 }
 0x24d   :  { %v303_v37 = vsub.f32 %v295_v21, %v299_v36 }
 0x24f   :  { %v305_v38 = vmul.f32 1.442695, %v303_v37 }
 0x251   :  { %3175 = vpow2.f32 %v305_v38 }
 0x254   :  { %v230_v39 = vpop.xlane.xlu2 %229  ;;  %v302_v46 = vpop.xlane.xlu0 %301 }
 0x255   :  { %v232_v40 = vsub.f32 %v224_v27, %v230_v39  ;;  %v304_v47 = vsub.f32 %v296_v28, %v302_v46  ;;  %v3378_v28 = vmov 32.0   ;;  %v3046_v46 = vld [vmem:[%s3440_s19] sm:$0xff] }
 0x257   :  { %v3176_v41 = vpop.eup %3175  ;;  %v235_v42 = vmul.f32 1.442695, %v232_v40  ;;  %v307_v48 = vmul.f32 1.442695, %v304_v47 }
 0x258   :  { %v309_v43 = vsel %vm200_vm1, %v3176_v41, 0.0 }
 0x259   :  { %3177 = vpow2.f32 %v235_v42  ;;  %310 = vadd.xlane.f32.xlu1 %v309_v43  ;;  %v3047_v43 = vld [vmem:[%s3440_s19 + $0x8] sm:$0xff] }
 0x25a   :  { %3179 = vpow2.f32 %v307_v48  ;;  %496 = vmatpush.bf16.msrb.mxu3 %v3047_v43 }
 0x25e   :  { %497 = vmatpush.bf16.msrb.mxu3 %v3046_v46 }
 0x25f   :  { %v3178_v44 = vpop.eup %3177 }
 0x260   :  { %v240_v45 = vsel %vm200_vm1, %v3178_v44, 0.0  ;;  %v3180_v49 = vpop.eup %3179 }
 0x261   :  { %241 = vadd.xlane.f32.xlu2 %v240_v45  ;;  %v312_v50 = vsel %vm200_vm1, %v3180_v49, 0.0 }
 0x267   :  { %v321_v58 = vpop.permute.xlu0 %320 }
 0x279   :  { %248 = vrot.lane.b32.xlu2 %v196_v7, %s3377_s13 }
 0x2a2   :  { %313 = vadd.xlane.f32.xlu2 %v312_v50 }
 0x2be   :  { %v239_v51 = vpop.xlane.xlu2 %238 }
 0x2bf   :  { %3181 = vrcp.f32 %v239_v51 }
 0x2c5   :  { %v3182_v53 = vpop.eup %3181 }
 0x2c6   :  { %v245_v56 = vmul.f32 %v3182_v53, %v3174_v34 }
 0x2cc   :  { %v311_v60 = vpop.xlane.xlu1 %310 }
 0x2d4   :  { %v242_v52 = vpop.xlane.xlu2 %241 }
 0x2d5   :  { %3183 = vrcp.f32 %v242_v52 }
 0x2d6   :  { %3185 = vrcp.f32 %v311_v60 }
 0x2db   :  { %v3184_v54 = vpop.eup %3183 }
 0x2dc   :  { %v249_v55 = vpop.permute.xlu2 %248  ;;  %v246_v57 = vmul.f32 %v3184_v54, %v3178_v44  ;;  %v3186_v62 = vpop.eup %3185 }
 0x2dd   :  { %261 = vmatpush.bf16.msra.mxu2 %v249_v55  ;;  %v317_v0 = vmul.f32 %v3186_v62, %v3176_v41 }
 0x2de   :  { %v247_v59 = vpack.c.bf16 %v246_v57, %v245_v56 }
 0x2e0   :  { %2714 = vmatmul.msk.bf16.vlgmr.msra.gmra.mxu2 %vm200_vm1, %v247_v59 }
 0x2e1   :  { %333 = vmatpush.bf16.msrb.mxu2 %v321_v58 }
 0x315   :  { %v314_v61 = vpop.xlane.xlu2 %313 }
 0x316   :  { %3187 = vrcp.f32 %v314_v61 }
 0x317   :  { %3189 = vrcp.f32 %v3378_v28 }
 0x31c   :  { %v3188_v63 = vpop.eup %3187 }
 0x31d   :  { %v318_v1 = vmul.f32 %v3188_v63, %v3180_v49  ;;  %v3190_v29 = vpop.eup %3189 }
 0x31e   :  { %v401_v30 = vmul.f32 32.0, %v3190_v29  ;;  %vm405_vm2 = vweird.f32 %v3190_v29 }
 0x31f   :  { %v319_v4 = vpack.c.bf16 %v318_v1, %v317_v0  ;;  %v3140_v0 = vld [vmem:[%s3430_s8] ss:$0 sm:$0xff] }
 0x320   :  { %v402_v31 = vsub.f32 1.0, %v401_v30 }
 0x321   :  { %2716 = vmatmul.msk.bf16.vlgmr.msrb.gmra.mxu2 %vm200_vm1, %v319_v4 }
 0x322   :  { %v403_v32 = vmul.f32 %v3190_v29, %v402_v31 }
 0x363   :  { %v263_v6 = vpop.f32.mrf.mxu2 }
 0x36b   :  { %v265_v7 = vpop.f32.mrf.mxu2 }
 0x36c   :  { %v268_v8 = vpack.c.bf16 %v265_v7, %v263_v6  ;;  %v3141_v7 = vld [vmem:[%s3435_s14] ss:$0 sm:$0xff] }
 0x36e   :  { %2726 = vmatmul.msk.bf16.vlgmr.msrb.gmra.mxu1 %vm200_vm1, %v268_v8 }
 0x3a4   :  { %v335_v10 = vpop.f32.mrf.mxu2 }
 0x3ac   :  { %v337_v11 = vpop.f32.mrf.mxu2 }
 0x3ad   :  { %v340_v12 = vpack.c.bf16 %v337_v11, %v335_v10 }
 0x3af   :  { %2721 = vmatmul.msk.bf16.vlgmr.msrb.gmra.mxu0 %vm200_vm1, %v340_v12  ;;  %v3051_v12 = vld [vmem:[%s3450_s30 + $0x18] sm:$0xff] }
 0x3b0   :  { %542 = vmatpush.bf16.msra.mxu2 %v3051_v12 }
 0x3eb   :  { %v382_v13 = vpop.f32.mrf.mxu1 }
 0x3f3   :  { %v384_v21 = vpop.f32.mrf.mxu1 }
 0x42c   :  { %v359_v16 = vpop.f32.mrf.mxu0 }
 0x42d   :  { %v383_v17 = vadd.f32 %v382_v13, %v359_v16  ;;  %v3050_v13 = vld [vmem:[%s3450_s30 + $0x10] sm:$0xff]  ;;  %v3048_v16 = vld [vmem:[%s3450_s30] sm:$0xff] }
 0x42e   :  { %543 = vmatpush.bf16.msra.mxu2 %v3050_v13 }
 0x42f   :  { %v390_v18 = vadd.f32 %v3139_v15, %v383_v17 }
 0x431   :  { %v392_v19 = vadd.f32 %v390_v18, %v3565_v2  ;;  %v404_v2 = vadd.f32 %v3190_v29, %v403_v32  ;;  %v3142_v18 = vld [vmem:[%s3445_s24] ss:$0 sm:$0xff] }
 0x433   :  { %v394_v20 = vsel %vm171_vm0, %v392_v19, 0.0  ;;  %v3611_v33 = vsel %vm405_vm2, %v3190_v29, %v404_v2 }
 0x434   :  { %395 = vadd.xlane.f32.xlu1 %v394_v20  ;;  %v361_v22 = vpop.f32.mrf.mxu0 }
 0x435   :  { %v385_v23 = vadd.f32 %v384_v21, %v361_v22 }
 0x437   :  { %v391_v25 = vadd.f32 %v3139_v15, %v385_v23  ;;  %v3049_v15 = vld [vmem:[%s3450_s30 + $0x8] sm:$0xff] }
 0x438   :  { %544 = vmatpush.bf16.msra.mxu2 %v3049_v15 }
 0x439   :  { %v393_v26 = vadd.f32 %v391_v25, %v3568_v3 }
 0x43b   :  { %v397_v27 = vsel %vm171_vm0, %v393_v26, 0.0 }
 0x43c   :  { %398 = vadd.xlane.f32.xlu1 %v397_v27  ;;  %545 = vmatpush.bf16.msra.mxu2 %v3048_v16 }
 0x4a7   :  { %v396_v34 = vpop.xlane.xlu1 %395 }
 0x4a8   :  { %v407_v35 = vmul.f32 %v3611_v33, %v396_v34 }
 0x4aa   :  { %v409_v36 = vsub.f32 %v392_v19, %v407_v35 }
 0x4ac   :  { %v411_v3 = vmul.f32 %v409_v36, %v409_v36 }
 0x4ae   :  { %v413_v37 = vsel %vm171_vm0, %v411_v3, 0.0 }
 0x4af   :  { %414 = vadd.xlane.f32.xlu1 %v413_v37  ;;  %v399_v38 = vpop.xlane.xlu1 %398 }
 0x4b0   :  { %v408_v39 = vmul.f32 %v3611_v33, %v399_v38 }
 0x4b2   :  { %v410_v40 = vsub.f32 %v393_v26, %v408_v39  ;;  %v3143_v26 = vld [vmem:[%s3455_s6] ss:$0 sm:$0xff] }
 0x4b4   :  { %v412_v41 = vmul.f32 %v410_v40, %v410_v40 }
 0x4b6   :  { %v416_v42 = vsel %vm171_vm0, %v412_v41, 0.0 }
 0x4b7   :  { %417 = vadd.xlane.f32.xlu0 %v416_v42 }
 0x522   :  { %v415_v44 = vpop.xlane.xlu1 %414 }
 0x523   :  { %v419_v45 = vmul.f32 %v415_v44, %v3611_v33  ;;  %v3053_v44 = vld [vmem:[%s3415_s25 + $0x18] sm:$0xff] }
 0x524   :  { %635 = vmatpush.bf16.msra.mxu0 %v3053_v44 }
 0x525   :  { %v421_v47 = vadd.f32 1e-05, %v419_v45 }
 0x527   :  { %3191 = vrsqrt.f32 %v421_v47  ;;  %vm429_vm4 = vweird.f32 %v421_v47 }
 0x52a   :  { %v418_v48 = vpop.xlane.xlu0 %417 }
 0x52b   :  { %v420_v49 = vmul.f32 %v418_v48, %v3611_v33  ;;  %v3052_v48 = vld [vmem:[%s3415_s25 + $0x10] sm:$0xff]  ;;  %s4052_s25 = sld [smem:[#allocation5_spill]] }
 0x52c   :  { %636 = vmatpush.bf16.msra.mxu0 %v3052_v48 }
 0x52d   :  { %v3192_v50 = vpop.eup %3191  ;;  %v422_v51 = vadd.f32 1e-05, %v420_v49 }
 0x52e   :  { %v424_v52 = vmul.f32 %v3192_v50, %v421_v47  ;;  %vm430_vm3 = vweird.f32 %v3192_v50 }
 0x52f   :  { %3193 = vrsqrt.f32 %v422_v51  ;;  %vm431_vm5 = vmor %vm429_vm4, %vm430_vm3  ;;  %vm439_vm7 = vweird.f32 %v422_v51 }
 0x530   :  { %v425_v53 = vmul.f32 %v3192_v50, %v424_v52 }
 0x532   :  { %v426_v54 = vmul.f32 0.5, %v425_v53 }
 0x534   :  { %v427_v55 = vsub.f32 1.5, %v426_v54 }
 0x535   :  { %v3194_v56 = vpop.eup %3193 }
 0x536   :  { %v428_v57 = vmul.f32 %v3192_v50, %v427_v55  ;;  %v434_v58 = vmul.f32 %v3194_v56, %v422_v51  ;;  %vm440_vm6 = vweird.f32 %v3194_v56 }
 0x537   :  { %vm441_vm8 = vmor %vm439_vm7, %vm440_vm6 }
 0x538   :  { %v435_v59 = vmul.f32 %v3194_v56, %v434_v58  ;;  %v432_v60 = vsel %vm431_vm5, %v3192_v50, %v428_v57 }
 0x539   :  { %v443_v63 = vmul.f32 %v432_v60, %v409_v36 }
 0x53a   :  { %v436_v61 = vmul.f32 0.5, %v435_v59 }
 0x53b   :  { %v448_v6 = vmul.f32 %v3140_v0, %v443_v63 }
 0x53c   :  { %v437_v62 = vsub.f32 1.5, %v436_v61 }
 0x53d   :  { %v453_v9 = vadd.f32 %v3141_v7, %v448_v6  ;;  %v3145_v6 = vld [vmem:[%s3465_s20] ss:$0 sm:$0xff] }
 0x53e   :  { %v438_v1 = vmul.f32 %v3194_v56, %v437_v62 }
 0x540   :  { %v442_v4 = vsel %vm441_vm8, %v3194_v56, %v438_v1 }
 0x541   :  { %v444_v5 = vmul.f32 %v442_v4, %v410_v40 }
 0x543   :  { %v449_v8 = vmul.f32 %v3140_v0, %v444_v5  ;;  %v3144_v0 = vld [vmem:[%s3460_s12] ss:$0 sm:$0xff] }
 0x545   :  { %v454_v10 = vadd.f32 %v3141_v7, %v449_v8 }
 0x547   :  { %v471_v11 = vpack.c.bf16 %v454_v10, %v453_v9 }
 0x549   :  { %2735 = vmatmul.msk.bf16.vlgmr.msrb.gmra.mxu3 %vm171_vm0, %v471_v11 }
 0x5cc   :  { %v499_v17 = vpop.f32.mrf.mxu3 }
 0x5cd   :  { %v500_v19 = vadd.f32 %v3142_v18, %v499_v17 }
 0x5cf   :  { %v504_v22 = vmax.f32 %v500_v19, 0.0 }
 0x5d4   :  { %v501_v20 = vpop.f32.mrf.mxu3 }
 0x5d5   :  { %v502_v21 = vadd.f32 %v3142_v18, %v501_v20 }
 0x5d7   :  { %v505_v23 = vmax.f32 %v502_v21, 0.0 }
 0x5d9   :  { %v506_v25 = vpack.c.bf16 %v505_v23, %v504_v22 }
 0x5db   :  { %2752 = vmatmul.msk.bf16.vlgmr.msra.gmra.mxu2 %vm534_vm9, %v506_v25 }
 0x65e   :  { %v547_v27 = vpop.f32.mrf.mxu2 }
 0x65f   :  { %v548_v28 = vadd.f32 %v3143_v26, %v547_v27 }
 0x661   :  { %v552_v29 = vadd.f32 %v548_v28, %v453_v9 }
 0x663   :  { %v554_v30 = vsel %vm171_vm0, %v552_v29, 0.0 }
 0x664   :  { %555 = vadd.xlane.f32.xlu1 %v554_v30 }
 0x666   :  { %v549_v31 = vpop.f32.mrf.mxu2 }
 0x667   :  { %v550_v32 = vadd.f32 %v3143_v26, %v549_v31 }
 0x669   :  { %v553_v2 = vadd.f32 %v550_v32, %v454_v10 }
 0x66b   :  { %v557_v34 = vsel %vm171_vm0, %v553_v2, 0.0 }
 0x66c   :  { %558 = vadd.xlane.f32.xlu1 %v557_v34 }
 0x6d7   :  { %v556_v35 = vpop.xlane.xlu1 %555 }
 0x6d8   :  { %v560_v36 = vmul.f32 %v556_v35, %v3611_v33 }
 0x6da   :  { %v562_v3 = vsub.f32 %v552_v29, %v560_v36 }
 0x6dc   :  { %v564_v37 = vmul.f32 %v562_v3, %v562_v3 }
 0x6de   :  { %v566_v38 = vsel %vm171_vm0, %v564_v37, 0.0 }
 0x6df   :  { %567 = vadd.xlane.f32.xlu2 %v566_v38  ;;  %v559_v39 = vpop.xlane.xlu1 %558 }
 0x6e0   :  { %v561_v40 = vmul.f32 %v559_v39, %v3611_v33 }
 0x6e2   :  { %v563_v41 = vsub.f32 %v553_v2, %v561_v40 }
 0x6e4   :  { %v565_v42 = vmul.f32 %v563_v41, %v563_v41 }
 0x6e6   :  { %v569_v43 = vsel %vm171_vm0, %v565_v42, 0.0 }
 0x6e7   :  { %570 = vadd.xlane.f32.xlu1 %v569_v43 }
 0x752   :  { %v568_v45 = vpop.xlane.xlu2 %567 }
 0x753   :  { %v572_v46 = vmul.f32 %v568_v45, %v3611_v33 }
 0x755   :  { %v574_v47 = vadd.f32 1e-05, %v572_v46 }
 0x757   :  { %3195 = vrsqrt.f32 %v574_v47  ;;  %vm582_vm11 = vweird.f32 %v574_v47 }
 0x75a   :  { %v571_v49 = vpop.xlane.xlu1 %570 }
 0x75b   :  { %v573_v50 = vmul.f32 %v571_v49, %v3611_v33 }
 0x75d   :  { %v3196_v51 = vpop.eup %3195  ;;  %v575_v52 = vadd.f32 1e-05, %v573_v50 }
 0x75e   :  { %v577_v53 = vmul.f32 %v3196_v51, %v574_v47  ;;  %vm583_vm10 = vweird.f32 %v3196_v51 }
 0x75f   :  { %3197 = vrsqrt.f32 %v575_v52  ;;  %vm584_vm12 = vmor %vm582_vm11, %vm583_vm10  ;;  %vm592_vm14 = vweird.f32 %v575_v52 }
 0x760   :  { %v578_v54 = vmul.f32 %v3196_v51, %v577_v53 }
 0x762   :  { %v579_v55 = vmul.f32 0.5, %v578_v54 }
 0x764   :  { %v580_v56 = vsub.f32 1.5, %v579_v55 }
 0x765   :  { %v3198_v57 = vpop.eup %3197 }
 0x766   :  { %v581_v58 = vmul.f32 %v3196_v51, %v580_v56  ;;  %v587_v59 = vmul.f32 %v3198_v57, %v575_v52  ;;  %vm593_vm13 = vweird.f32 %v3198_v57 }
 0x767   :  { %vm594_vm15 = vmor %vm592_vm14, %vm593_vm13 }
 0x768   :  { %v588_v60 = vmul.f32 %v3198_v57, %v587_v59  ;;  %v585_v61 = vsel %vm584_vm12, %v3196_v51, %v581_v58 }
 0x769   :  { %v596_v1 = vmul.f32 %v585_v61, %v562_v3 }
 0x76a   :  { %v589_v62 = vmul.f32 0.5, %v588_v60 }
 0x76b   :  { %v601_v7 = vmul.f32 %v3144_v0, %v596_v1 }
 0x76c   :  { %v590_v63 = vsub.f32 1.5, %v589_v62 }
 0x76d   :  { %v3643_v10 = vadd.f32 %v3145_v6, %v601_v7 }
 0x76e   :  { %v591_v4 = vmul.f32 %v3198_v57, %v590_v63 }
 0x770   :  { %v595_v5 = vsel %vm594_vm15, %v3198_v57, %v591_v4 }
 0x771   :  { %v597_v8 = vmul.f32 %v595_v5, %v563_v41 }
 0x773   :  { %v602_v9 = vmul.f32 %v3144_v0, %v597_v8 }
 0x775   :  { %v3645_v11 = vadd.f32 %v3145_v6, %v602_v9 }
 0x777   :  { %v608_v12 = vpack.c.bf16 %v3645_v11, %v3643_v10 }
 0x779   :  { %2765 = vmatmul.msk.bf16.vlgmr.msra.gmra.mxu0 %vm171_vm0, %v608_v12  ;;  %v3054_v12 = vld [vmem:[%s3420_s29 + $0x10] sm:$0xff] }
 0x7f6   :  { %v638_v13 = vpop.f32.mrf.mxu0 }
 0x7fe   :  { %v640_v15 = vpop.f32.mrf.mxu0 }
 0x7ff   :  { %v654_v16 = vpack.c.bf16 %v640_v15, %v638_v13  ;;  %v3055_v13 = vld [vmem:[%s3420_s29 + $0x18] sm:$0xff]  ;;  %v3063_v15 = vld [vmem:[%s3470_s27 + $0x8] sm:$0xff]  ;;  %s4053_s29 = sld [smem:[#allocation6_spill]] }
 0x801   :  { %726 = vrot.lane.b32.xlu0 %v654_v16, %s3373_s0  ;;  %728 = vrot.lane.b32.xlu1 %v654_v16, %s3375_s5 }
 0x802   :  { %656 = vrot.lane.b32.xlu2 %v654_v16, %s3374_s15 }
 0x85c   :  { %v657_v17 = vpop.permute.xlu2 %656 }
 0x85d   :  { %v662_v18 = vsel %vm200_vm1, %v657_v17, 0 }
 0x85e   :  { %671 = vmatpush.bf16.xpose.msra.mxu1 %v662_v18 }
 0x865   :  { %2773 = vmatmul.msk.bf16.vlgmr.msra.gmra.mxu1 %vm200_vm1, %v654_v16 }
 0x866   :  { %814 = vmatpush.bf16.msrb.mxu1 %v3055_v13  ;;  %v3147_v13 = vld [vmem:[%s3430_s8 + $0x1] ss:$0 sm:$0xff]  ;;  %s4055_s8 = sld [smem:[#allocation9_spill]] }
 0x86a   :  { %1090 = vmatpush.bf16.msra.mxu1 %v3063_v15 }
 0x873   :  { %v729_v19 = vpop.permute.xlu1 %728  ;;  %v727_v21 = vpop.permute.xlu0 %726 }
 0x874   :  { %v734_v20 = vsel %vm200_vm1, %v729_v19, 0 }
 0x875   :  { %743 = vmatpush.bf16.xpose.msrb.mxu2 %v734_v20 }
 0x87c   :  { %2775 = vmatmul.msk.bf16.vlgmr.msrb.gmra.mxu2 %vm200_vm1, %v727_v21 }
 0x8e2   :  { %v673_v22 = vpop.f32.mrf.mxu1 }
 0x8e3   :  { %v678_v23 = vmul.f32 0.25, %v673_v22 }
 0x8e5   :  { %v680_v25 = vadd.f32 %v678_v23, %v3581_v14  ;;  %v3680_v23 = vld [vmem:[%s4052_s25] sm:$0xff] }
 0x8e7   :  { %v682_v26 = vsel %vm200_vm1, %v680_v25, -inf }
 0x8e8   :  { %683 = vmax.xlane.f32.xlu2 %v682_v26 }
 0x8ea   :  { %v675_v27 = vpop.f32.mrf.mxu1 }
 0x8eb   :  { %v679_v28 = vmul.f32 0.25, %v675_v27 }
 0x8ed   :  { %v681_v29 = vadd.f32 %v679_v28, %v3588_v24  ;;  %v3146_v28 = vld [vmem:[%s3425_s3 + $0x1] ss:$0 sm:$0xff]  ;;  %s4054_s3 = sld [smem:[#allocation8_spill]] }
 0x8ef   :  { %v685_v30 = vsel %vm200_vm1, %v681_v29, -inf }
 0x8f0   :  { %686 = vmax.xlane.f32.xlu1 %v685_v30 }
 0x8ff   :  { %v745_v31 = vpop.f32.mrf.mxu2 }
 0x900   :  { %v750_v32 = vmul.f32 0.25, %v745_v31 }
 0x902   :  { %v752_v2 = vadd.f32 %v750_v32, %v3581_v14 }
 0x904   :  { %v754_v34 = vsel %vm200_vm1, %v752_v2, -inf }
 0x905   :  { %755 = vmax.xlane.f32.xlu0 %v754_v34 }
 0x907   :  { %v747_v35 = vpop.f32.mrf.mxu2 }
 0x908   :  { %v751_v36 = vmul.f32 0.25, %v747_v35 }
 0x90a   :  { %v753_v3 = vadd.f32 %v751_v36, %v3588_v24 }
 0x90c   :  { %v757_v37 = vsel %vm200_vm1, %v753_v3, -inf }
 0x90d   :  { %758 = vmax.xlane.f32.xlu2 %v757_v37 }
 0x95b   :  { %v684_v38 = vpop.xlane.xlu2 %683 }
 0x95c   :  { %v688_v39 = vsub.f32 %v680_v25, %v684_v38  ;;  %v3683_v25 = vld [vmem:[%s4052_s25 + $0x8] sm:$0xff] }
 0x95d   :  { %v1064_v26 = vpack.c.bf16 %v3683_v25, %v3680_v23 }
 0x95e   :  { %v690_v40 = vmul.f32 1.442695, %v688_v39 }
 0x960   :  { %3199 = vpow2.f32 %v690_v40 }
 0x963   :  { %v687_v41 = vpop.xlane.xlu1 %686 }
 0x964   :  { %v689_v42 = vsub.f32 %v681_v29, %v687_v41 }
 0x966   :  { %v3200_v43 = vpop.eup %3199  ;;  %v692_v44 = vmul.f32 1.442695, %v689_v42 }
 0x967   :  { %v694_v14 = vsel %vm200_vm1, %v3200_v43, 0.0 }
 0x968   :  { %3201 = vpow2.f32 %v692_v44  ;;  %695 = vadd.xlane.f32.xlu1 %v694_v14 }
 0x96e   :  { %v3202_v45 = vpop.eup %3201 }
 0x96f   :  { %v697_v46 = vsel %vm200_vm1, %v3202_v45, 0.0 }
 0x970   :  { %698 = vadd.xlane.f32.xlu2 %v697_v46 }
 0x978   :  { %v756_v24 = vpop.xlane.xlu0 %755 }
 0x979   :  { %v760_v47 = vsub.f32 %v752_v2, %v756_v24 }
 0x97b   :  { %v762_v48 = vmul.f32 1.442695, %v760_v47 }
 0x97d   :  { %3203 = vpow2.f32 %v762_v48 }
 0x980   :  { %v759_v49 = vpop.xlane.xlu2 %758 }
 0x981   :  { %v761_v50 = vsub.f32 %v753_v3, %v759_v49  ;;  %705 = vrot.lane.b32.xlu1 %v654_v16, %s3377_s13 }
 0x983   :  { %v3204_v51 = vpop.eup %3203  ;;  %v764_v52 = vmul.f32 1.442695, %v761_v50  ;;  %v3057_v50 = vld [vmem:[%s3440_s19 + $0x18] sm:$0xff] }
 0x984   :  { %v766_v53 = vsel %vm200_vm1, %v3204_v51, 0.0  ;;  %952 = vmatpush.bf16.msra.mxu2 %v3057_v50 }
 0x985   :  { %3205 = vpow2.f32 %v764_v52  ;;  %767 = vadd.xlane.f32.xlu0 %v766_v53 }
 0x98b   :  { %v3206_v54 = vpop.eup %3205 }
 0x98c   :  { %v769_v55 = vsel %vm200_vm1, %v3206_v54, 0.0 }
 0x98d   :  { %770 = vadd.xlane.f32.xlu2 %v769_v55 }
 0x999   :  { %777 = vrot.lane.b32.xlu0 %v654_v16, %s3376_s16  ;;  %v3062_v16 = vld [vmem:[%s3470_s27] sm:$0xff] }
 0x99a   :  { %1091 = vmatpush.bf16.msra.mxu1 %v3062_v16 }
 0x9db   :  { %v696_v57 = vpop.xlane.xlu1 %695 }
 0x9e3   :  { %v699_v56 = vpop.xlane.xlu2 %698 }
 0x9e4   :  { %3207 = vrcp.f32 %v699_v56 }
 0x9e5   :  { %3209 = vrcp.f32 %v696_v57 }
 0x9ea   :  { %v3208_v58 = vpop.eup %3207 }
 0x9eb   :  { %v3210_v59 = vpop.eup %3209  ;;  %v703_v60 = vmul.f32 %v3208_v58, %v3202_v45 }
 0x9ec   :  { %v702_v61 = vmul.f32 %v3210_v59, %v3200_v43 }
 0x9ee   :  { %v704_v63 = vpack.c.bf16 %v703_v60, %v702_v61  ;;  %v3061_v61 = vld [vmem:[%s3450_s30 + $0x38] sm:$0xff] }
 0x9f3   :  { %v706_v62 = vpop.permute.xlu1 %705 }
 0x9f4   :  { %718 = vmatpush.bf16.msra.mxu3 %v706_v62 }
 0x9f7   :  { %2774 = vmatmul.msk.bf16.vlgmr.msra.gmra.mxu3 %vm200_vm1, %v704_v63  ;;  %v3060_v63 = vld [vmem:[%s3450_s30 + $0x30] sm:$0xff] }
 0x9f8   :  { %v768_v0 = vpop.xlane.xlu0 %767  ;;  %837 = vmatpush.bf16.msrb.mxu3 %v3054_v12 }
 0xa00   :  { %v771_v1 = vpop.xlane.xlu2 %770 }
 0xa01   :  { %3211 = vrcp.f32 %v771_v1 }
 0xa02   :  { %3213 = vrcp.f32 %v768_v0 }
 0xa07   :  { %v3212_v4 = vpop.eup %3211 }
 0xa08   :  { %v3214_v5 = vpop.eup %3213  ;;  %v775_v6 = vmul.f32 %v3212_v4, %v3206_v54  ;;  %v3056_v54 = vld [vmem:[%s3440_s19 + $0x10] sm:$0xff]  ;;  %s4057_s19 = sld [smem:[#allocation12_spill]] }
 0xa09   :  { %v774_v7 = vmul.f32 %v3214_v5, %v3204_v51  ;;  %953 = vmatpush.bf16.msra.mxu2 %v3056_v54 }
 0xa0b   :  { %v778_v8 = vpop.permute.xlu0 %777  ;;  %v776_v9 = vpack.c.bf16 %v775_v6, %v774_v7  ;;  %v3059_v6 = vld [vmem:[%s3450_s30 + $0x28] sm:$0xff] }
 0xa0c   :  { %790 = vmatpush.bf16.msrb.mxu0 %v778_v8 }
 0xa0f   :  { %2776 = vmatmul.msk.bf16.vlgmr.msrb.gmra.mxu0 %vm200_vm1, %v776_v9 }
 0xa10   :  { %997 = vmatpush.bf16.msra.mxu0 %v3061_v61 }
 0xa14   :  { %998 = vmatpush.bf16.msra.mxu0 %v3060_v63 }
 0xa18   :  { %999 = vmatpush.bf16.msra.mxu0 %v3059_v6 }
 0xa7a   :  { %v720_v17 = vpop.f32.mrf.mxu3 }
 0xa82   :  { %v722_v18 = vpop.f32.mrf.mxu3 }
 0xa83   :  { %v725_v19 = vpack.c.bf16 %v722_v18, %v720_v17  ;;  %v3148_v18 = vld [vmem:[%s3435_s14 + $0x1] ss:$0 sm:$0xff]  ;;  %s4056_s14 = sld [smem:[#allocation13_spill]] }
 0xa85   :  { %2786 = vmatmul.msk.bf16.vlgmr.msrb.gmra.mxu3 %vm200_vm1, %v725_v19 }
 0xa8c   :  { %v792_v20 = vpop.f32.mrf.mxu0 }
 0xa94   :  { %v794_v21 = vpop.f32.mrf.mxu0 }
 0xa95   :  { %v797_v22 = vpack.c.bf16 %v794_v21, %v792_v20 }
 0xa97   :  { %2781 = vmatmul.msk.bf16.vlgmr.msrb.gmra.mxu1 %vm200_vm1, %v797_v22 }
 0xaa7   :  { %2837 = vmatmul.msk.bf16.vlgmr.msra.gmra.mxu1 %vm171_vm0, %v1064_v26  ;;  %v150_v26 = vld [vmem:[%s4053_s29] sm:$0xff] }
 0xb08   :  { %v839_v27 = vpop.f32.mrf.mxu3 }
 0xb10   :  { %v841_v34 = vpop.f32.mrf.mxu3 }
 0xb14   :  { %v816_v29 = vpop.f32.mrf.mxu1 }
 0xb15   :  { %v840_v30 = vadd.f32 %v839_v27, %v816_v29 }
 0xb17   :  { %v847_v31 = vadd.f32 %v3146_v28, %v840_v30 }
 0xb19   :  { %v849_v32 = vadd.f32 %v847_v31, %v3643_v10 }
 0xb1b   :  { %v851_v2 = vsel %vm171_vm0, %v849_v32, 0.0 }
 0xb1c   :  { %v818_v35 = vpop.f32.mrf.mxu1  ;;  %852 = vadd.xlane.f32.xlu2 %v851_v2 }
 0xb1d   :  { %v842_v36 = vadd.f32 %v841_v34, %v818_v35  ;;  %v3724_v34 = vld [vmem:[%s4053_s29 + $0x8] sm:$0xff] }
 0xb1f   :  { %v848_v3 = vadd.f32 %v3146_v28, %v842_v36 }
 0xb21   :  { %v850_v37 = vadd.f32 %v848_v3, %v3645_v11 }
 0xb23   :  { %v854_v38 = vsel %vm171_vm0, %v850_v37, 0.0 }
 0xb24   :  { %855 = vadd.xlane.f32.xlu2 %v854_v38  ;;  %v1093_v39 = vpop.f32.mrf.mxu1 }
 0xb2c   :  { %v1095_v40 = vpop.f32.mrf.mxu1 }
 0xb2d   :  { %v3693_v41 = vpack.c.bf16 %v1095_v40, %v1093_v39  ;;  %v3058_v39 = vld [vmem:[%s3450_s30 + $0x20] sm:$0xff]  ;;  %s4059_s30 = sld [smem:[#allocation11_spill]] }
 0xb2e   :  { %1000 = vmatpush.bf16.msra.mxu0 %v3058_v39 }
 0xb3c   :  { %1107 = vrot.lane.b32.xlu2 %v3693_v41, %s3374_s15 }
 0xb44   :  { %1179 = vrot.lane.b32.xlu2 %v3693_v41, %s3375_s5 }
 0xb4c   :  { %1177 = vrot.lane.b32.xlu2 %v3693_v41, %s3373_s0 }
 0xb8f   :  { %v853_v10 = vpop.xlane.xlu2 %852 }
 0xb90   :  { %v857_v11 = vmul.f32 %v853_v10, %v3611_v33  ;;  %v3149_v10 = vld [vmem:[%s3445_s24 + $0x1] ss:$0 sm:$0xff]  ;;  %s4058_s24 = sld [smem:[#allocation10_spill]] }
 0xb92   :  { %v859_v42 = vsub.f32 %v849_v32, %v857_v11 }
 0xb94   :  { %v861_v43 = vmul.f32 %v859_v42, %v859_v42 }
 0xb96   :  { %v863_v44 = vsel %vm171_vm0, %v861_v43, 0.0 }
 0xb97   :  { %864 = vadd.xlane.f32.xlu1 %v863_v44  ;;  %v856_v14 = vpop.xlane.xlu2 %855 }
 0xb98   :  { %v858_v45 = vmul.f32 %v856_v14, %v3611_v33 }
 0xb9a   :  { %v860_v46 = vsub.f32 %v850_v37, %v858_v45 }
 0xb9c   :  { %v862_v24 = vmul.f32 %v860_v46, %v860_v46 }
 0xb9e   :  { %v866_v47 = vsel %vm171_vm0, %v862_v24, 0.0  ;;  %v3150_v24 = vld [vmem:[%s3455_s6 + $0x1] ss:$0 sm:$0xff]  ;;  %s4060_s6 = sld [smem:[#allocation7_spill]] }
 0xb9f   :  { %867 = vadd.xlane.f32.xlu0 %v866_v47  ;;  %v1108_v48 = vpop.permute.xlu2 %1107 }
 0xba0   :  { %v1113_v49 = vsel %vm200_vm1, %v1108_v48, 0 }
 0xba1   :  { %1122 = vmatpush.bf16.xpose.msra.mxu3 %v1113_v49 }
 0xba7   :  { %v1180_v37 = vpop.permute.xlu2 %1179 }
 0xba8   :  { %2838 = vmatmul.msk.bf16.vlgmr.msra.gmra.mxu3 %vm200_vm1, %v3693_v41  ;;  %v1185_v38 = vsel %vm200_vm1, %v1180_v37, 0 }
 0xba9   :  { %1194 = vmatpush.bf16.xpose.msrb.mxu0 %v1185_v38 }
 0xc0a   :  { %v865_v51 = vpop.xlane.xlu1 %864 }
 0xc0b   :  { %v869_v52 = vmul.f32 %v865_v51, %v3611_v33 }
 0xc0d   :  { %v871_v53 = vadd.f32 1e-05, %v869_v52 }
 0xc0f   :  { %3215 = vrsqrt.f32 %v871_v53  ;;  %vm879_vm3 = vweird.f32 %v871_v53 }
 0xc12   :  { %v868_v55 = vpop.xlane.xlu0 %867 }
 0xc13   :  { %v870_v56 = vmul.f32 %v868_v55, %v3611_v33 }
 0xc15   :  { %v3216_v57 = vpop.eup %3215  ;;  %v872_v58 = vadd.f32 1e-05, %v870_v56 }
 0xc16   :  { %v874_v59 = vmul.f32 %v3216_v57, %v871_v53  ;;  %vm880_vm2 = vweird.f32 %v3216_v57 }
 0xc17   :  { %3217 = vrsqrt.f32 %v872_v58  ;;  %vm881_vm4 = vmor %vm879_vm3, %vm880_vm2  ;;  %vm889_vm6 = vweird.f32 %v872_v58 }
 0xc18   :  { %v875_v60 = vmul.f32 %v3216_v57, %v874_v59 }
 0xc1a   :  { %v876_v62 = vmul.f32 0.5, %v875_v60 }
 0xc1c   :  { %v877_v0 = vsub.f32 1.5, %v876_v62 }
 0xc1d   :  { %v3218_v1 = vpop.eup %3217 }
 0xc1e   :  { %v878_v4 = vmul.f32 %v3216_v57, %v877_v0  ;;  %v884_v5 = vmul.f32 %v3218_v1, %v872_v58  ;;  %vm890_vm5 = vweird.f32 %v3218_v1 }
 0xc1f   :  { %vm891_vm7 = vmor %vm889_vm6, %vm890_vm5 }
 0xc20   :  { %v885_v7 = vmul.f32 %v3218_v1, %v884_v5  ;;  %v882_v8 = vsel %vm881_vm4, %v3216_v57, %v878_v4 }
 0xc21   :  { %v893_v15 = vmul.f32 %v882_v8, %v859_v42 }
 0xc22   :  { %v886_v9 = vmul.f32 0.5, %v885_v7 }
 0xc23   :  { %v898_v19 = vmul.f32 %v3147_v13, %v893_v15 }
 0xc24   :  { %v887_v12 = vsub.f32 1.5, %v886_v9 }
 0xc25   :  { %v903_v28 = vadd.f32 %v3148_v18, %v898_v19 }
 0xc26   :  { %v888_v16 = vmul.f32 %v3218_v1, %v887_v12 }
 0xc28   :  { %v892_v17 = vsel %vm891_vm7, %v3218_v1, %v888_v16 }
 0xc29   :  { %v894_v20 = vmul.f32 %v892_v17, %v860_v46  ;;  %v1178_v46 = vpop.permute.xlu2 %1177 }
 0xc2b   :  { %v899_v21 = vmul.f32 %v3147_v13, %v894_v20  ;;  %v1124_v22 = vpop.f32.mrf.mxu3 }
 0xc2c   :  { %v1129_v27 = vmul.f32 0.25, %v1124_v22 }
 0xc2d   :  { %v3718_v29 = vadd.f32 %v3148_v18, %v899_v21 }
 0xc2e   :  { %v1131_v30 = vadd.f32 %v1129_v27, %v150_v26 }
 0xc2f   :  { %v927_v31 = vpack.c.bf16 %v3718_v29, %v903_v28 }
 0xc30   :  { %v1133_v32 = vsel %vm200_vm1, %v1131_v30, -inf }
 0xc31   :  { %2811 = vmatmul.msk.bf16.vlgmr.msra.gmra.mxu2 %vm171_vm0, %v927_v31  ;;  %1134 = vmax.xlane.f32.xlu1 %v1133_v32 }
 0xc33   :  { %v1126_v2 = vpop.f32.mrf.mxu3 }
 0xc34   :  { %v1130_v35 = vmul.f32 0.25, %v1126_v2 }
 0xc36   :  { %v1132_v36 = vadd.f32 %v1130_v35, %v3724_v34 }
 0xc38   :  { %v1136_v3 = vsel %vm200_vm1, %v1132_v36, -inf }
 0xc39   :  { %1137 = vmax.xlane.f32.xlu2 %v1136_v3 }
 0xca4   :  { %v1135_v52 = vpop.xlane.xlu1 %1134 }
 0xca5   :  { %v1139_v54 = vsub.f32 %v1131_v30, %v1135_v52 }
 0xca7   :  { %v1141_v55 = vmul.f32 1.442695, %v1139_v54 }
 0xca9   :  { %3219 = vpow2.f32 %v1141_v55 }
 0xcac   :  { %v1138_v57 = vpop.xlane.xlu2 %1137 }
 0xcad   :  { %v1140_v60 = vsub.f32 %v1132_v36, %v1138_v57 }
 0xcaf   :  { %v1143_v62 = vmul.f32 1.442695, %v1140_v60  ;;  %v3220_v1 = vpop.eup %3219 }
 0xcb0   :  { %v1145_v5 = vsel %vm200_vm1, %v3220_v1, 0.0 }
 0xcb1   :  { %3221 = vpow2.f32 %v1143_v62 }
 0xcb4   :  { %v955_v40 = vpop.f32.mrf.mxu2 }
 0xcb5   :  { %v956_v11 = vadd.f32 %v3149_v10, %v955_v40 }
 0xcb7   :  { %v960_v44 = vmax.f32 %v956_v11, 0.0  ;;  %v3222_v7 = vpop.eup %3221  ;;  %v3064_v11 = vld [vmem:[%s4054_s3] sm:$0xff] }
 0xcb8   :  { %v1148_v8 = vsel %vm200_vm1, %v3222_v7, 0.0 }
 0xcbc   :  { %v957_v42 = vpop.f32.mrf.mxu2 }
 0xcbd   :  { %v958_v43 = vadd.f32 %v3149_v10, %v957_v42  ;;  %v3065_v42 = vld [vmem:[%s4054_s3 + $0x8] sm:$0xff] }
 0xcbe   :  { %1265 = vmatpush.bf16.msrb.mxu3 %v3065_v42 }
 0xcbf   :  { %v961_v14 = vmax.f32 %v958_v43, 0.0 }
 0xcc1   :  { %v962_v45 = vpack.c.bf16 %v961_v14, %v960_v44 }
 0xcc3   :  { %2828 = vmatmul.msk.bf16.vlgmr.msra.gmra.mxu0 %vm534_vm9, %v962_v45 }
 0xcd3   :  { %2840 = vmatmul.msk.bf16.vlgmr.msrb.gmra.mxu0 %vm200_vm1, %v1178_v46 }
 0xd40   :  { %v1002_v47 = vpop.f32.mrf.mxu0 }
 0xd41   :  { %v1003_v48 = vadd.f32 %v3150_v24, %v1002_v47 }
 0xd43   :  { %v3734_v49 = vadd.f32 %v1003_v48, %v903_v28  ;;  %v3151_v48 = vld [vmem:[%s4055_s8] ss:$0 sm:$0xff] }
 0xd45   :  { %v1009_v50 = vsel %vm171_vm0, %v3734_v49, 0.0 }
 0xd46   :  { %1010 = vadd.xlane.f32.xlu2 %v1009_v50 }
 0xd48   :  { %v1004_v51 = vpop.f32.mrf.mxu0 }
 0xd49   :  { %v1005_v53 = vadd.f32 %v3150_v24, %v1004_v51 }
 0xd4b   :  { %v1008_v22 = vadd.f32 %v1005_v53, %v3718_v29 }
 0xd50   :  { %v1196_v56 = vpop.f32.mrf.mxu0 }
 0xd51   :  { %v1201_v58 = vmul.f32 0.25, %v1196_v56 }
 0xd53   :  { %v1203_v59 = vadd.f32 %v1201_v58, %v150_v26  ;;  %v1012_v26 = vsel %vm171_vm0, %v1008_v22, 0.0 }
 0xd55   :  { %v1205_v61 = vsel %vm200_vm1, %v1203_v59, -inf }
 0xd56   :  { %1206 = vmax.xlane.f32.xlu0 %v1205_v61 }
 0xd58   :  { %v1198_v63 = vpop.f32.mrf.mxu0 }
 0xd59   :  { %v1202_v0 = vmul.f32 0.25, %v1198_v63 }
 0xd5b   :  { %v1204_v4 = vadd.f32 %v1202_v0, %v3724_v34 }
 0xd5d   :  { %v1208_v6 = vsel %vm200_vm1, %v1204_v4, -inf }
 0xd5e   :  { %1146 = vadd.xlane.f32.xlu0 %v1145_v5  ;;  %1209 = vmax.xlane.f32.xlu1 %v1208_v6 }
 0xd66   :  { %1149 = vadd.xlane.f32.xlu1 %v1148_v8 }
 0xdb9   :  { %v1011_v50 = vpop.xlane.xlu2 %1010 }
 0xdba   :  { %v1015_v53 = vmul.f32 %v1011_v50, %v3611_v33  ;;  %v3067_v50 = vld [vmem:[%s4057_s19 + $0x8] sm:$0xff] }
 0xdbb   :  { %1382 = vmatpush.bf16.msra.mxu0 %v3067_v50 }
 0xdbc   :  { %v1017_v56 = vsub.f32 %v3734_v49, %v1015_v53 }
 0xdbe   :  { %v1019_v0 = vmul.f32 %v1017_v56, %v1017_v56 }
 0xdc9   :  { %v1207_v9 = vpop.xlane.xlu0 %1206 }
 0xdca   :  { %v1211_v12 = vsub.f32 %v1203_v59, %v1207_v9 }
 0xdcc   :  { %v1213_v13 = vmul.f32 1.442695, %v1211_v12 }
 0xdce   :  { %3223 = vpow2.f32 %v1213_v13  ;;  %v3069_v13 = vld [vmem:[%s4056_s14 + $0x8] sm:$0xff] }
 0xdd1   :  { %v1210_v15 = vpop.xlane.xlu1 %1209  ;;  %v1147_v27 = vpop.xlane.xlu0 %1146 }
 0xdd2   :  { %v1212_v16 = vsub.f32 %v1204_v4, %v1210_v15 }
 0xdd4   :  { %v3224_v17 = vpop.eup %3223  ;;  %v1215_v18 = vmul.f32 1.442695, %v1212_v16 }
 0xdd5   :  { %v1217_v19 = vsel %vm200_vm1, %v3224_v17, 0.0 }
 0xdd6   :  { %3225 = vpow2.f32 %v1215_v18  ;;  %1218 = vadd.xlane.f32.xlu0 %v1217_v19 }
 0xdd9   :  { %v1150_v28 = vpop.xlane.xlu1 %1149 }
 0xdda   :  { %3227 = vrcp.f32 %v1150_v28 }
 0xddb   :  { %3229 = vrcp.f32 %v1147_v27 }
 0xddc   :  { %v3226_v20 = vpop.eup %3225 }
 0xddd   :  { %v1220_v21 = vsel %vm200_vm1, %v3226_v20, 0.0 }
 0xdde   :  { %1221 = vadd.xlane.f32.xlu1 %v1220_v21  ;;  %v3068_v21 = vld [vmem:[%s4056_s14] sm:$0xff] }
 0xde0   :  { %v3228_v31 = vpop.eup %3227 }
 0xde1   :  { %v3230_v32 = vpop.eup %3229  ;;  %v1154_v2 = vmul.f32 %v3228_v31, %v3222_v7 }
 0xde2   :  { %v1153_v36 = vmul.f32 %v3230_v32, %v3220_v1 }
 0xdea   :  { %1156 = vrot.lane.b32.xlu0 %v3693_v41, %s3377_s13 }
 0xdf7   :  { %1228 = vrot.lane.b32.xlu1 %v3693_v41, %s3376_s16  ;;  %v1155_v41 = vpack.c.bf16 %v1154_v2, %v1153_v36 }
 0xe14   :  { %1013 = vadd.xlane.f32.xlu0 %v1012_v26 }
 0xe49   :  { %v1219_v30 = vpop.xlane.xlu0 %1218 }
 0xe51   :  { %v1222_v35 = vpop.xlane.xlu1 %1221 }
 0xe52   :  { %3231 = vrcp.f32 %v1222_v35 }
 0xe53   :  { %3233 = vrcp.f32 %v1219_v30 }
 0xe58   :  { %v3232_v29 = vpop.eup %3231 }
 0xe59   :  { %v3234_v37 = vpop.eup %3233  ;;  %v1226_v38 = vmul.f32 %v3232_v29, %v3226_v20 }
 0xe5a   :  { %v1225_v39 = vmul.f32 %v3234_v37, %v3224_v17 }
 0xe5c   :  { %v1157_v3 = vpop.permute.xlu0 %1156  ;;  %v1227_v10 = vpack.c.bf16 %v1226_v38, %v1225_v39 }
 0xe5d   :  { %1169 = vmatpush.bf16.msrb.mxu2 %v1157_v3 }
 0xe60   :  { %2839 = vmatmul.msk.bf16.vlgmr.msrb.gmra.mxu2 %vm200_vm1, %v1155_v41 }
 0xe61   :  { %1288 = vmatpush.bf16.msra.mxu2 %v3064_v11 }
 0xe69   :  { %v1229_v40 = vpop.permute.xlu1 %1228 }
 0xe6a   :  { %1241 = vmatpush.bf16.msrb.mxu1 %v1229_v40 }
 0xe6d   :  { %2841 = vmatmul.msk.bf16.vlgmr.msrb.gmra.mxu1 %vm200_vm1, %v1227_v10  ;;  %v3152_v10 = vld [vmem:[%s3460_s12 + $0x1] ss:$0 sm:$0xff]  ;;  %s4061_s12 = sld [smem:[#allocation14_spill]] }
 0xe6e   :  { %1415 = vmatpush.bf16.msra.mxu1 %v3069_v13 }
 0xe72   :  { %1416 = vmatpush.bf16.msra.mxu1 %v3068_v21 }
 0xe87   :  { %v1014_v57 = vpop.xlane.xlu0 %1013 }
 0xe88   :  { %v1016_v62 = vmul.f32 %v1014_v57, %v3611_v33 }
 0xe8a   :  { %v1018_v4 = vsub.f32 %v1008_v22, %v1016_v62 }
 0xe8c   :  { %v1020_v49 = vmul.f32 %v1018_v4, %v1018_v4 }
 0xe8e   :  { %v1024_v6 = vsel %vm171_vm0, %v1020_v49, 0.0 }
 0xee3   :  { %v1171_v43 = vpop.f32.mrf.mxu2 }
 0xeea   :  { %v1243_v44 = vpop.f32.mrf.mxu1 }
 0xeeb   :  { %v1173_v14 = vpop.f32.mrf.mxu2 }
 0xeec   :  { %v1176_v45 = vpack.c.bf16 %v1173_v14, %v1171_v43 }
 0xeee   :  { %2851 = vmatmul.msk.bf16.vlgmr.msra.gmra.mxu2 %vm200_vm1, %v1176_v45 }
 0xef2   :  { %v1245_v46 = vpop.f32.mrf.mxu1 }
 0xef3   :  { %v1248_v24 = vpack.c.bf16 %v1245_v46, %v1243_v44  ;;  %v3153_v44 = vld [vmem:[%s3465_s20 + $0x1] ss:$0 sm:$0xff]  ;;  %s4062_s20 = sld [smem:[#allocation15_spill]] }
 0xef5   :  { %2846 = vmatmul.msk.bf16.vlgmr.msrb.gmra.mxu3 %vm200_vm1, %v1248_v24 }
 0xf71   :  { %v1290_v47 = vpop.f32.mrf.mxu2 }
 0xf78   :  { %v1267_v51 = vpop.f32.mrf.mxu3 }
 0xf79   :  { %v1291_v52 = vadd.f32 %v1290_v47, %v1267_v51  ;;  %v1292_v59 = vpop.f32.mrf.mxu2 }
 0xf7b   :  { %v1298_v54 = vadd.f32 %v3151_v48, %v1291_v52 }
 0xf7d   :  { %v1300_v55 = vadd.f32 %v1298_v54, %v3680_v23  ;;  %v1021_v23 = vsel %vm171_vm0, %v1019_v0, 0.0  ;;  %v3066_v54 = vld [vmem:[%s4057_s19] sm:$0xff] }
 0xf7e   :  { %1383 = vmatpush.bf16.msra.mxu0 %v3066_v54 }
 0xf7f   :  { %v1302_v58 = vsel %vm171_vm0, %v1300_v55, 0.0 }
 0xf80   :  { %1303 = vadd.xlane.f32.xlu2 %v1302_v58  ;;  %v1269_v60 = vpop.f32.mrf.mxu3 }
 0xf81   :  { %v1293_v61 = vadd.f32 %v1292_v59, %v1269_v60 }
 0xf83   :  { %v1299_v63 = vadd.f32 %v3151_v48, %v1293_v61 }
 0xf85   :  { %v1301_v1 = vadd.f32 %v1299_v63, %v3683_v25 }
 0xf87   :  { %v1305_v5 = vsel %vm171_vm0, %v1301_v1, 0.0 }
 0xf88   :  { %1306 = vadd.xlane.f32.xlu1 %v1305_v5  ;;  %1022 = vadd.xlane.f32.xlu2 %v1021_v23 }
 0xf90   :  { %1025 = vadd.xlane.f32.xlu2 %v1024_v6  ;;  %v3154_v6 = vld [vmem:[%s4058_s24] ss:$0 sm:$0xff] }
 0xff3   :  { %v1304_v7 = vpop.xlane.xlu2 %1303 }
 0xff4   :  { %v1308_v8 = vmul.f32 %v1304_v7, %v3611_v33 }
 0xff6   :  { %v3768_v9 = vsub.f32 %v1300_v55, %v1308_v8 }
 0xff8   :  { %v1312_v25 = vmul.f32 %v3768_v9, %v3768_v9 }
 0xffa   :  { %v1314_v12 = vsel %vm171_vm0, %v1312_v25, 0.0 }
 0xffb   :  { %v1307_v15 = vpop.xlane.xlu1 %1306  ;;  %1315 = vadd.xlane.f32.xlu2 %v1314_v12  ;;  %v1023_v16 = vpop.xlane.xlu2 %1022  ;;  %v3155_v12 = vld [vmem:[%s4059_s30] ss:$0 sm:$0xff] }
 0xffc   :  { %v1309_v17 = vmul.f32 %v1307_v15, %v3611_v33  ;;  %v1027_v18 = vmul.f32 %v1023_v16, %v3611_v33 }
 0xffe   :  { %v3776_v19 = vsub.f32 %v1301_v1, %v1309_v17  ;;  %v1029_v20 = vadd.f32 1e-05, %v1027_v18 }
0x1000   :  { %3235 = vrsqrt.f32 %v1029_v20  ;;  %v1313_v22 = vmul.f32 %v3776_v19, %v3776_v19  ;;  %vm1037_vm10 = vweird.f32 %v1029_v20 }
0x1002   :  { %v1317_v26 = vsel %vm171_vm0, %v1313_v22, 0.0 }
0x1003   :  { %1318 = vadd.xlane.f32.xlu2 %v1317_v26  ;;  %v1026_v27 = vpop.xlane.xlu2 %1025 }
0x1004   :  { %v1028_v28 = vmul.f32 %v1026_v27, %v3611_v33 }
0x1006   :  { %v3236_v30 = vpop.eup %3235  ;;  %v1030_v31 = vadd.f32 1e-05, %v1028_v28 }
0x1007   :  { %v1032_v32 = vmul.f32 %v3236_v30, %v1029_v20  ;;  %vm1038_vm8 = vweird.f32 %v3236_v30 }
0x1008   :  { %3237 = vrsqrt.f32 %v1030_v31  ;;  %vm1039_vm11 = vmor %vm1037_vm10, %vm1038_vm8  ;;  %vm1047_vm13 = vweird.f32 %v1030_v31 }
0x1009   :  { %v1033_v2 = vmul.f32 %v3236_v30, %v1032_v32 }
0x100b   :  { %v1034_v35 = vmul.f32 0.5, %v1033_v2 }
0x100d   :  { %v1035_v36 = vsub.f32 1.5, %v1034_v35  ;;  %v3815_v35 = vld [vmem:[%s4060_s6] sm:$0xff] }
0x100e   :  { %v3238_v3 = vpop.eup %3237 }
0x100f   :  { %v1036_v41 = vmul.f32 %v3236_v30, %v1035_v36  ;;  %v1042_v29 = vmul.f32 %v3238_v3, %v1030_v31  ;;  %vm1048_vm12 = vweird.f32 %v3238_v3 }
0x1010   :  { %vm1049_vm14 = vmor %vm1047_vm13, %vm1048_vm12 }
0x1011   :  { %v1043_v37 = vmul.f32 %v3238_v3, %v1042_v29  ;;  %v1040_v38 = vsel %vm1039_vm11, %v3236_v30, %v1036_v41 }
0x1012   :  { %v1051_v11 = vmul.f32 %v1040_v38, %v1017_v56 }
0x1013   :  { %v1044_v39 = vmul.f32 0.5, %v1043_v37  ;;  %v3820_v37 = vld [vmem:[%s4060_s6 + $0x8] sm:$0xff] }
0x1014   :  { %v1056_v14 = vmul.f32 %v3152_v10, %v1051_v11 }
0x1015   :  { %v1045_v40 = vsub.f32 1.5, %v1044_v39 }
0x1016   :  { %v1061_v24 = vadd.f32 %v3153_v44, %v1056_v14 }
0x1017   :  { %v1046_v42 = vmul.f32 %v3238_v3, %v1045_v40 }
0x1019   :  { %v1050_v43 = vsel %vm1049_vm14, %v3238_v3, %v1046_v42 }
0x101a   :  { %v1052_v45 = vmul.f32 %v1050_v43, %v1018_v4 }
0x101c   :  { %v1057_v46 = vmul.f32 %v3152_v10, %v1052_v45 }
0x101e   :  { %v1062_v47 = vadd.f32 %v3153_v44, %v1057_v46 }
0x1020   :  { %v3785_v48 = vpack.c.bf16 %v1062_v47, %v1061_v24 }
0x1022   :  { %2869 = vmatmul.msk.bf16.vlgmr.msra.gmra.mxu1 %vm171_vm0, %v3785_v48 }
0x106e   :  { %v1316_v51 = vpop.xlane.xlu2 %1315 }
0x106f   :  { %v1320_v52 = vmul.f32 %v1316_v51, %v3611_v33 }
0x1071   :  { %v1322_v53 = vadd.f32 1e-05, %v1320_v52 }
0x1073   :  { %3239 = vrsqrt.f32 %v1322_v53  ;;  %vm1330_vm2 = vweird.f32 %v1322_v53 }
0x1076   :  { %v1319_v55 = vpop.xlane.xlu2 %1318 }
0x1077   :  { %v1321_v56 = vmul.f32 %v1319_v55, %v3611_v33 }
0x1079   :  { %v3240_v57 = vpop.eup %3239  ;;  %v1323_v58 = vadd.f32 1e-05, %v1321_v56 }
0x107a   :  { %v1325_v59 = vmul.f32 %v3240_v57, %v1322_v53  ;;  %vm1331_vm15 = vweird.f32 %v3240_v57 }
0x107b   :  { %3241 = vrsqrt.f32 %v1323_v58  ;;  %vm1332_vm3 = vmor %vm1330_vm2, %vm1331_vm15  ;;  %vm1340_vm5 = vweird.f32 %v1323_v58 }
0x107c   :  { %v1326_v60 = vmul.f32 %v3240_v57, %v1325_v59 }
0x107e   :  { %v1327_v61 = vmul.f32 0.5, %v1326_v60 }
0x1080   :  { %v1328_v62 = vsub.f32 1.5, %v1327_v61 }
0x1081   :  { %v3242_v63 = vpop.eup %3241 }
0x1082   :  { %v1329_v0 = vmul.f32 %v3240_v57, %v1328_v62  ;;  %v1335_v1 = vmul.f32 %v3242_v63, %v1323_v58  ;;  %vm1341_vm4 = vweird.f32 %v3242_v63 }
0x1083   :  { %vm1342_vm6 = vmor %vm1340_vm5, %vm1341_vm4 }
0x1084   :  { %v1336_v4 = vmul.f32 %v3242_v63, %v1335_v1  ;;  %v1333_v5 = vsel %vm1332_vm3, %v3240_v57, %v1329_v0 }
0x1085   :  { %v1344_v7 = vmul.f32 %v1333_v5, %v3768_v9 }
0x1086   :  { %v1337_v23 = vmul.f32 0.5, %v1336_v4 }
0x1087   :  { %v1349_v13 = vmul.f32 %v3154_v6, %v1344_v7 }
0x1088   :  { %v1338_v49 = vsub.f32 1.5, %v1337_v23 }
0x1089   :  { %v3797_v17 = vadd.f32 %v3155_v12, %v1349_v13 }
0x108a   :  { %v1339_v8 = vmul.f32 %v3242_v63, %v1338_v49 }
0x108c   :  { %v1343_v25 = vsel %vm1342_vm6, %v3242_v63, %v1339_v8 }
0x108d   :  { %v1345_v15 = vmul.f32 %v1343_v25, %v3776_v19 }
0x108f   :  { %v1350_v16 = vmul.f32 %v3154_v6, %v1345_v15 }
0x1091   :  { %v3799_v18 = vadd.f32 %v3155_v12, %v1350_v16 }
0x1093   :  { %v1356_v20 = vpack.c.bf16 %v3799_v18, %v3797_v17 }
0x1095   :  { %2860 = vmatmul.msk.bf16.vlgmr.msra.gmra.mxu0 %vm171_vm0, %v1356_v20 }
0x109f   :  { %v1418_v21 = vpop.f32.mrf.mxu1 }
0x10a7   :  { %v1420_v9 = vpop.f32.mrf.mxu1 }
0x10a8   :  { %v3804_v22 = vpack.c.bf16 %v1420_v9, %v1418_v21 }
0x10aa   :  { %1504 = vrot.lane.b32.xlu0 %v3804_v22, %s3373_s0  ;;  %v1436_v19 = vsel %vm200_vm1, %v3804_v22, 0 }
0x10ab   :  { %1445 = vmatpush.bf16.xpose.msra.mxu3 %v1436_v19 }
0x1112   :  { %v1385_v26 = vpop.f32.mrf.mxu0 }
0x111a   :  { %v1387_v27 = vpop.f32.mrf.mxu0 }
0x111b   :  { %v1430_v28 = vpack.c.bf16 %v1387_v27, %v1385_v26  ;;  %v3071_v27 = vld [vmem:[%s4061_s12 + $0x8] sm:$0xff] }
0x111c   :  { %v1505_v30 = vpop.permute.xlu0 %1504  ;;  %1590 = vmatpush.bf16.msrb.mxu3 %v3071_v27 }
0x111d   :  { %v1510_v31 = vsel %vm200_vm1, %v1505_v30, 0  ;;  %1502 = vrot.lane.b32.xlu2 %v1430_v28, %s3373_s0  ;;  %2870 = vmatmul.msk.bf16.vlgmr.msra.gmra.mxu3 %vm200_vm1, %v1430_v28  ;;  %v3070_v28 = vld [vmem:[%s4061_s12] sm:$0xff] }
0x111e   :  { %1519 = vmatpush.bf16.xpose.msrb.mxu0 %v1510_v31 }
0x1177   :  { %v1503_v32 = vpop.permute.xlu2 %1502 }
0x1178   :  { %2872 = vmatmul.msk.bf16.vlgmr.msrb.gmra.mxu0 %vm200_vm1, %v1503_v32 }
0x11a0   :  { %v1447_v2 = vpop.f32.mrf.mxu3 }
0x11a1   :  { %v1452_v36 = vmul.f32 0.25, %v1447_v2 }
0x11a3   :  { %v1454_v3 = vadd.f32 %v1452_v36, %v3815_v35 }
0x11a5   :  { %v1456_v41 = vsel %vm200_vm1, %v1454_v3, -inf }
0x11a6   :  { %1457 = vmax.xlane.f32.xlu1 %v1456_v41 }
0x11a8   :  { %v1449_v29 = vpop.f32.mrf.mxu3 }
0x11a9   :  { %v1453_v38 = vmul.f32 0.25, %v1449_v29  ;;  %v3156_v29 = vld [vmem:[%s4062_s20] ss:$0 sm:$0xff] }
0x11ab   :  { %v1455_v39 = vadd.f32 %v1453_v38, %v3820_v37 }
0x11ad   :  { %v1459_v40 = vsel %vm200_vm1, %v1455_v39, -inf }
0x11ae   :  { %1460 = vmax.xlane.f32.xlu1 %v1459_v40 }
0x11f5   :  { %v1521_v10 = vpop.f32.mrf.mxu0 }
0x11f6   :  { %v1526_v11 = vmul.f32 0.25, %v1521_v10 }
0x11f8   :  { %v1528_v42 = vadd.f32 %v1526_v11, %v3815_v35 }
0x11fa   :  { %v1530_v43 = vsel %vm200_vm1, %v1528_v42, -inf }
0x11fb   :  { %1531 = vmax.xlane.f32.xlu0 %v1530_v43 }
0x11fd   :  { %v1523_v44 = vpop.f32.mrf.mxu0 }
0x11fe   :  { %v1527_v14 = vmul.f32 0.25, %v1523_v44 }
0x1200   :  { %v1529_v45 = vadd.f32 %v1527_v14, %v3820_v37 }
0x1202   :  { %v1533_v46 = vsel %vm200_vm1, %v1529_v45, -inf }
0x1203   :  { %1534 = vmax.xlane.f32.xlu1 %v1533_v46 }
0x120f   :  { %1553 = vrot.lane.b32.xlu0 %v3804_v22, %s3375_s5 }
0x1219   :  { %v1458_v24 = vpop.xlane.xlu1 %1457 }
0x121a   :  { %v1462_v47 = vsub.f32 %v1454_v3, %v1458_v24 }
0x121c   :  { %v1464_v50 = vmul.f32 1.442695, %v1462_v47 }
0x121e   :  { %3243 = vpow2.f32 %v1464_v50 }
0x1221   :  { %v1461_v51 = vpop.xlane.xlu1 %1460 }
0x1222   :  { %v1463_v52 = vsub.f32 %v1455_v39, %v1461_v51 }
0x1224   :  { %v3244_v53 = vpop.eup %3243  ;;  %v1466_v54 = vmul.f32 1.442695, %v1463_v52 }
0x1225   :  { %v1468_v55 = vsel %vm200_vm1, %v3244_v53, 0.0 }
0x1226   :  { %3245 = vpow2.f32 %v1466_v54  ;;  %1469 = vadd.xlane.f32.xlu2 %v1468_v55 }
0x122c   :  { %v3246_v56 = vpop.eup %3245 }
0x122d   :  { %v1471_v57 = vsel %vm200_vm1, %v3246_v56, 0.0 }
0x122e   :  { %1472 = vadd.xlane.f32.xlu1 %v1471_v57 }
0x126e   :  { %v1532_v58 = vpop.xlane.xlu0 %1531 }
0x126f   :  { %v1536_v59 = vsub.f32 %v1528_v42, %v1532_v58 }
0x1271   :  { %v1538_v60 = vmul.f32 1.442695, %v1536_v59 }
0x1273   :  { %3247 = vpow2.f32 %v1538_v60  ;;  %v3072_v60 = vld [vmem:[%s4063_s18] sm:$0xff] }
0x1276   :  { %v1535_v61 = vpop.xlane.xlu1 %1534 }
0x1277   :  { %v1537_v62 = vsub.f32 %v1529_v45, %v1535_v61 }
0x1279   :  { %v3248_v63 = vpop.eup %3247  ;;  %v1540_v0 = vmul.f32 1.442695, %v1537_v62 }
0x127a   :  { %v1542_v1 = vsel %vm200_vm1, %v3248_v63, 0.0 }
0x127b   :  { %3249 = vpow2.f32 %v1540_v0  ;;  %1543 = vadd.xlane.f32.xlu1 %v1542_v1 }
0x1281   :  { %v3250_v4 = vpop.eup %3249  ;;  %v1554_v5 = vpop.permute.xlu0 %1553 }
0x1282   :  { %1566 = vmatpush.bf16.msrb.mxu1 %v1554_v5  ;;  %v1545_v23 = vsel %vm200_vm1, %v3250_v4, 0.0 }
0x1283   :  { %1546 = vadd.xlane.f32.xlu1 %v1545_v23 }
0x1299   :  { %v1470_v16 = vpop.xlane.xlu2 %1469 }
0x129c   :  { %1480 = vrot.lane.b32.xlu1 %v3804_v22, %s3374_s15 }
0x12a1   :  { %v1473_v49 = vpop.xlane.xlu1 %1472 }
0x12ee   :  { %v1544_v6 = vpop.xlane.xlu1 %1543 }
0x12ef   :  { %3251 = vrcp.f32 %v1544_v6 }
0x12f5   :  { %v3252_v8 = vpop.eup %3251 }
0x12f6   :  { %v1547_v7 = vpop.xlane.xlu1 %1546  ;;  %v1550_v12 = vmul.f32 %v3252_v8, %v3248_v63 }
0x12f7   :  { %3253 = vrcp.f32 %v1547_v7 }
0x12f8   :  { %3255 = vrcp.f32 %v1473_v49 }
0x12f9   :  { %3257 = vrcp.f32 %v1470_v16 }
0x12fd   :  { %v3254_v25 = vpop.eup %3253 }
0x12fe   :  { %v1551_v13 = vmul.f32 %v3254_v25, %v3250_v4  ;;  %v3256_v20 = vpop.eup %3255 }
0x12ff   :  { %v3258_v21 = vpop.eup %3257  ;;  %v1477_v9 = vmul.f32 %v3256_v20, %v3246_v56 }
0x1300   :  { %v1552_v15 = vpack.c.bf16 %v1551_v13, %v1550_v12  ;;  %v1476_v22 = vmul.f32 %v3258_v21, %v3244_v53 }
0x1302   :  { %2873 = vmatmul.msk.bf16.vlgmr.msrb.gmra.mxu1 %vm200_vm1, %v1552_v15  ;;  %v1478_v26 = vpack.c.bf16 %v1477_v9, %v1476_v22  ;;  %v3157_v15 = vld [vmem:[%s4064_s22] ss:$0 sm:$0xff] }
0x1303   :  { %v3158_v9 = vld [vmem:[%s4065_s23] ss:$0 sm:$0xff] }
0x130e   :  { %v1481_v19 = vpop.permute.xlu1 %1480 }
0x130f   :  { %1493 = vmatpush.bf16.msrb.mxu2 %v1481_v19 }
0x1312   :  { %2871 = vmatmul.msk.bf16.vlgmr.msrb.gmra.mxu2 %vm200_vm1, %v1478_v26 }
0x1313   :  { %1613 = vmatpush.bf16.msra.mxu2 %v3070_v28 }
0x137f   :  { %v1568_v30 = vpop.f32.mrf.mxu1 }
0x1387   :  { %v1570_v31 = vpop.f32.mrf.mxu1 }
0x1388   :  { %v1573_v32 = vpack.c.bf16 %v1570_v31, %v1568_v30  ;;  %v3077_v31 = vld [vmem:[%s4066_s26 + $0x18] sm:$0xff] }
0x1389   :  { %1767 = vmatpush.bf16.msra.mxu1 %v3077_v31 }
0x138a   :  { %2878 = vmatmul.msk.bf16.vlgmr.msrb.gmra.mxu3 %vm200_vm1, %v1573_v32  ;;  %v3076_v32 = vld [vmem:[%s4066_s26 + $0x10] sm:$0xff] }
0x138d   :  { %1768 = vmatpush.bf16.msra.mxu1 %v3076_v32 }
0x1395   :  { %v1495_v2 = vpop.f32.mrf.mxu2 }
0x139d   :  { %v1497_v36 = vpop.f32.mrf.mxu2 }
0x139e   :  { %v1500_v3 = vpack.c.bf16 %v1497_v36, %v1495_v2  ;;  %v3075_v2 = vld [vmem:[%s4066_s26 + $0x8] sm:$0xff]  ;;  %v3074_v36 = vld [vmem:[%s4066_s26] sm:$0xff] }
0x139f   :  { %1769 = vmatpush.bf16.msra.mxu1 %v3075_v2 }
0x13a0   :  { %2883 = vmatmul.msk.bf16.vlgmr.msra.gmra.mxu2 %vm200_vm1, %v1500_v3 }
0x13a3   :  { %1770 = vmatpush.bf16.msra.mxu1 %v3074_v36 }
0x140d   :  { %v1592_v41 = vpop.f32.mrf.mxu3 }
0x1415   :  { %v1594_v42 = vpop.f32.mrf.mxu3 }
0x1423   :  { %v1615_v38 = vpop.f32.mrf.mxu2 }
0x1424   :  { %v1616_v39 = vadd.f32 %v1615_v38, %v1592_v41  ;;  %v3159_v41 = vld [vmem:[%s4067_s28] ss:$0 sm:$0xff] }
0x1426   :  { %v1623_v40 = vadd.f32 %v3156_v29, %v1616_v39 }
0x1428   :  { %v1625_v10 = vadd.f32 %v1623_v40, %v3797_v17 }
0x142a   :  { %v1627_v11 = vsel %vm171_vm0, %v1625_v10, 0.0 }
0x142b   :  { %v1617_v43 = vpop.f32.mrf.mxu2  ;;  %1628 = vadd.xlane.f32.xlu2 %v1627_v11 }
0x142c   :  { %v1618_v44 = vadd.f32 %v1617_v43, %v1594_v42  ;;  %v3160_v42 = vld [vmem:[%s4068_s1] ss:$0 sm:$0xff] }
0x142e   :  { %v1624_v14 = vadd.f32 %v3156_v29, %v1618_v44 }
0x1430   :  { %v1626_v45 = vadd.f32 %v1624_v14, %v3799_v18  ;;  %v3073_v18 = vld [vmem:[%s4063_s18 + $0x8] sm:$0xff] }
0x1431   :  { %1722 = vmatpush.bf16.msra.mxu0 %v3073_v18 }
0x1432   :  { %v1630_v46 = vsel %vm171_vm0, %v1626_v45, 0.0 }
0x1433   :  { %1631 = vadd.xlane.f32.xlu2 %v1630_v46 }
0x1435   :  { %1723 = vmatpush.bf16.msra.mxu0 %v3072_v60 }
0x149e   :  { %v1629_v24 = vpop.xlane.xlu2 %1628 }
0x149f   :  { %v1633_v47 = vmul.f32 %v1629_v24, %v3611_v33 }
0x14a1   :  { %v1635_v50 = vsub.f32 %v1625_v10, %v1633_v47 }
0x14a3   :  { %v1637_v51 = vmul.f32 %v1635_v50, %v1635_v50 }
0x14a5   :  { %v1639_v17 = vsel %vm171_vm0, %v1637_v51, 0.0 }
0x14a6   :  { %1640 = vadd.xlane.f32.xlu0 %v1639_v17  ;;  %v1632_v52 = vpop.xlane.xlu2 %1631 }
0x14a7   :  { %v1634_v53 = vmul.f32 %v1632_v52, %v3611_v33 }
0x14a9   :  { %v1636_v54 = vsub.f32 %v1626_v45, %v1634_v53 }
0x14ab   :  { %v1638_v55 = vmul.f32 %v1636_v54, %v1636_v54 }
0x14ad   :  { %v1642_v56 = vsel %vm171_vm0, %v1638_v55, 0.0 }
0x14ae   :  { %1643 = vadd.xlane.f32.xlu1 %v1642_v56 }
0x1519   :  { %v1641_v57 = vpop.xlane.xlu0 %1640 }
0x151a   :  { %v1645_v58 = vmul.f32 %v1641_v57, %v3611_v33 }
0x151c   :  { %v1647_v59 = vadd.f32 1e-05, %v1645_v58 }
0x151e   :  { %3259 = vrsqrt.f32 %v1647_v59  ;;  %vm1655_vm8 = vweird.f32 %v1647_v59 }
0x1521   :  { %v1644_v61 = vpop.xlane.xlu1 %1643 }
0x1522   :  { %v1646_v62 = vmul.f32 %v1644_v61, %v3611_v33 }
0x1524   :  { %v3260_v63 = vpop.eup %3259  ;;  %v1648_v0 = vadd.f32 1e-05, %v1646_v62 }
0x1525   :  { %v1650_v1 = vmul.f32 %v3260_v63, %v1647_v59  ;;  %vm1656_vm7 = vweird.f32 %v3260_v63  ;;  %v3079_v59 = vld [vmem:[%s3470_s27 + $0x18] sm:$0xff] }
0x1526   :  { %3261 = vrsqrt.f32 %v1648_v0  ;;  %vm1657_vm10 = vmor %vm1655_vm8, %vm1656_vm7  ;;  %vm1665_vm12 = vweird.f32 %v1648_v0  ;;  %1860 = vmatpush.bf16.msra.mxu3 %v3079_v59 }
0x1527   :  { %v1651_v4 = vmul.f32 %v3260_v63, %v1650_v1 }
0x1529   :  { %v1652_v5 = vmul.f32 0.5, %v1651_v4 }
0x152b   :  { %v1653_v23 = vsub.f32 1.5, %v1652_v5 }
0x152c   :  { %v3262_v49 = vpop.eup %3261 }
0x152d   :  { %v1654_v6 = vmul.f32 %v3260_v63, %v1653_v23  ;;  %v1660_v7 = vmul.f32 %v3262_v49, %v1648_v0  ;;  %vm1666_vm11 = vweird.f32 %v3262_v49 }
0x152e   :  { %vm1667_vm13 = vmor %vm1665_vm12, %vm1666_vm11 }
0x152f   :  { %v1661_v8 = vmul.f32 %v3262_v49, %v1660_v7  ;;  %v1658_v25 = vsel %vm1657_vm10, %v3260_v63, %v1654_v6  ;;  %v3078_v63 = vld [vmem:[%s3470_s27 + $0x10] sm:$0xff] }
0x1530   :  { %v1669_v16 = vmul.f32 %v1658_v25, %v1635_v50  ;;  %1861 = vmatpush.bf16.msra.mxu3 %v3078_v63 }
0x1531   :  { %v1662_v12 = vmul.f32 0.5, %v1661_v8 }
0x1532   :  { %v1674_v22 = vmul.f32 %v3157_v15, %v1669_v16 }
0x1533   :  { %v1663_v13 = vsub.f32 1.5, %v1662_v12 }
0x1534   :  { %v1679_v27 = vadd.f32 %v3158_v9, %v1674_v22 }
0x1535   :  { %v1664_v20 = vmul.f32 %v3262_v49, %v1663_v13 }
0x1537   :  { %v1668_v21 = vsel %vm1667_vm13, %v3262_v49, %v1664_v20 }
0x1538   :  { %v1670_v19 = vmul.f32 %v1668_v21, %v1636_v54  ;;  %v3161_v21 = vld [vmem:[%s3545_s17] ss:$0 sm:$0xff] }
0x153a   :  { %v1675_v26 = vmul.f32 %v3157_v15, %v1670_v19 }
0x153c   :  { %v1680_v28 = vadd.f32 %v3158_v9, %v1675_v26  ;;  %v3162_v26 = vld [vmem:[%s3550_s9] ss:$0 sm:$0xff] }
0x153e   :  { %v1697_v30 = vpack.c.bf16 %v1680_v28, %v1679_v27 }
0x1540   :  { %2892 = vmatmul.msk.bf16.vlgmr.msra.gmra.mxu0 %vm171_vm0, %v1697_v30 }
0x15bd   :  { %v1725_v3 = vpop.f32.mrf.mxu0 }
0x15be   :  { %v1726_v29 = vadd.f32 %v3159_v41, %v1725_v3 }
0x15c0   :  { %v1730_v40 = vmax.f32 %v1726_v29, 0.0 }
0x15c5   :  { %v1727_v38 = vpop.f32.mrf.mxu0 }
0x15c6   :  { %v1728_v39 = vadd.f32 %v3159_v41, %v1727_v38 }
0x15c8   :  { %v1731_v10 = vmax.f32 %v1728_v39, 0.0 }
0x15ca   :  { %v1732_v11 = vpack.c.bf16 %v1731_v10, %v1730_v40 }
0x15cc   :  { %2909 = vmatmul.msk.bf16.vlgmr.msra.gmra.mxu1 %vm534_vm9, %v1732_v11 }
0x1649   :  { %v1772_v43 = vpop.f32.mrf.mxu1 }
0x164a   :  { %v1773_v44 = vadd.f32 %v3160_v42, %v1772_v43  ;;  %v3311_v43 = vld [vmem:[%s4053_s29] sm:$0xff] }
0x164c   :  { %v1777_v14 = vadd.f32 %v1773_v44, %v1679_v27 }
0x164e   :  { %v1779_v45 = vsel %vm171_vm0, %v1777_v14, 0.0 }
0x164f   :  { %1780 = vadd.xlane.f32.xlu2 %v1779_v45 }
0x1651   :  { %v1774_v46 = vpop.f32.mrf.mxu1 }
0x1652   :  { %v1775_v24 = vadd.f32 %v3160_v42, %v1774_v46 }
0x1654   :  { %v1778_v47 = vadd.f32 %v1775_v24, %v1680_v28 }
0x1656   :  { %v1782_v50 = vsel %vm171_vm0, %v1778_v47, 0.0 }
0x1657   :  { %1783 = vadd.xlane.f32.xlu2 %v1782_v50 }
0x16c2   :  { %v1781_v51 = vpop.xlane.xlu2 %1780 }
0x16c3   :  { %v1785_v17 = vmul.f32 %v1781_v51, %v3611_v33 }
0x16c5   :  { %v1787_v52 = vsub.f32 %v1777_v14, %v1785_v17 }
0x16c7   :  { %v1789_v53 = vmul.f32 %v1787_v52, %v1787_v52 }
0x16c9   :  { %v1791_v54 = vsel %vm171_vm0, %v1789_v53, 0.0 }
0x16ca   :  { %1792 = vadd.xlane.f32.xlu2 %v1791_v54  ;;  %v1784_v55 = vpop.xlane.xlu2 %1783 }
0x16cb   :  { %v1786_v56 = vmul.f32 %v1784_v55, %v3611_v33  ;;  %v3312_v55 = vld [vmem:[%s4053_s29 + $0x8] sm:$0xff] }
0x16cd   :  { %v1788_v18 = vsub.f32 %v1778_v47, %v1786_v56 }
0x16cf   :  { %v1790_v57 = vmul.f32 %v1788_v18, %v1788_v18 }
0x16d1   :  { %v1794_v58 = vsel %vm171_vm0, %v1790_v57, 0.0 }
0x16d2   :  { %1795 = vadd.xlane.f32.xlu2 %v1794_v58 }
0x173d   :  { %v1793_v60 = vpop.xlane.xlu2 %1792 }
0x173e   :  { %v1797_v61 = vmul.f32 %v1793_v60, %v3611_v33 }
0x1740   :  { %v1799_v62 = vadd.f32 1e-05, %v1797_v61 }
0x1742   :  { %3263 = vrsqrt.f32 %v1799_v62  ;;  %vm1807_vm15 = vweird.f32 %v1799_v62 }
0x1745   :  { %v1796_v0 = vpop.xlane.xlu2 %1795 }
0x1746   :  { %v1798_v1 = vmul.f32 %v1796_v0, %v3611_v33 }
0x1748   :  { %v3264_v4 = vpop.eup %3263  ;;  %v1800_v5 = vadd.f32 1e-05, %v1798_v1 }
0x1749   :  { %v1802_v23 = vmul.f32 %v3264_v4, %v1799_v62  ;;  %vm1808_vm14 = vweird.f32 %v3264_v4 }
0x174a   :  { %3265 = vrsqrt.f32 %v1800_v5  ;;  %vm1809_vm2 = vmor %vm1807_vm15, %vm1808_vm14  ;;  %vm1817_vm4 = vweird.f32 %v1800_v5 }
0x174b   :  { %v1803_v49 = vmul.f32 %v3264_v4, %v1802_v23 }
0x174d   :  { %v1804_v6 = vmul.f32 0.5, %v1803_v49 }
0x174f   :  { %v1805_v7 = vsub.f32 1.5, %v1804_v6 }
0x1750   :  { %v3266_v8 = vpop.eup %3265 }
0x1751   :  { %v1806_v25 = vmul.f32 %v3264_v4, %v1805_v7  ;;  %v1812_v12 = vmul.f32 %v3266_v8, %v1800_v5  ;;  %vm1818_vm3 = vweird.f32 %v3266_v8 }
0x1752   :  { %vm1819_vm5 = vmor %vm1817_vm4, %vm1818_vm3 }
0x1753   :  { %v1813_v13 = vmul.f32 %v3266_v8, %v1812_v12  ;;  %v1810_v15 = vsel %vm1809_vm2, %v3264_v4, %v1806_v25 }
0x1754   :  { %v1821_v9 = vmul.f32 %v1810_v15, %v1787_v52 }
0x1755   :  { %v1814_v16 = vmul.f32 0.5, %v1813_v13 }
0x1756   :  { %v1826_v27 = vmul.f32 %v3161_v21, %v1821_v9 }
0x1757   :  { %v1815_v20 = vsub.f32 1.5, %v1814_v16  ;;  %v3085_v16 = vld [vmem:[%s4056_s14 + $0x18] sm:$0xff] }
0x1758   :  { %v3877_v31 = vadd.f32 %v3162_v26, %v1826_v27 }
0x1759   :  { %v1816_v22 = vmul.f32 %v3266_v8, %v1815_v20  ;;  %v3084_v20 = vld [vmem:[%s4056_s14 + $0x10] sm:$0xff] }
0x175b   :  { %v1820_v19 = vsel %vm1819_vm5, %v3266_v8, %v1816_v22 }
0x175c   :  { %v1822_v28 = vmul.f32 %v1820_v19, %v1788_v18 }
0x175e   :  { %v1827_v30 = vmul.f32 %v3161_v21, %v1822_v28 }
0x1760   :  { %v3879_v32 = vadd.f32 %v3162_v26, %v1827_v30 }
0x1762   :  { %v1833_v2 = vpack.c.bf16 %v3879_v32, %v3877_v31 }
0x1764   :  { %2922 = vmatmul.msk.bf16.vlgmr.msra.gmra.mxu3 %vm171_vm0, %v1833_v2 }
0x17e7   :  { %v1863_v36 = vpop.f32.mrf.mxu3 }
0x17ef   :  { %v1865_v3 = vpop.f32.mrf.mxu3 }
0x17f0   :  { %v3884_v41 = vpack.c.bf16 %v1865_v3, %v1863_v36 }
0x17f2   :  { %1951 = vrot.lane.b32.xlu1 %v3884_v41, %s3373_s0  ;;  %1881 = vrot.lane.b32.xlu0 %v3884_v41, %s3374_s15 }
0x17f3   :  { %1953 = vrot.lane.b32.xlu2 %v3884_v41, %s3375_s5 }
0x184d   :  { %v1954_v29 = vpop.permute.xlu2 %1953 }
0x184e   :  { %v1959_v38 = vsel %vm200_vm1, %v1954_v29, 0 }
0x184f   :  { %1968 = vmatpush.bf16.xpose.msrb.mxu1 %v1959_v38 }
0x1864   :  { %v1952_v39 = vpop.permute.xlu1 %1951  ;;  %v1882_v40 = vpop.permute.xlu0 %1881 }
0x1865   :  { %v1887_v10 = vsel %vm200_vm1, %v1882_v40, 0  ;;  %2932 = vmatmul.msk.bf16.vlgmr.msrb.gmra.mxu1 %vm200_vm1, %v1952_v39  ;;  %v3081_v40 = vld [vmem:[%s4054_s3 + $0x18] sm:$0xff] }
0x1866   :  { %1896 = vmatpush.bf16.xpose.msrb.mxu2 %v1887_v10  ;;  %v3080_v10 = vld [vmem:[%s4054_s3 + $0x10] sm:$0xff] }
0x186d   :  { %2930 = vmatmul.msk.bf16.vlgmr.msrb.gmra.mxu2 %vm200_vm1, %v3884_v41 }
0x186e   :  { %2039 = vmatpush.bf16.msra.mxu2 %v3081_v40  ;;  %v3165_v40 = vld [vmem:[%s4059_s30 + $0x1] ss:$0 sm:$0xff] }
0x18e2   :  { %v1970_v11 = vpop.f32.mrf.mxu1 }
0x18e3   :  { %v1975_v42 = vmul.f32 0.25, %v1970_v11  ;;  %v3083_v11 = vld [vmem:[%s4057_s19 + $0x18] sm:$0xff] }
0x18e4   :  { %2157 = vmatpush.bf16.msra.mxu1 %v3083_v11 }
0x18e5   :  { %v1977_v44 = vadd.f32 %v3311_v43, %v1975_v42 }
0x18e7   :  { %v1979_v14 = vsel %vm200_vm1, %v1977_v44, -inf }
0x18e8   :  { %1980 = vmax.xlane.f32.xlu2 %v1979_v14 }
0x18ea   :  { %v1972_v45 = vpop.f32.mrf.mxu1 }
0x18eb   :  { %v1976_v46 = vmul.f32 0.25, %v1972_v45 }
0x18ed   :  { %v1978_v24 = vadd.f32 %v1976_v46, %v3724_v34 }
0x18ef   :  { %v1982_v47 = vsel %vm200_vm1, %v1978_v24, -inf }
0x18f0   :  { %v1898_v50 = vpop.f32.mrf.mxu2  ;;  %1983 = vmax.xlane.f32.xlu0 %v1982_v47 }
0x18f1   :  { %v1903_v51 = vmul.f32 0.25, %v1898_v50 }
0x18f3   :  { %v1905_v17 = vadd.f32 %v3311_v43, %v1903_v51  ;;  %v3082_v51 = vld [vmem:[%s4057_s19 + $0x10] sm:$0xff] }
0x18f4   :  { %2158 = vmatpush.bf16.msra.mxu1 %v3082_v51 }
0x18f5   :  { %v1907_v52 = vsel %vm200_vm1, %v1905_v17, -inf }
0x18f6   :  { %1908 = vmax.xlane.f32.xlu1 %v1907_v52 }
0x18f8   :  { %v1900_v53 = vpop.f32.mrf.mxu2 }
0x18f9   :  { %v1904_v54 = vmul.f32 0.25, %v1900_v53 }
0x18fb   :  { %v1906_v56 = vadd.f32 %v3312_v55, %v1904_v54  ;;  %v3163_v54 = vld [vmem:[%s4055_s8 + $0x1] ss:$0 sm:$0xff] }
0x18fd   :  { %v1910_v18 = vsel %vm200_vm1, %v1906_v56, -inf }
0x18fe   :  { %1911 = vmax.xlane.f32.xlu2 %v1910_v18 }
0x190f   :  { %2002 = vrot.lane.b32.xlu1 %v3884_v41, %s3376_s16 }
0x195b   :  { %v1981_v34 = vpop.xlane.xlu2 %1980 }
0x195c   :  { %v1985_v57 = vsub.f32 %v1977_v44, %v1981_v34 }
0x195e   :  { %v1987_v58 = vmul.f32 1.442695, %v1985_v57 }
0x1960   :  { %3267 = vpow2.f32 %v1987_v58 }
0x1963   :  { %v1984_v59 = vpop.xlane.xlu0 %1983 }
0x1964   :  { %v1986_v60 = vsub.f32 %v1978_v24, %v1984_v59 }
0x1966   :  { %v3268_v61 = vpop.eup %3267  ;;  %v1989_v62 = vmul.f32 1.442695, %v1986_v60 }
0x1967   :  { %v1991_v63 = vsel %vm200_vm1, %v3268_v61, 0.0 }
0x1968   :  { %3269 = vpow2.f32 %v1989_v62  ;;  %1992 = vadd.xlane.f32.xlu0 %v1991_v63 }
0x1969   :  { %v1909_v0 = vpop.xlane.xlu1 %1908 }
0x196a   :  { %v1913_v1 = vsub.f32 %v1905_v17, %v1909_v0 }
0x196c   :  { %v1915_v4 = vmul.f32 1.442695, %v1913_v1 }
0x196e   :  { %v3270_v5 = vpop.eup %3269  ;;  %3271 = vpow2.f32 %v1915_v4 }
0x196f   :  { %v1994_v23 = vsel %vm200_vm1, %v3270_v5, 0.0 }
0x1970   :  { %1995 = vadd.xlane.f32.xlu2 %v1994_v23 }
0x1971   :  { %v1912_v49 = vpop.xlane.xlu2 %1911 }
0x1972   :  { %v1914_v6 = vsub.f32 %v1906_v56, %v1912_v49 }
0x1974   :  { %v3272_v7 = vpop.eup %3271  ;;  %v1917_v8 = vmul.f32 1.442695, %v1914_v6 }
0x1975   :  { %v1919_v25 = vsel %vm200_vm1, %v3272_v7, 0.0 }
0x1976   :  { %3273 = vpow2.f32 %v1917_v8  ;;  %1920 = vadd.xlane.f32.xlu0 %v1919_v25 }
0x197c   :  { %v3274_v12 = vpop.eup %3273 }
0x197d   :  { %v1922_v13 = vsel %vm200_vm1, %v3274_v12, 0.0 }
0x197e   :  { %1923 = vadd.xlane.f32.xlu2 %v1922_v13 }
0x1981   :  { %v2003_v15 = vpop.permute.xlu1 %2002 }
0x1982   :  { %2015 = vmatpush.bf16.msrb.mxu3 %v2003_v15 }
0x1986   :  { %2188 = vmatpush.bf16.msra.mxu3 %v3085_v16 }
0x198a   :  { %1930 = vrot.lane.b32.xlu0 %v3884_v41, %s3377_s13  ;;  %2189 = vmatpush.bf16.msra.mxu3 %v3084_v20 }
0x19db   :  { %v1993_v21 = vpop.xlane.xlu0 %1992 }
0x19dc   :  { %3275 = vrcp.f32 %v1993_v21 }
0x19e2   :  { %v3276_v22 = vpop.eup %3275 }
0x19e3   :  { %v1996_v9 = vpop.xlane.xlu2 %1995  ;;  %v1999_v26 = vmul.f32 %v3276_v22, %v3268_v61 }
0x19e4   :  { %3277 = vrcp.f32 %v1996_v9 }
0x19e9   :  { %v1921_v30 = vpop.xlane.xlu0 %1920 }
0x19ea   :  { %v3278_v19 = vpop.eup %3277 }
0x19eb   :  { %v2000_v27 = vmul.f32 %v3278_v19, %v3270_v5 }
0x19ed   :  { %v2001_v28 = vpack.c.bf16 %v2000_v27, %v1999_v26 }
0x19ef   :  { %2933 = vmatmul.msk.bf16.vlgmr.msrb.gmra.mxu3 %vm200_vm1, %v2001_v28 }
0x19f1   :  { %v1924_v2 = vpop.xlane.xlu2 %1923 }
0x19f2   :  { %3279 = vrcp.f32 %v1924_v2 }
0x19f3   :  { %3281 = vrcp.f32 %v1921_v30 }
0x19f8   :  { %v3280_v36 = vpop.eup %3279 }
0x19f9   :  { %v3282_v3 = vpop.eup %3281  ;;  %v1928_v41 = vmul.f32 %v3280_v36, %v3274_v12 }
0x19fa   :  { %v1927_v29 = vmul.f32 %v3282_v3, %v3272_v7 }
0x19fc   :  { %v1931_v38 = vpop.permute.xlu0 %1930  ;;  %v1929_v39 = vpack.c.bf16 %v1928_v41, %v1927_v29  ;;  %v3164_v41 = vld [vmem:[%s4058_s24 + $0x1] ss:$0 sm:$0xff] }
0x19fd   :  { %1943 = vmatpush.bf16.msrb.mxu0 %v1931_v38 }
0x19ff   :  { %2969 = vmatmul.msk.bf16.vlgmr.msra.gmra.mxu3 %vm171_vm0, %v3785_v48 }
0x1a00   :  { %2931 = vmatmul.msk.bf16.vlgmr.msrb.gmra.mxu0 %vm200_vm1, %v1929_v39 }
0x1a01   :  { %2062 = vmatpush.bf16.msra.mxu0 %v3080_v10 }
0x1a72   :  { %v2017_v42 = vpop.f32.mrf.mxu3 }
0x1a7a   :  { %v2019_v43 = vpop.f32.mrf.mxu3 }
0x1a7b   :  { %v2022_v44 = vpack.c.bf16 %v2019_v43, %v2017_v42 }
0x1a7d   :  { %v1945_v14 = vpop.f32.mrf.mxu0  ;;  %2938 = vmatmul.msk.bf16.vlgmr.msra.gmra.mxu2 %vm200_vm1, %v2022_v44 }
0x1a82   :  { %v2191_v45 = vpop.f32.mrf.mxu3 }
0x1a85   :  { %v1947_v46 = vpop.f32.mrf.mxu0 }
0x1a86   :  { %v1950_v24 = vpack.c.bf16 %v1947_v46, %v1945_v14 }
0x1a88   :  { %2943 = vmatmul.msk.bf16.vlgmr.msra.gmra.mxu0 %vm200_vm1, %v1950_v24 }
0x1a8a   :  { %v2193_v48 = vpop.f32.mrf.mxu3 }
0x1a8b   :  { %v3923_v47 = vpack.c.bf16 %v2193_v48, %v2191_v45 }
0x1a8d   :  { %2281 = vrot.lane.b32.xlu0 %v3923_v47, %s3373_s0  ;;  %v2213_v50 = vsel %vm200_vm1, %v3923_v47, 0 }
0x1a8e   :  { %2222 = vmatpush.bf16.xpose.msrb.mxu2 %v2213_v50 }
0x1aff   :  { %v2282_v17 = vpop.permute.xlu0 %2281 }
0x1b00   :  { %v2287_v52 = vsel %vm200_vm1, %v2282_v17, 0  ;;  %v2041_v53 = vpop.f32.mrf.mxu2 }
0x1b01   :  { %2296 = vmatpush.bf16.xpose.msrb.mxu1 %v2287_v52 }
0x1b05   :  { %v2064_v55 = vpop.f32.mrf.mxu0 }
0x1b06   :  { %v2065_v56 = vadd.f32 %v2064_v55, %v2041_v53 }
0x1b08   :  { %v2072_v18 = vadd.f32 %v3163_v54, %v2065_v56  ;;  %v2043_v58 = vpop.f32.mrf.mxu2 }
0x1b0a   :  { %v2074_v34 = vadd.f32 %v2072_v18, %v3877_v31 }
0x1b0c   :  { %v2076_v57 = vsel %vm171_vm0, %v2074_v34, 0.0 }
0x1b0d   :  { %v2066_v59 = vpop.f32.mrf.mxu0  ;;  %2077 = vadd.xlane.f32.xlu2 %v2076_v57 }
0x1b0e   :  { %v2067_v60 = vadd.f32 %v2066_v59, %v2043_v58 }
0x1b10   :  { %v2073_v61 = vadd.f32 %v3163_v54, %v2067_v60 }
0x1b12   :  { %v2075_v62 = vadd.f32 %v2073_v61, %v3879_v32 }
0x1b14   :  { %v2079_v63 = vsel %vm171_vm0, %v2075_v62, 0.0 }
0x1b15   :  { %2080 = vadd.xlane.f32.xlu2 %v2079_v63 }
0x1b80   :  { %v2078_v0 = vpop.xlane.xlu2 %2077 }
0x1b81   :  { %v2082_v1 = vmul.f32 %v2078_v0, %v3611_v33 }
0x1b83   :  { %v2084_v4 = vsub.f32 %v2074_v34, %v2082_v1 }
0x1b85   :  { %v2086_v5 = vmul.f32 %v2084_v4, %v2084_v4 }
0x1b87   :  { %v2088_v23 = vsel %vm171_vm0, %v2086_v5, 0.0 }
0x1b88   :  { %2089 = vadd.xlane.f32.xlu1 %v2088_v23  ;;  %v2081_v31 = vpop.xlane.xlu2 %2080 }
0x1b89   :  { %v2083_v49 = vmul.f32 %v2081_v31, %v3611_v33 }
0x1b8b   :  { %v2085_v6 = vsub.f32 %v2075_v62, %v2083_v49 }
0x1b8d   :  { %v2087_v7 = vmul.f32 %v2085_v6, %v2085_v6 }
0x1b8f   :  { %v2091_v8 = vsel %vm171_vm0, %v2087_v7, 0.0 }
0x1b90   :  { %2092 = vadd.xlane.f32.xlu2 %v2091_v8 }
0x1bfb   :  { %v2090_v32 = vpop.xlane.xlu1 %2089 }
0x1bfc   :  { %v2094_v25 = vmul.f32 %v2090_v32, %v3611_v33 }
0x1bfe   :  { %v2096_v12 = vadd.f32 1e-05, %v2094_v25 }
0x1c00   :  { %3283 = vrsqrt.f32 %v2096_v12  ;;  %vm2104_vm7 = vweird.f32 %v2096_v12 }
0x1c03   :  { %v2093_v13 = vpop.xlane.xlu2 %2092 }
0x1c04   :  { %v2095_v15 = vmul.f32 %v2093_v13, %v3611_v33 }
0x1c06   :  { %v3284_v16 = vpop.eup %3283  ;;  %v2097_v20 = vadd.f32 1e-05, %v2095_v15 }
0x1c07   :  { %v2099_v21 = vmul.f32 %v3284_v16, %v2096_v12  ;;  %vm2105_vm6 = vweird.f32 %v3284_v16 }
0x1c08   :  { %3285 = vrsqrt.f32 %v2097_v20  ;;  %vm2106_vm8 = vmor %vm2104_vm7, %vm2105_vm6  ;;  %vm2114_vm11 = vweird.f32 %v2097_v20 }
0x1c09   :  { %v2100_v9 = vmul.f32 %v3284_v16, %v2099_v21 }
0x1c0b   :  { %v2101_v22 = vmul.f32 0.5, %v2100_v9 }
0x1c0d   :  { %v2102_v19 = vsub.f32 1.5, %v2101_v22 }
0x1c0e   :  { %v3286_v26 = vpop.eup %3285 }
0x1c0f   :  { %v2103_v27 = vmul.f32 %v3284_v16, %v2102_v19  ;;  %v2109_v28 = vmul.f32 %v3286_v26, %v2097_v20  ;;  %vm2115_vm10 = vweird.f32 %v3286_v26 }
0x1c10   :  { %vm2116_vm12 = vmor %vm2114_vm11, %vm2115_vm10 }
0x1c11   :  { %v2110_v30 = vmul.f32 %v3286_v26, %v2109_v28  ;;  %v2107_v2 = vsel %vm2106_vm8, %v3284_v16, %v2103_v27 }
0x1c12   :  { %v2118_v29 = vmul.f32 %v2107_v2, %v2084_v4 }
0x1c13   :  { %v2111_v36 = vmul.f32 0.5, %v2110_v30 }
0x1c14   :  { %v2123_v10 = vmul.f32 %v3164_v41, %v2118_v29 }
0x1c15   :  { %v2112_v3 = vsub.f32 1.5, %v2111_v36 }
0x1c16   :  { %v3944_v43 = vadd.f32 %v3165_v40, %v2123_v10  ;;  %v3086_v10 = vld [vmem:[%s4061_s12 + $0x10] sm:$0xff] }
0x1c17   :  { %v2113_v38 = vmul.f32 %v3286_v26, %v2112_v3 }
0x1c19   :  { %v2117_v39 = vsel %vm2116_vm12, %v3286_v26, %v2113_v38 }
0x1c1a   :  { %v2119_v11 = vmul.f32 %v2117_v39, %v2085_v6 }
0x1c1c   :  { %v2124_v42 = vmul.f32 %v3164_v41, %v2119_v11 }
0x1c1e   :  { %v3946_v44 = vadd.f32 %v3165_v40, %v2124_v42  ;;  %v3087_v40 = vld [vmem:[%s4061_s12 + $0x18] sm:$0xff] }
0x1c1f   :  { %2367 = vmatpush.bf16.msra.mxu2 %v3087_v40  ;;  %v3092_v40 = vld [vmem:[%s4066_s26 + $0x30] sm:$0xff] }
0x1c20   :  { %v2130_v14 = vpack.c.bf16 %v3946_v44, %v3944_v43 }
0x1c22   :  { %2956 = vmatmul.msk.bf16.vlgmr.msra.gmra.mxu1 %vm171_vm0, %v2130_v14 }
0x1c9f   :  { %v2160_v45 = vpop.f32.mrf.mxu1 }
0x1ca7   :  { %v2162_v46 = vpop.f32.mrf.mxu1 }
0x1ca8   :  { %v2207_v24 = vpack.c.bf16 %v2162_v46, %v2160_v45 }
0x1caa   :  { %2279 = vrot.lane.b32.xlu2 %v2207_v24, %s3373_s0  ;;  %2977 = vmatmul.msk.bf16.vlgmr.msrb.gmra.mxu2 %vm200_vm1, %v2207_v24 }
0x1d04   :  { %v2280_v48 = vpop.permute.xlu2 %2279 }
0x1d05   :  { %2979 = vmatmul.msk.bf16.vlgmr.msrb.gmra.mxu1 %vm200_vm1, %v2280_v48 }
0x1d2d   :  { %v2224_v50 = vpop.f32.mrf.mxu2 }
0x1d2e   :  { %v2229_v51 = vmul.f32 0.25, %v2224_v50  ;;  %v3166_v50 = vld [vmem:[%s4062_s20 + $0x1] ss:$0 sm:$0xff] }
0x1d30   :  { %v2231_v17 = vadd.f32 %v2229_v51, %v3815_v35 }
0x1d32   :  { %v2233_v52 = vsel %vm200_vm1, %v2231_v17, -inf }
0x1d33   :  { %2234 = vmax.xlane.f32.xlu1 %v2233_v52 }
0x1d35   :  { %v2226_v53 = vpop.f32.mrf.mxu2 }
0x1d36   :  { %v2230_v54 = vmul.f32 0.25, %v2226_v53 }
0x1d38   :  { %v2232_v55 = vadd.f32 %v2230_v54, %v3820_v37 }
0x1d3a   :  { %v2236_v56 = vsel %vm200_vm1, %v2232_v55, -inf }
0x1d3b   :  { %2237 = vmax.xlane.f32.xlu1 %v2236_v56 }
0x1d82   :  { %v2298_v18 = vpop.f32.mrf.mxu1 }
0x1d83   :  { %v2303_v34 = vmul.f32 0.25, %v2298_v18 }
0x1d85   :  { %v2305_v57 = vadd.f32 %v2303_v34, %v3815_v35 }
0x1d87   :  { %v2307_v58 = vsel %vm200_vm1, %v2305_v57, -inf }
0x1d88   :  { %2308 = vmax.xlane.f32.xlu0 %v2307_v58 }
0x1d8a   :  { %v2300_v59 = vpop.f32.mrf.mxu1 }
0x1d8b   :  { %v2304_v60 = vmul.f32 0.25, %v2300_v59 }
0x1d8d   :  { %v2306_v61 = vadd.f32 %v2304_v60, %v3820_v37 }
0x1d8f   :  { %v2310_v62 = vsel %vm200_vm1, %v2306_v61, -inf }
0x1d90   :  { %2311 = vmax.xlane.f32.xlu2 %v2310_v62 }
0x1da6   :  { %v2235_v4 = vpop.xlane.xlu1 %2234 }
0x1da7   :  { %v2239_v31 = vsub.f32 %v2231_v17, %v2235_v4 }
0x1da8   :  { %2257 = vrot.lane.b32.xlu2 %v3923_v47, %s3374_s15 }
0x1da9   :  { %v2241_v37 = vmul.f32 1.442695, %v2239_v31 }
0x1dae   :  { %v2238_v7 = vpop.xlane.xlu1 %2237 }
0x1daf   :  { %v2240_v25 = vsub.f32 %v2232_v55, %v2238_v7 }
0x1db1   :  { %v2243_v13 = vmul.f32 1.442695, %v2240_v25 }
0x1dfb   :  { %v2309_v63 = vpop.xlane.xlu0 %2308 }
0x1dfc   :  { %v2313_v0 = vsub.f32 %v2305_v57, %v2309_v63 }
0x1dfe   :  { %v2315_v1 = vmul.f32 1.442695, %v2313_v0 }
0x1e00   :  { %3287 = vpow2.f32 %v2315_v1 }
0x1e03   :  { %v2312_v5 = vpop.xlane.xlu2 %2311 }
0x1e04   :  { %v2314_v35 = vsub.f32 %v2306_v61, %v2312_v5 }
0x1e06   :  { %v3288_v23 = vpop.eup %3287  ;;  %v2317_v49 = vmul.f32 1.442695, %v2314_v35 }
0x1e07   :  { %v2319_v6 = vsel %vm200_vm1, %v3288_v23, 0.0 }
0x1e08   :  { %3289 = vpow2.f32 %v2317_v49  ;;  %2320 = vadd.xlane.f32.xlu0 %v2319_v6  ;;  %v3088_v49 = vld [vmem:[%s4063_s18 + $0x10] sm:$0xff] }
0x1e09   :  { %3291 = vpow2.f32 %v2241_v37 }
0x1e0a   :  { %3293 = vpow2.f32 %v2243_v13 }
0x1e0b   :  { %v2258_v8 = vpop.permute.xlu2 %2257 }
0x1e0c   :  { %2270 = vmatpush.bf16.msrb.mxu0 %v2258_v8 }
0x1e0e   :  { %v3290_v32 = vpop.eup %3289 }
0x1e0f   :  { %v2322_v12 = vsel %vm200_vm1, %v3290_v32, 0.0  ;;  %v3292_v15 = vpop.eup %3291 }
0x1e10   :  { %2323 = vadd.xlane.f32.xlu1 %v2322_v12  ;;  %v2245_v16 = vsel %vm200_vm1, %v3292_v15, 0.0  ;;  %v3294_v20 = vpop.eup %3293  ;;  %2390 = vmatpush.bf16.msra.mxu0 %v3086_v10  ;;  %v3091_v10 = vld [vmem:[%s4066_s26 + $0x28] sm:$0xff] }
0x1e11   :  { %v2248_v21 = vsel %vm200_vm1, %v3294_v20, 0.0 }
0x1e18   :  { %2246 = vadd.xlane.f32.xlu1 %v2245_v16 }
0x1e1c   :  { %2330 = vrot.lane.b32.xlu0 %v3923_v47, %s3375_s5 }
0x1e20   :  { %2249 = vadd.xlane.f32.xlu1 %v2248_v21 }
0x1e7b   :  { %v2321_v9 = vpop.xlane.xlu0 %2320 }
0x1e83   :  { %v2324_v22 = vpop.xlane.xlu1 %2323 }
0x1e84   :  { %3295 = vrcp.f32 %v2324_v22 }
0x1e85   :  { %3297 = vrcp.f32 %v2321_v9 }
0x1e8a   :  { %v3296_v19 = vpop.eup %3295 }
0x1e8b   :  { %v3298_v26 = vpop.eup %3297  ;;  %v2247_v27 = vpop.xlane.xlu1 %2246  ;;  %v2328_v28 = vmul.f32 %v3296_v19, %v3290_v32 }
0x1e8c   :  { %v2327_v30 = vmul.f32 %v3298_v26, %v3288_v23  ;;  %3299 = vrcp.f32 %v2247_v27  ;;  %v3167_v26 = vld [vmem:[%s4064_s22 + $0x1] ss:$0 sm:$0xff] }
0x1e8e   :  { %v2331_v2 = vpop.permute.xlu0 %2330  ;;  %v2329_v36 = vpack.c.bf16 %v2328_v28, %v2327_v30 }
0x1e8f   :  { %2343 = vmatpush.bf16.msrb.mxu3 %v2331_v2  ;;  %v3168_v2 = vld [vmem:[%s4065_s23 + $0x1] ss:$0 sm:$0xff] }
0x1e92   :  { %2980 = vmatmul.msk.bf16.vlgmr.msrb.gmra.mxu3 %vm200_vm1, %v2329_v36  ;;  %v3300_v3 = vpop.eup %3299 }
0x1e93   :  { %v2250_v47 = vpop.xlane.xlu1 %2249  ;;  %v2253_v29 = vmul.f32 %v3300_v3, %v3292_v15 }
0x1e94   :  { %3301 = vrcp.f32 %v2250_v47 }
0x1e9a   :  { %v3302_v41 = vpop.eup %3301 }
0x1e9b   :  { %v2254_v38 = vmul.f32 %v3302_v41, %v3294_v20 }
0x1e9d   :  { %v2255_v39 = vpack.c.bf16 %v2254_v38, %v2253_v29 }
0x1e9f   :  { %2978 = vmatmul.msk.bf16.vlgmr.msrb.gmra.mxu0 %vm200_vm1, %v2255_v39  ;;  %v3093_v39 = vld [vmem:[%s4066_s26 + $0x38] sm:$0xff] }
0x1ea0   :  { %2550 = vmatpush.bf16.msra.mxu3 %v3093_v39 }
0x1ea4   :  { %2551 = vmatpush.bf16.msra.mxu3 %v3092_v40 }
0x1ea8   :  { %2552 = vmatpush.bf16.msra.mxu3 %v3091_v10 }
0x1f15   :  { %v2345_v11 = vpop.f32.mrf.mxu3 }
0x1f1c   :  { %v2272_v42 = vpop.f32.mrf.mxu0 }
0x1f1d   :  { %v2347_v14 = vpop.f32.mrf.mxu3 }
0x1f1e   :  { %v2350_v45 = vpack.c.bf16 %v2347_v14, %v2345_v11  ;;  %v3090_v11 = vld [vmem:[%s4066_s26 + $0x20] sm:$0xff] }
0x1f1f   :  { %2553 = vmatpush.bf16.msra.mxu3 %v3090_v11  ;;  %v3169_v14 = vld [vmem:[%s4067_s28 + $0x1] ss:$0 sm:$0xff] }
0x1f20   :  { %2985 = vmatmul.msk.bf16.vlgmr.msra.gmra.mxu2 %vm200_vm1, %v2350_v45 }
0x1f24   :  { %v2274_v46 = vpop.f32.mrf.mxu0 }
0x1f25   :  { %v2277_v24 = vpack.c.bf16 %v2274_v46, %v2272_v42 }
0x1f27   :  { %2990 = vmatmul.msk.bf16.vlgmr.msra.gmra.mxu0 %vm200_vm1, %v2277_v24 }
0x1fa3   :  { %v2369_v48 = vpop.f32.mrf.mxu2 }
0x1fa4   :  { %v2392_v51 = vpop.f32.mrf.mxu0 }
0x1fa5   :  { %v2393_v17 = vadd.f32 %v2392_v51, %v2369_v48 }
0x1fa7   :  { %v2400_v52 = vadd.f32 %v3166_v50, %v2393_v17  ;;  %v3170_v17 = vld [vmem:[%s4068_s1 + $0x1] ss:$0 sm:$0xff] }
0x1fa9   :  { %v2402_v53 = vadd.f32 %v2400_v52, %v3944_v43 }
0x1fab   :  { %v2371_v54 = vpop.f32.mrf.mxu2  ;;  %v2404_v55 = vsel %vm171_vm0, %v2402_v53, 0.0 }
0x1fac   :  { %v2394_v56 = vpop.f32.mrf.mxu0  ;;  %2405 = vadd.xlane.f32.xlu1 %v2404_v55 }
0x1fad   :  { %v2395_v18 = vadd.f32 %v2394_v56, %v2371_v54 }
0x1faf   :  { %v2401_v34 = vadd.f32 %v3166_v50, %v2395_v18 }
0x1fb1   :  { %v2403_v57 = vadd.f32 %v2401_v34, %v3946_v44  ;;  %v3089_v44 = vld [vmem:[%s4063_s18 + $0x18] sm:$0xff] }
0x1fb2   :  { %2505 = vmatpush.bf16.msra.mxu1 %v3089_v44 }
0x1fb3   :  { %v2407_v58 = vsel %vm171_vm0, %v2403_v57, 0.0 }
0x1fb4   :  { %2408 = vadd.xlane.f32.xlu0 %v2407_v58 }
0x1fb6   :  { %2506 = vmatpush.bf16.msra.mxu1 %v3088_v49 }
0x201f   :  { %v2406_v59 = vpop.xlane.xlu1 %2405 }
0x2020   :  { %v2410_v60 = vmul.f32 %v2406_v59, %v3611_v33 }
0x2022   :  { %v2412_v61 = vsub.f32 %v2402_v53, %v2410_v60 }
0x2024   :  { %v2414_v62 = vmul.f32 %v2412_v61, %v2412_v61 }
0x2026   :  { %v2416_v43 = vsel %vm171_vm0, %v2414_v62, 0.0 }
0x2027   :  { %v2409_v63 = vpop.xlane.xlu0 %2408  ;;  %2417 = vadd.xlane.f32.xlu1 %v2416_v43 }
0x2028   :  { %v2411_v0 = vmul.f32 %v2409_v63, %v3611_v33 }
0x202a   :  { %v2413_v1 = vsub.f32 %v2403_v57, %v2411_v0 }
0x202c   :  { %v2415_v4 = vmul.f32 %v2413_v1, %v2413_v1 }
0x202e   :  { %v2419_v5 = vsel %vm171_vm0, %v2415_v4, 0.0 }
0x202f   :  { %2420 = vadd.xlane.f32.xlu1 %v2419_v5  ;;  %v3095_v5 = vld [vmem:[%s3555_s4 + $0x8] sm:$0xff] }
0x2030   :  { %2642 = vmatpush.bf16.msrb.mxu2 %v3095_v5 }
0x209a   :  { %v2418_v35 = vpop.xlane.xlu1 %2417 }
0x209b   :  { %v2422_v23 = vmul.f32 %v2418_v35, %v3611_v33 }
0x209d   :  { %v2424_v31 = vadd.f32 1e-05, %v2422_v23 }
0x209f   :  { %3303 = vrsqrt.f32 %v2424_v31  ;;  %vm2432_vm14 = vweird.f32 %v2424_v31 }
0x20a2   :  { %v2421_v6 = vpop.xlane.xlu1 %2420 }
0x20a3   :  { %v2423_v37 = vmul.f32 %v2421_v6, %v3611_v33 }
0x20a5   :  { %v3304_v7 = vpop.eup %3303  ;;  %v2425_v8 = vadd.f32 1e-05, %v2423_v37 }
0x20a6   :  { %v2427_v32 = vmul.f32 %v3304_v7, %v2424_v31  ;;  %vm2433_vm13 = vweird.f32 %v3304_v7  ;;  %v3094_v31 = vld [vmem:[%s3555_s4] sm:$0xff]  ;;  %s2658_s4 = sshll.u32 %s3560_s21, 4  ;;  %s2659_s4 = int_to_ptr.hbm [resolvable:$true] %s2658_s4 }
0x20a7   :  { %3305 = vrsqrt.f32 %v2425_v8  ;;  %vm2434_vm15 = vmor %vm2432_vm14, %vm2433_vm13  ;;  %vm2442_vm3 = vweird.f32 %v2425_v8  ;;  %2643 = vmatpush.bf16.msrb.mxu2 %v3094_v31 }
0x20a8   :  { %v2428_v25 = vmul.f32 %v3304_v7, %v2427_v32 }
0x20aa   :  { %v2429_v12 = vmul.f32 0.5, %v2428_v25 }
0x20ac   :  { %v2430_v13 = vsub.f32 1.5, %v2429_v12 }
0x20ad   :  { %v3306_v15 = vpop.eup %3305 }
0x20ae   :  { %v2431_v16 = vmul.f32 %v3304_v7, %v2430_v13  ;;  %v2437_v20 = vmul.f32 %v3306_v15, %v2425_v8  ;;  %vm2443_vm2 = vweird.f32 %v3306_v15 }
0x20af   :  { %vm2444_vm4 = vmor %vm2442_vm3, %vm2443_vm2 }
0x20b0   :  { %v2438_v21 = vmul.f32 %v3306_v15, %v2437_v20  ;;  %v2435_v9 = vsel %vm2434_vm15, %v3304_v7, %v2431_v16 }
0x20b1   :  { %v2446_v27 = vmul.f32 %v2435_v9, %v2412_v61 }
0x20b2   :  { %v2439_v22 = vmul.f32 0.5, %v2438_v21 }
0x20b3   :  { %v2451_v36 = vmul.f32 %v3167_v26, %v2446_v27 }
0x20b4   :  { %v2440_v19 = vsub.f32 1.5, %v2439_v22 }
0x20b5   :  { %v2456_v41 = vadd.f32 %v3168_v2, %v2451_v36 }
0x20b6   :  { %v2441_v28 = vmul.f32 %v3306_v15, %v2440_v19 }
0x20b8   :  { %v2445_v30 = vsel %vm2444_vm4, %v3306_v15, %v2441_v28  ;;  %v3172_v28 = vld [vmem:[%s3550_s9 + $0x1] ss:$0 sm:$0xff]  ;;  %s3325_s9 = sshra.s32 %s2659_s4, 4  ;;  %s3326_s9 = int_to_ptr.hbm [resolvable:$true] %s3325_s9 }
0x20b9   :  { %v2447_v47 = vmul.f32 %v2445_v30, %v2413_v1  ;;  %s3327_s2 = scalar_lea.hbm %s3326_s9, 16  ;;  %p3330_p1 = scmp.lt.s32.totalorder %s3326_s9, %s3560_s21 }
0x20ba   :  { %p3328_p0 = scmp.ne.s32.totalorder %s3326_s9, %s3327_s2  ;;  %p3331_p2 = scmp.lt.s32.totalorder %s3329_s7, %s3327_s2 }
0x20bb   :  { %v2452_v3 = vmul.f32 %v3167_v26, %v2447_v47 }
0x20bc   :  { %p3332_p3 = por %p3331_p2, %p3330_p1 }
0x20bd   :  { %v2457_v29 = vadd.f32 %v3168_v2, %v2452_v3 }
0x20be   :  { %p3333_p4 = pnand %p3332_p3, %p3328_p0 }
0x20bf   :  { %v2480_v38 = vpack.c.bf16 %v2457_v29, %v2456_v41 }
0x20c1   :  { %3015 = vmatmul.msk.bf16.vlgmr.msra.gmra.mxu1 %vm171_vm0, %v2480_v38 }
0x213e   :  { %v2508_v42 = vpop.f32.mrf.mxu1 }
0x213f   :  { %v2509_v45 = vadd.f32 %v3169_v14, %v2508_v42 }
0x2141   :  { %v2513_v48 = vmax.f32 %v2509_v45, 0.0 }
0x2146   :  { %v2510_v46 = vpop.f32.mrf.mxu1 }
0x2147   :  { %v2511_v24 = vadd.f32 %v3169_v14, %v2510_v46 }
0x2149   :  { %v2514_v50 = vmax.f32 %v2511_v24, 0.0 }
0x214b   :  { %v2515_v51 = vpack.c.bf16 %v2514_v50, %v2513_v48 }
0x214d   :  { %3032 = vmatmul.msk.bf16.vlgmr.msra.gmra.mxu3 %vm534_vm9, %v2515_v51 }
0x21d0   :  { %v2555_v52 = vpop.f32.mrf.mxu3 }
0x21d1   :  { %v2556_v53 = vadd.f32 %v3170_v17, %v2555_v52 }
0x21d3   :  { %v2560_v54 = vadd.f32 %v2556_v53, %v2456_v41 }
0x21d5   :  { %v2562_v55 = vsel %vm171_vm0, %v2560_v54, 0.0 }
0x21d6   :  { %2563 = vadd.xlane.f32.xlu2 %v2562_v55 }
0x21d8   :  { %v2557_v56 = vpop.f32.mrf.mxu3 }
0x21d9   :  { %v2558_v18 = vadd.f32 %v3170_v17, %v2557_v56 }
0x21db   :  { %v2561_v34 = vadd.f32 %v2558_v18, %v2457_v29 }
0x21dd   :  { %v2565_v57 = vsel %vm171_vm0, %v2561_v34, 0.0 }
0x21de   :  { %2566 = vadd.xlane.f32.xlu1 %v2565_v57 }
0x2249   :  { %v2564_v58 = vpop.xlane.xlu2 %2563 }
0x224a   :  { %v2568_v59 = vmul.f32 %v2564_v58, %v3611_v33 }
0x224c   :  { %v2570_v60 = vsub.f32 %v2560_v54, %v2568_v59 }
0x224e   :  { %v2572_v61 = vmul.f32 %v2570_v60, %v2570_v60 }
0x2250   :  { %v2574_v62 = vsel %vm171_vm0, %v2572_v61, 0.0 }
0x2251   :  { %v2567_v43 = vpop.xlane.xlu1 %2566  ;;  %2575 = vadd.xlane.f32.xlu1 %v2574_v62 }
0x2252   :  { %v2569_v63 = vmul.f32 %v2567_v43, %v3611_v33 }
0x2254   :  { %v2571_v0 = vsub.f32 %v2561_v34, %v2569_v63 }
0x2256   :  { %v2573_v1 = vmul.f32 %v2571_v0, %v2571_v0 }
0x2258   :  { %v2577_v4 = vsel %vm171_vm0, %v2573_v1, 0.0 }
0x2259   :  { %2578 = vadd.xlane.f32.xlu1 %v2577_v4 }
0x22c4   :  { %v2576_v44 = vpop.xlane.xlu1 %2575 }
0x22c5   :  { %v2580_v35 = vmul.f32 %v2576_v44, %v3611_v33 }
0x22c7   :  { %v2582_v23 = vadd.f32 1e-05, %v2580_v35 }
0x22c9   :  { %3307 = vrsqrt.f32 %v2582_v23  ;;  %vm2590_vm5 = vweird.f32 %v2582_v23 }
0x22cc   :  { %v2579_v49 = vpop.xlane.xlu1 %2578 }
0x22cd   :  { %v2581_v6 = vmul.f32 %v2579_v49, %v3611_v33  ;;  %v3171_v33 = vld [vmem:[%s3545_s17 + $0x1] ss:$0 sm:$0xff]  ;;  %s3379_s17 = smov [#allocation2]  }
0x22ce   :  { %s2656_s27 = sshll.u32 %s3379_s17, 4  ;;  %s2657_s27 = int_to_ptr.vmem [resolvable:$true] %s2656_s27 }
0x22cf   :  { %v3308_v37 = vpop.eup %3307  ;;  %v2583_v7 = vadd.f32 1e-05, %v2581_v6 }
0x22d0   :  { %v2585_v8 = vmul.f32 %v3308_v37, %v2582_v23  ;;  %vm2591_vm9 = vweird.f32 %v3308_v37 }
0x22d1   :  { %3309 = vrsqrt.f32 %v2583_v7  ;;  %vm2592_vm6 = vmor %vm2590_vm5, %vm2591_vm9  ;;  %vm2600_vm8 = vweird.f32 %v2583_v7 }
0x22d2   :  { %v2586_v32 = vmul.f32 %v3308_v37, %v2585_v8 }
0x22d4   :  { %v2587_v25 = vmul.f32 0.5, %v2586_v32 }
0x22d6   :  { %v2588_v12 = vsub.f32 1.5, %v2587_v25 }
0x22d7   :  { %v3310_v13 = vpop.eup %3309 }
0x22d8   :  { %v2589_v15 = vmul.f32 %v3308_v37, %v2588_v12  ;;  %v2595_v16 = vmul.f32 %v3310_v13, %v2583_v7  ;;  %vm2601_vm7 = vweird.f32 %v3310_v13 }
0x22d9   :  { %vm2602_vm10 = vmor %vm2600_vm8, %vm2601_vm7 }
0x22da   :  { %v2596_v20 = vmul.f32 %v3310_v13, %v2595_v16  ;;  %v2593_v21 = vsel %vm2592_vm6, %v3308_v37, %v2589_v15 }
0x22db   :  { %v2604_v19 = vmul.f32 %v2593_v21, %v2570_v60 }
0x22dc   :  { %v2597_v9 = vmul.f32 0.5, %v2596_v20 }
0x22dd   :  { %v2609_v30 = vmul.f32 %v3171_v33, %v2604_v19 }
0x22de   :  { %v2598_v22 = vsub.f32 1.5, %v2597_v9 }
0x22df   :  { %v2614_v47 = vadd.f32 %v3172_v28, %v2609_v30 }
0x22e0   :  { %v2599_v26 = vmul.f32 %v3310_v13, %v2598_v22 }
0x22e2   :  { %v2603_v27 = vsel %vm2602_vm10, %v3310_v13, %v2599_v26 }
0x22e3   :  { %v2605_v2 = vmul.f32 %v2603_v27, %v2571_v0 }
0x22e5   :  { %v2610_v36 = vmul.f32 %v3171_v33, %v2605_v2 }
0x22e7   :  { %v2615_v3 = vadd.f32 %v3172_v28, %v2610_v36 }
0x22e9   :  { %v2616_v41 = vpack.c.bf16 %v2615_v3, %v2614_v47 }
0x22eb   :  { %3041 = vmatmul.msk.bf16.vlgmr.msrb.gmra.mxu2 %vm171_vm0, %v2616_v41 }
0x236e   :  { %v2645_v29 = vpop.f32.mrf.mxu2 }
0x236f   :  { %2650 = vst.msk [vmem:[#allocation2] sm:$0xff] %vm200_vm1, %v2645_v29 }
0x2376   :  { %v2647_v38 = vpop.f32.mrf.mxu2 }
0x2377   :  { %2651 = vst.msk [vmem:[#allocation2 + $0x8] sm:$0xff] %vm200_vm1, %v2647_v38 }
0x2378   :  { %3336 = shalt.err (!%p3333_p4)
}
0x2379   :  { %s3380_s10 = smov 128   ;;  %s3381_s11 = smov 8  }
0x237a   :  { %2664 = dma.vmem_to_hbm [thread:$0]  %s2657_s27, 256, %s2659_s4, [#allocation3], %s3380_s10, %s3380_s10, %s3381_s11  }
0x237b   :  { %3337 = dma.done.wait [#allocation3], 256  }
0x237c   :  { %3338 = vsyncadd [#allocation3], 4294967040 }
0x237d   :  { %2669 = vsyncpa [#allocation3], 1 }

</bundles_post_ra>
